<compile_context>
chip_gen: v7x
topology: tpu7x:2x2x1
jax: 0.10.0
libtpu: 0.0.40
codegen_flags: <defaults>
</compile_context>

<pallas_src>
import functools
import math

import jax
import jax.numpy as jnp
from jax.experimental import pallas as pl
from jax.experimental.pallas import tpu as pltpu


LRELU_SLOPE = 0.2
BN_EPS = 0.8  # BatchNorm1d(out_feat, 0.8): second positional arg is eps


# ------------------------------ fused kernel --------------------------------

def _generator_fused_kernel(z_ref,
                            w0_ref, b0_ref,
                            w1_ref, b1_ref, g1_ref, bt1_ref,
                            w2_ref, b2_ref, g2_ref, bt2_ref,
                            w3_ref, b3_ref, g3_ref, bt3_ref,
                            w4_ref, b4_ref,
                            o_ref, *, eps):
    """Whole generator forward on one (B, ...) tile resident in VMEM."""

    def linear(x_f32, w_ref, b_ref):
        # bf16 operands on the MXU, f32 accumulation.
        y = jnp.dot(x_f32.astype(jnp.bfloat16), w_ref[...],
                    preferred_element_type=jnp.float32)
        return y + b_ref[...]                      # (1, N) broadcasts over batch

    def lrelu(y):
        return jnp.where(y > 0, y, LRELU_SLOPE * y)

    def bn_lrelu(y, g_ref, bt_ref):
        # Training-mode BatchNorm1d: biased batch stats, computed in f32.
        mean = jnp.mean(y, axis=0, keepdims=True)
        var = jnp.mean((y - mean) ** 2, axis=0, keepdims=True)
        y = (y - mean) * jax.lax.rsqrt(var + eps)
        y = y * g_ref[...] + bt_ref[...]
        return lrelu(y)

    h = lrelu(linear(z_ref[...], w0_ref, b0_ref))                       # latent -> 128
    h = bn_lrelu(linear(h, w1_ref, b1_ref), g1_ref, bt1_ref)            # 128 -> 256
    h = bn_lrelu(linear(h, w2_ref, b2_ref), g2_ref, bt2_ref)            # 256 -> 512
    h = bn_lrelu(linear(h, w3_ref, b3_ref), g3_ref, bt3_ref)            # 512 -> 1024
    y = linear(h, w4_ref, b4_ref)                                       # 1024 -> C*H*W
    o_ref[...] = jnp.tanh(y).astype(o_ref.dtype)


# ------------------------------ parameter init -------------------------------

def init_linear(key, in_feat, out_feat, pad_in_to=None):
    """PyTorch-style Linear init: U(-1/sqrt(fan_in), 1/sqrt(fan_in)).

    Weights are stored (in, out) in bf16 (MXU operand dtype); biases stay f32.
    Optionally zero-pads the input dimension to `pad_in_to` rows (lane align).
    """
    kw, kb = jax.random.split(key)
    bound = 1.0 / math.sqrt(in_feat)
    w = jax.random.uniform(kw, (in_feat, out_feat), jnp.float32, -bound, bound)
    b = jax.random.uniform(kb, (1, out_feat), jnp.float32, -bound, bound)
    if pad_in_to is not None and pad_in_to > in_feat:
        w = jnp.pad(w, ((0, pad_in_to - in_feat), (0, 0)))   # zero rows: no effect
    return w.astype(jnp.bfloat16), b


def init_generator_params(key, latent_dim, img_area):
    # Lane-align the first matmul's contraction dim to a multiple of 128.
    latent_pad = max(128, ((latent_dim + 127) // 128) * 128)
    sizes = [(latent_dim, 128), (128, 256), (256, 512), (512, 1024), (1024, img_area)]
    keys = jax.random.split(key, len(sizes))
    params = {}
    for idx, (k, (i, o)) in enumerate(zip(keys, sizes)):
        pad_to = latent_pad if idx == 0 else None
        w, b = init_linear(k, i, o, pad_in_to=pad_to)
        params[f"w{idx}"] = w
        params[f"b{idx}"] = b
    # BatchNorm affine params (gamma=1, beta=0) for layers 1, 2, 3
    for idx, feat in zip((1, 2, 3), (256, 512, 1024)):
        params[f"g{idx}"] = jnp.ones((1, feat), jnp.float32)
        params[f"beta{idx}"] = jnp.zeros((1, feat), jnp.float32)
    return params


# --------------------------------- forward -----------------------------------

def generator_forward(params, z, channels, img_size):
    """Replicates Generator.forward(z) -> (B, channels, img_size, img_size)."""
    B, latent_dim = z.shape
    img_area = channels * img_size * img_size

    # Static (shape-derived) padded latent width — safe under jit tracing.
    latent_pad = params["w0"].shape[0]
    if latent_pad > latent_dim:
        # Zero-pad latent to lane-aligned width (w0 has matching zero rows).
        z = jnp.pad(z, ((0, 0), (0, latent_pad - latent_dim)))

    vmem = pl.BlockSpec(memory_space=pltpu.MemorySpace.VMEM)  # whole array in VMEM
    flat = pl.pallas_call(
        functools.partial(_generator_fused_kernel, eps=BN_EPS),
        out_shape=jax.ShapeDtypeStruct((B, img_area), jnp.float32),
        in_specs=[vmem] * 17,
        out_specs=vmem,
    )(z,
      params["w0"], params["b0"],
      params["w1"], params["b1"], params["g1"], params["beta1"],
      params["w2"], params["b2"], params["g2"], params["beta2"],
      params["w3"], params["b3"], params["g3"], params["beta3"],
      params["w4"], params["b4"])

    return flat.reshape(B, channels, img_size, img_size)


# ----------------------------------- main -------------------------------------

if __name__ == "__main__":
    channels = 1
    img_size = 16
    latent_dim = 64
    batch = 8
    img_area = channels * img_size * img_size

    key = jax.random.PRNGKey(0)
    k_params, k_z = jax.random.split(key)
    params = init_generator_params(k_params, latent_dim, img_area)
    z = jax.random.normal(k_z, (batch, latent_dim), jnp.float32)

    fwd = jax.jit(functools.partial(generator_forward,
                                    channels=channels, img_size=img_size))
    imgs = fwd(params, z)
    jax.block_until_ready(imgs)

    assert imgs.shape == (batch, channels, img_size, img_size), imgs.shape
    assert bool(jnp.all(jnp.isfinite(imgs)))
    assert bool(jnp.all(jnp.abs(imgs) <= 1.0))  # tanh output range
    print("KERNEL_OK")
</pallas_src>

<mosaic_0001>
module attributes {stable_mosaic.version = 11 : i64} {
  func.func @_generator_fused_kernel(%arg0: memref<8x128xf32, #tpu.memory_space<vmem>>, %arg1: memref<128x128xbf16, #tpu.memory_space<vmem>>, %arg2: memref<1x128xf32, #tpu.memory_space<vmem>>, %arg3: memref<128x256xbf16, #tpu.memory_space<vmem>>, %arg4: memref<1x256xf32, #tpu.memory_space<vmem>>, %arg5: memref<1x256xf32, #tpu.memory_space<vmem>>, %arg6: memref<1x256xf32, #tpu.memory_space<vmem>>, %arg7: memref<256x512xbf16, #tpu.memory_space<vmem>>, %arg8: memref<1x512xf32, #tpu.memory_space<vmem>>, %arg9: memref<1x512xf32, #tpu.memory_space<vmem>>, %arg10: memref<1x512xf32, #tpu.memory_space<vmem>>, %arg11: memref<512x1024xbf16, #tpu.memory_space<vmem>>, %arg12: memref<1x1024xf32, #tpu.memory_space<vmem>>, %arg13: memref<1x1024xf32, #tpu.memory_space<vmem>>, %arg14: memref<1x1024xf32, #tpu.memory_space<vmem>>, %arg15: memref<1024x256xbf16, #tpu.memory_space<vmem>>, %arg16: memref<1x256xf32, #tpu.memory_space<vmem>>, %arg17: memref<8x256xf32, #tpu.memory_space<vmem>>) attributes {dimension_semantics = [], scalar_prefetch = 0 : i64, scratch_operands = 0 : i64, tpu.core_type = #tpu.core_type<tc>} {
    %c0 = arith.constant 0 : index
    %c0_0 = arith.constant 0 : index
    %0 = vector.load %arg0[%c0, %c0_0] : memref<8x128xf32, #tpu.memory_space<vmem>>, vector<8x128xf32>
    %1 = arith.truncf %0 : vector<8x128xf32> to vector<8x128xbf16>
    %c0_1 = arith.constant 0 : index
    %c0_2 = arith.constant 0 : index
    %2 = vector.load %arg1[%c0_1, %c0_2] : memref<128x128xbf16, #tpu.memory_space<vmem>>, vector<128x128xbf16>
    %cst = arith.constant dense<0.000000e+00> : vector<8x128xf32>
    %3 = tpu.matmul %1, %2, %cst {dimension_numbers = #tpu.dot_dimension_numbers<[1], [0], [0], [1], [0, 0, 1, 1], [], []>} : vector<8x128xbf16>, vector<128x128xbf16>, vector<8x128xf32> -> vector<8x128xf32>
    %c0_3 = arith.constant 0 : index
    %c0_4 = arith.constant 0 : index
    %4 = vector.load %arg2[%c0_3, %c0_4] : memref<1x128xf32, #tpu.memory_space<vmem>>, vector<1x128xf32>
    %5 = vector.broadcast %4 : vector<1x128xf32> to vector<8x128xf32>
    %6 = arith.addf %3, %5 : vector<8x128xf32>
    %cst_5 = arith.constant 0.000000e+00 : f32
    %7 = vector.broadcast %cst_5 : f32 to vector<8x128xf32>
    %8 = arith.cmpf ogt, %6, %7 : vector<8x128xf32>
    %cst_6 = arith.constant 2.000000e-01 : f32
    %9 = vector.broadcast %cst_6 : f32 to vector<8x128xf32>
    %10 = arith.mulf %9, %6 : vector<8x128xf32>
    %11 = arith.select %8, %6, %10 : vector<8x128xi1>, vector<8x128xf32>
    %12 = arith.truncf %11 : vector<8x128xf32> to vector<8x128xbf16>
    %c0_7 = arith.constant 0 : index
    %c0_8 = arith.constant 0 : index
    %13 = vector.load %arg3[%c0_7, %c0_8] : memref<128x256xbf16, #tpu.memory_space<vmem>>, vector<128x256xbf16>
    %cst_9 = arith.constant dense<0.000000e+00> : vector<8x256xf32>
    %14 = tpu.matmul %12, %13, %cst_9 {dimension_numbers = #tpu.dot_dimension_numbers<[1], [0], [0], [1], [0, 0, 1, 1], [], []>} : vector<8x128xbf16>, vector<128x256xbf16>, vector<8x256xf32> -> vector<8x256xf32>
    %c0_10 = arith.constant 0 : index
    %c0_11 = arith.constant 0 : index
    %15 = vector.load %arg4[%c0_10, %c0_11] : memref<1x256xf32, #tpu.memory_space<vmem>>, vector<1x256xf32>
    %16 = vector.broadcast %15 : vector<1x256xf32> to vector<8x256xf32>
    %17 = arith.addf %14, %16 : vector<8x256xf32>
    %cst_12 = arith.constant dense<0.000000e+00> : vector<256xf32>
    %18 = vector.multi_reduction <add>, %17, %cst_12 [0] : vector<8x256xf32> to vector<256xf32>
    %19 = vector.shape_cast %18 : vector<256xf32> to vector<1x256xf32>
    %cst_13 = arith.constant 8.000000e+00 : f32
    %20 = vector.broadcast %cst_13 : f32 to vector<1x256xf32>
    %21 = arith.divf %19, %20 : vector<1x256xf32>
    %22 = vector.broadcast %21 : vector<1x256xf32> to vector<8x256xf32>
    %23 = arith.subf %17, %22 : vector<8x256xf32>
    %24 = arith.mulf %23, %23 : vector<8x256xf32>
    %cst_14 = arith.constant dense<0.000000e+00> : vector<256xf32>
    %25 = vector.multi_reduction <add>, %24, %cst_14 [0] : vector<8x256xf32> to vector<256xf32>
    %26 = vector.shape_cast %25 : vector<256xf32> to vector<1x256xf32>
    %cst_15 = arith.constant 8.000000e+00 : f32
    %27 = vector.broadcast %cst_15 : f32 to vector<1x256xf32>
    %28 = arith.divf %26, %27 : vector<1x256xf32>
    %29 = vector.broadcast %21 : vector<1x256xf32> to vector<8x256xf32>
    %30 = arith.subf %17, %29 : vector<8x256xf32>
    %cst_16 = arith.constant 8.000000e-01 : f32
    %31 = vector.broadcast %cst_16 : f32 to vector<1x256xf32>
    %32 = arith.addf %28, %31 : vector<1x256xf32>
    %33 = math.rsqrt %32 : vector<1x256xf32>
    %34 = vector.broadcast %33 : vector<1x256xf32> to vector<8x256xf32>
    %35 = arith.mulf %30, %34 : vector<8x256xf32>
    %c0_17 = arith.constant 0 : index
    %c0_18 = arith.constant 0 : index
    %36 = vector.load %arg5[%c0_17, %c0_18] : memref<1x256xf32, #tpu.memory_space<vmem>>, vector<1x256xf32>
    %37 = vector.broadcast %36 : vector<1x256xf32> to vector<8x256xf32>
    %38 = arith.mulf %35, %37 : vector<8x256xf32>
    %c0_19 = arith.constant 0 : index
    %c0_20 = arith.constant 0 : index
    %39 = vector.load %arg6[%c0_19, %c0_20] : memref<1x256xf32, #tpu.memory_space<vmem>>, vector<1x256xf32>
    %40 = vector.broadcast %39 : vector<1x256xf32> to vector<8x256xf32>
    %41 = arith.addf %38, %40 : vector<8x256xf32>
    %cst_21 = arith.constant 0.000000e+00 : f32
    %42 = vector.broadcast %cst_21 : f32 to vector<8x256xf32>
    %43 = arith.cmpf ogt, %41, %42 : vector<8x256xf32>
    %cst_22 = arith.constant 2.000000e-01 : f32
    %44 = vector.broadcast %cst_22 : f32 to vector<8x256xf32>
    %45 = arith.mulf %44, %41 : vector<8x256xf32>
    %46 = arith.select %43, %41, %45 : vector<8x256xi1>, vector<8x256xf32>
    %47 = arith.truncf %46 : vector<8x256xf32> to vector<8x256xbf16>
    %c0_23 = arith.constant 0 : index
    %c0_24 = arith.constant 0 : index
    %48 = vector.load %arg7[%c0_23, %c0_24] : memref<256x512xbf16, #tpu.memory_space<vmem>>, vector<256x512xbf16>
    %cst_25 = arith.constant dense<0.000000e+00> : vector<8x512xf32>
    %49 = tpu.matmul %47, %48, %cst_25 {dimension_numbers = #tpu.dot_dimension_numbers<[1], [0], [0], [1], [0, 0, 1, 1], [], []>} : vector<8x256xbf16>, vector<256x512xbf16>, vector<8x512xf32> -> vector<8x512xf32>
    %c0_26 = arith.constant 0 : index
    %c0_27 = arith.constant 0 : index
    %50 = vector.load %arg8[%c0_26, %c0_27] : memref<1x512xf32, #tpu.memory_space<vmem>>, vector<1x512xf32>
    %51 = vector.broadcast %50 : vector<1x512xf32> to vector<8x512xf32>
    %52 = arith.addf %49, %51 : vector<8x512xf32>
    %cst_28 = arith.constant dense<0.000000e+00> : vector<512xf32>
    %53 = vector.multi_reduction <add>, %52, %cst_28 [0] : vector<8x512xf32> to vector<512xf32>
    %54 = vector.shape_cast %53 : vector<512xf32> to vector<1x512xf32>
    %cst_29 = arith.constant 8.000000e+00 : f32
    %55 = vector.broadcast %cst_29 : f32 to vector<1x512xf32>
    %56 = arith.divf %54, %55 : vector<1x512xf32>
    %57 = vector.broadcast %56 : vector<1x512xf32> to vector<8x512xf32>
    %58 = arith.subf %52, %57 : vector<8x512xf32>
    %59 = arith.mulf %58, %58 : vector<8x512xf32>
    %cst_30 = arith.constant dense<0.000000e+00> : vector<512xf32>
    %60 = vector.multi_reduction <add>, %59, %cst_30 [0] : vector<8x512xf32> to vector<512xf32>
    %61 = vector.shape_cast %60 : vector<512xf32> to vector<1x512xf32>
    %cst_31 = arith.constant 8.000000e+00 : f32
    %62 = vector.broadcast %cst_31 : f32 to vector<1x512xf32>
    %63 = arith.divf %61, %62 : vector<1x512xf32>
    %64 = vector.broadcast %56 : vector<1x512xf32> to vector<8x512xf32>
    %65 = arith.subf %52, %64 : vector<8x512xf32>
    %cst_32 = arith.constant 8.000000e-01 : f32
    %66 = vector.broadcast %cst_32 : f32 to vector<1x512xf32>
    %67 = arith.addf %63, %66 : vector<1x512xf32>
    %68 = math.rsqrt %67 : vector<1x512xf32>
    %69 = vector.broadcast %68 : vector<1x512xf32> to vector<8x512xf32>
    %70 = arith.mulf %65, %69 : vector<8x512xf32>
    %c0_33 = arith.constant 0 : index
    %c0_34 = arith.constant 0 : index
    %71 = vector.load %arg9[%c0_33, %c0_34] : memref<1x512xf32, #tpu.memory_space<vmem>>, vector<1x512xf32>
    %72 = vector.broadcast %71 : vector<1x512xf32> to vector<8x512xf32>
    %73 = arith.mulf %70, %72 : vector<8x512xf32>
    %c0_35 = arith.constant 0 : index
    %c0_36 = arith.constant 0 : index
    %74 = vector.load %arg10[%c0_35, %c0_36] : memref<1x512xf32, #tpu.memory_space<vmem>>, vector<1x512xf32>
    %75 = vector.broadcast %74 : vector<1x512xf32> to vector<8x512xf32>
    %76 = arith.addf %73, %75 : vector<8x512xf32>
    %cst_37 = arith.constant 0.000000e+00 : f32
    %77 = vector.broadcast %cst_37 : f32 to vector<8x512xf32>
    %78 = arith.cmpf ogt, %76, %77 : vector<8x512xf32>
    %cst_38 = arith.constant 2.000000e-01 : f32
    %79 = vector.broadcast %cst_38 : f32 to vector<8x512xf32>
    %80 = arith.mulf %79, %76 : vector<8x512xf32>
    %81 = arith.select %78, %76, %80 : vector<8x512xi1>, vector<8x512xf32>
    %82 = arith.truncf %81 : vector<8x512xf32> to vector<8x512xbf16>
    %c0_39 = arith.constant 0 : index
    %c0_40 = arith.constant 0 : index
    %83 = vector.load %arg11[%c0_39, %c0_40] : memref<512x1024xbf16, #tpu.memory_space<vmem>>, vector<512x1024xbf16>
    %cst_41 = arith.constant dense<0.000000e+00> : vector<8x1024xf32>
    %84 = tpu.matmul %82, %83, %cst_41 {dimension_numbers = #tpu.dot_dimension_numbers<[1], [0], [0], [1], [0, 0, 1, 1], [], []>} : vector<8x512xbf16>, vector<512x1024xbf16>, vector<8x1024xf32> -> vector<8x1024xf32>
    %c0_42 = arith.constant 0 : index
    %c0_43 = arith.constant 0 : index
    %85 = vector.load %arg12[%c0_42, %c0_43] : memref<1x1024xf32, #tpu.memory_space<vmem>>, vector<1x1024xf32>
    %86 = vector.broadcast %85 : vector<1x1024xf32> to vector<8x1024xf32>
    %87 = arith.addf %84, %86 : vector<8x1024xf32>
    %cst_44 = arith.constant dense<0.000000e+00> : vector<1024xf32>
    %88 = vector.multi_reduction <add>, %87, %cst_44 [0] : vector<8x1024xf32> to vector<1024xf32>
    %89 = vector.shape_cast %88 : vector<1024xf32> to vector<1x1024xf32>
    %cst_45 = arith.constant 8.000000e+00 : f32
    %90 = vector.broadcast %cst_45 : f32 to vector<1x1024xf32>
    %91 = arith.divf %89, %90 : vector<1x1024xf32>
    %92 = vector.broadcast %91 : vector<1x1024xf32> to vector<8x1024xf32>
    %93 = arith.subf %87, %92 : vector<8x1024xf32>
    %94 = arith.mulf %93, %93 : vector<8x1024xf32>
    %cst_46 = arith.constant dense<0.000000e+00> : vector<1024xf32>
    %95 = vector.multi_reduction <add>, %94, %cst_46 [0] : vector<8x1024xf32> to vector<1024xf32>
    %96 = vector.shape_cast %95 : vector<1024xf32> to vector<1x1024xf32>
    %cst_47 = arith.constant 8.000000e+00 : f32
    %97 = vector.broadcast %cst_47 : f32 to vector<1x1024xf32>
    %98 = arith.divf %96, %97 : vector<1x1024xf32>
    %99 = vector.broadcast %91 : vector<1x1024xf32> to vector<8x1024xf32>
    %100 = arith.subf %87, %99 : vector<8x1024xf32>
    %cst_48 = arith.constant 8.000000e-01 : f32
    %101 = vector.broadcast %cst_48 : f32 to vector<1x1024xf32>
    %102 = arith.addf %98, %101 : vector<1x1024xf32>
    %103 = math.rsqrt %102 : vector<1x1024xf32>
    %104 = vector.broadcast %103 : vector<1x1024xf32> to vector<8x1024xf32>
    %105 = arith.mulf %100, %104 : vector<8x1024xf32>
    %c0_49 = arith.constant 0 : index
    %c0_50 = arith.constant 0 : index
    %106 = vector.load %arg13[%c0_49, %c0_50] : memref<1x1024xf32, #tpu.memory_space<vmem>>, vector<1x1024xf32>
    %107 = vector.broadcast %106 : vector<1x1024xf32> to vector<8x1024xf32>
    %108 = arith.mulf %105, %107 : vector<8x1024xf32>
    %c0_51 = arith.constant 0 : index
    %c0_52 = arith.constant 0 : index
    %109 = vector.load %arg14[%c0_51, %c0_52] : memref<1x1024xf32, #tpu.memory_space<vmem>>, vector<1x1024xf32>
    %110 = vector.broadcast %109 : vector<1x1024xf32> to vector<8x1024xf32>
    %111 = arith.addf %108, %110 : vector<8x1024xf32>
    %cst_53 = arith.constant 0.000000e+00 : f32
    %112 = vector.broadcast %cst_53 : f32 to vector<8x1024xf32>
    %113 = arith.cmpf ogt, %111, %112 : vector<8x1024xf32>
    %cst_54 = arith.constant 2.000000e-01 : f32
    %114 = vector.broadcast %cst_54 : f32 to vector<8x1024xf32>
    %115 = arith.mulf %114, %111 : vector<8x1024xf32>
    %116 = arith.select %113, %111, %115 : vector<8x1024xi1>, vector<8x1024xf32>
    %117 = arith.truncf %116 : vector<8x1024xf32> to vector<8x1024xbf16>
    %c0_55 = arith.constant 0 : index
    %c0_56 = arith.constant 0 : index
    %118 = vector.load %arg15[%c0_55, %c0_56] : memref<1024x256xbf16, #tpu.memory_space<vmem>>, vector<1024x256xbf16>
    %cst_57 = arith.constant dense<0.000000e+00> : vector<8x256xf32>
    %119 = tpu.matmul %117, %118, %cst_57 {dimension_numbers = #tpu.dot_dimension_numbers<[1], [0], [0], [1], [0, 0, 1, 1], [], []>} : vector<8x1024xbf16>, vector<1024x256xbf16>, vector<8x256xf32> -> vector<8x256xf32>
    %c0_58 = arith.constant 0 : index
    %c0_59 = arith.constant 0 : index
    %120 = vector.load %arg16[%c0_58, %c0_59] : memref<1x256xf32, #tpu.memory_space<vmem>>, vector<1x256xf32>
    %121 = vector.broadcast %120 : vector<1x256xf32> to vector<8x256xf32>
    %122 = arith.addf %119, %121 : vector<8x256xf32>
    %123 = math.tanh %122 : vector<8x256xf32>
    %c0_60 = arith.constant 0 : index
    %c0_61 = arith.constant 0 : index
    %124 = vector.load %arg17[%c0_60, %c0_61] : memref<8x256xf32, #tpu.memory_space<vmem>>, vector<8x256xf32>
    tpu.vector_store %arg17[%c0_60, %c0_61], %123 {strides = array<i32>} : memref<8x256xf32, #tpu.memory_space<vmem>>, vector<8x256xf32>,
    return
  }
}

</mosaic_0001>

<bundles_post_ra>
// kernel: generator_forward.1
= control target key start
LH: loop header
LB: loop body
LE: loop exit
PB: predicated region body
PF: predicated region fallthrough
CT: control target
= control target key end

     0   :  { %s5953_s0 = inlined_call_operand.vmem [shape: f32[8,128], index: 0, kind: input, shape index: {}]   ;;  %s5954_s1 = inlined_call_operand.hbm [shape: bf16[128,128], index: 1, kind: input, shape index: {}]   ;;  %s5955_s2 = inlined_call_operand.hbm [shape: f32[1,128], index: 2, kind: input, shape index: {}]   ;;  %s5956_s3 = inlined_call_operand.hbm [shape: bf16[128,256], index: 3, kind: input, shape index: {}]   ;;  %s5957_s4 = inlined_call_operand.hbm [shape: f32[1,256], index: 4, kind: input, shape index: {}]   ;;  %s5958_s5 = inlined_call_operand.vmem [shape: f32[1,256], index: 5, kind: input, shape index: {}]   ;;  %s5959_s6 = inlined_call_operand.hbm [shape: f32[1,256], index: 6, kind: input, shape index: {}]   ;;  %s5960_s7 = inlined_call_operand.hbm [shape: bf16[256,512], index: 7, kind: input, shape index: {}]   ;;  %s5961_s8 = inlined_call_operand.hbm [shape: f32[1,512], index: 8, kind: input, shape index: {}]   ;;  %s5962_s9 = inlined_call_operand.vmem [shape: f32[1,512], index: 9, kind: input, shape index: {}]   ;;  %s5963_s10 = inlined_call_operand.hbm [shape: f32[1,512], index: 10, kind: input, shape index: {}]   ;;  %s5964_s11 = inlined_call_operand.hbm [shape: bf16[512,1024], index: 11, kind: input, shape index: {}]   ;;  %s5965_s12 = inlined_call_operand.vmem [shape: f32[1,1024], index: 12, kind: input, shape index: {}]   ;;  %s5966_s13 = inlined_call_operand.vmem [shape: f32[1,1024], index: 13, kind: input, shape index: {}]   ;;  %s5967_s14 = inlined_call_operand.vmem [shape: f32[1,1024], index: 14, kind: input, shape index: {}]   ;;  %s5968_s15 = inlined_call_operand.hbm [shape: bf16[1024,256], index: 15, kind: input, shape index: {}]   ;;  %s5969_s16 = inlined_call_operand.hbm [shape: f32[1,256], index: 16, kind: input, shape index: {}]   ;;  %s5970_s17 = inlined_call_operand.vmem [shape: f32[8,256], index: 17, kind: output, shape index: {}]  }
   0x1   :  { %5972 = sst [smem:[#allocation25_spill]] %s5953_s0 }
   0x2   :  { %5973 = sst [smem:[#allocation26_spill]] %s5954_s1 }
   0x3   :  { %22 = vsyncpa [#allocation3], 0 }
   0x4   :  { %23 = vsyncpa [#allocation5], 0 }
   0x5   :  { %24 = vsyncpa [#allocation8], 0 }
   0x6   :  { %25 = vsyncpa [#allocation11], 0 }
   0x7   :  { %26 = vsyncpa [#allocation14], 0 }
   0x8   :  { %27 = vsyncpa [#allocation17], 0  ;;  %s5481_s24 = smov [#allocation4]   ;;  %s5482_s26 = smov [#allocation7]  }
   0x9   :  { %s48_s25 = sshll.u32 %s5481_s24, 4  ;;  %s70_s27 = sshll.u32 %s5482_s26, 4  ;;  %s49_s25 = int_to_ptr.vmem [resolvable:$true] %s48_s25  ;;  %s71_s27 = int_to_ptr.vmem [resolvable:$true] %s70_s27 }
   0xa   :  { %s5227_s0 = scalar_lea.hbm %s5955_s2, 16 }
   0xb   :  { %p5228_p0 = scmp.ne.s32.totalorder %s5955_s2, %s5227_s0  ;;  %p5231_p1 = scmp.lt.u32.totalorder %s5227_s0, %s5955_s2 }
   0xd   :  { %p5233_p2 = pnand %p5231_p1, %p5228_p0 }
   0xf   :  { %5236 = shalt.err (!%p5233_p2)
}
  0x10   :  { %s5237_s20 = scalar_lea.vmem %s49_s25, 16  ;;  %s5241_s21 = scalar_lea.vmem %s49_s25, 32 }
  0x11   :  { %p5238_p3 = scmp.ne.s32.totalorder %s49_s25, %s5237_s20  ;;  %p5242_p4 = scmp.lt.s32.totalorder %s49_s25, %s49_s25 }
  0x12   :  { %p5243_p5 = scmp.lt.s32.totalorder %s5241_s21, %s5237_s20 }
  0x14   :  { %p5244_p6 = por %p5243_p5, %p5242_p4 }
  0x16   :  { %p5245_p7 = pnand %p5244_p6, %p5238_p3 }
  0x18   :  { %5248 = shalt.err (!%p5245_p7)
}
  0x19   :  { %51 = dma.hbm_to_vmem [thread:$0]  %s5955_s2, 16, %s49_s25, [#allocation5]  }
  0x1a   :  { %s5249_s28 = scalar_lea.hbm %s5957_s4, 32 }
  0x1b   :  { %p5250_p8 = scmp.ne.s32.totalorder %s5957_s4, %s5249_s28  ;;  %p5253_p9 = scmp.lt.u32.totalorder %s5249_s28, %s5957_s4 }
  0x1d   :  { %p5255_p10 = pnand %p5253_p9, %p5250_p8 }
  0x1f   :  { %5258 = shalt.err (!%p5255_p10)
}
  0x20   :  { %s5259_s19 = scalar_lea.vmem %s71_s27, 32  ;;  %p5264_p12 = scmp.lt.s32.totalorder %s71_s27, %s71_s27 }
  0x21   :  { %p5260_p11 = scmp.ne.s32.totalorder %s71_s27, %s5259_s19  ;;  %p5265_p13 = scmp.lt.s32.totalorder %s5259_s19, %s5259_s19 }
  0x23   :  { %p5266_p0 = por %p5265_p13, %p5264_p12 }
  0x25   :  { %p5267_p1 = pnand %p5266_p0, %p5260_p11 }
  0x27   :  { %5270 = shalt.err (!%p5267_p1)
}
  0x28   :  { %73 = dma.hbm_to_vmem [thread:$0]  %s5957_s4, 32, %s71_s27, [#allocation8]  }
  0x29   :  { %s5483_s1 = smov [#allocation10]   ;;  %s5271_s23 = scalar_lea.hbm %s5960_s7, 8192 }
  0x2a   :  { %s91_s20 = sshll.u32 %s5483_s1, 4  ;;  %p5272_p2 = scmp.ne.s32.totalorder %s5960_s7, %s5271_s23  ;;  %s92_s20 = int_to_ptr.vmem [resolvable:$true] %s91_s20 }
  0x2b   :  { %p5275_p3 = scmp.lt.u32.totalorder %s5271_s23, %s5960_s7 }
  0x2d   :  { %p5277_p4 = pnand %p5275_p3, %p5272_p2 }
  0x2f   :  { %5280 = shalt.err (!%p5277_p4)
}
  0x30   :  { %s5281_s0 = scalar_lea.vmem %s92_s20, 8192  ;;  %p5286_p6 = scmp.lt.s32.totalorder %s92_s20, %s92_s20 }
  0x31   :  { %p5282_p5 = scmp.ne.s32.totalorder %s92_s20, %s5281_s0  ;;  %p5287_p7 = scmp.lt.s32.totalorder %s5281_s0, %s5281_s0 }
  0x33   :  { %p5288_p8 = por %p5287_p7, %p5286_p6 }
  0x35   :  { %p5289_p9 = pnand %p5288_p8, %p5282_p5 }
  0x37   :  { %5292 = shalt.err (!%p5289_p9)
}
  0x38   :  { %s5484_s4 = smov 256   ;;  %s5485_s27 = smov 16  }
  0x39   :  { %97 = dma.hbm_to_vmem [thread:$0]  %s5960_s7, 8192, %s92_s20, [#allocation11], %s5484_s4, %s5484_s4, %s5485_s27  }
  0x3a   :  { %s5486_s19 = smov [#allocation13]   ;;  %s5293_s21 = scalar_lea.hbm %s5963_s10, 64 }
  0x3b   :  { %s116_s2 = sshll.u32 %s5486_s19, 4  ;;  %p5294_p10 = scmp.ne.s32.totalorder %s5963_s10, %s5293_s21  ;;  %s117_s2 = int_to_ptr.vmem [resolvable:$true] %s116_s2 }
  0x3c   :  { %p5297_p11 = scmp.lt.u32.totalorder %s5293_s21, %s5963_s10 }
  0x3e   :  { %p5299_p12 = pnand %p5297_p11, %p5294_p10 }
  0x40   :  { %5302 = shalt.err (!%p5299_p12)
}
  0x41   :  { %s5303_s28 = scalar_lea.vmem %s117_s2, 64  ;;  %p5308_p0 = scmp.lt.s32.totalorder %s117_s2, %s117_s2 }
  0x42   :  { %p5304_p13 = scmp.ne.s32.totalorder %s117_s2, %s5303_s28  ;;  %p5309_p1 = scmp.lt.s32.totalorder %s5303_s28, %s5303_s28 }
  0x44   :  { %p5310_p2 = por %p5309_p1, %p5308_p0 }
  0x46   :  { %p5311_p3 = pnand %p5310_p2, %p5304_p13 }
  0x48   :  { %5314 = shalt.err (!%p5311_p3)
}
  0x49   :  { %119 = dma.hbm_to_vmem [thread:$0]  %s5963_s10, 64, %s117_s2, [#allocation14]  }
  0x4a   :  { %s5487_s29 = smov [#allocation16]   ;;  %s5488_s4 = smov [#allocation2]  }
  0x4b   :  { %s143_s0 = sshll.u32 %s5487_s29, 4  ;;  %s35_s27 = sshll.u32 %s5488_s4, 4  ;;  %s144_s0 = int_to_ptr.vmem [resolvable:$true] %s143_s0  ;;  %s5641_s27 = int_to_ptr.vmem [resolvable:$true] %s35_s27 }
  0x4c   :  { %s5315_s19 = scalar_lea.hbm %s5968_s15, 16384 }
  0x4d   :  { %p5316_p4 = scmp.ne.s32.totalorder %s5968_s15, %s5315_s19  ;;  %p5319_p5 = scmp.lt.u32.totalorder %s5315_s19, %s5968_s15 }
  0x4f   :  { %p5321_p6 = pnand %p5319_p5, %p5316_p4 }
  0x51   :  { %5324 = shalt.err (!%p5321_p6)
}
  0x52   :  { %s5325_s10 = scalar_lea.vmem %s144_s0, 16384  ;;  %p5330_p8 = scmp.lt.s32.totalorder %s144_s0, %s144_s0 }
  0x53   :  { %p5326_p7 = scmp.ne.s32.totalorder %s144_s0, %s5325_s10  ;;  %p5331_p9 = scmp.lt.s32.totalorder %s5325_s10, %s5325_s10 }
  0x55   :  { %p5332_p10 = por %p5331_p9, %p5330_p8 }
  0x57   :  { %p5333_p11 = pnand %p5332_p10, %p5326_p7 }
  0x59   :  { %5336 = shalt.err (!%p5333_p11)
}
  0x5a   :  { %s5489_s2 = smov 128   ;;  %s5490_s23 = smov 8  }
  0x5b   :  { %149 = dma.hbm_to_vmem [thread:$0]  %s5968_s15, 16384, %s144_s0, [#allocation17], %s5489_s2, %s5489_s2, %s5490_s23  }
  0x5c   :  { %s5974_s20 = sld [smem:[#allocation26_spill]] }
  0x62   :  { %s5337_s29 = scalar_lea.hbm %s5974_s20, 1024 }
  0x63   :  { %p5338_p12 = scmp.ne.s32.totalorder %s5974_s20, %s5337_s29  ;;  %p5341_p13 = scmp.lt.u32.totalorder %s5337_s29, %s5974_s20 }
  0x65   :  { %p5343_p0 = pnand %p5341_p13, %p5338_p12 }
  0x67   :  { %5346 = shalt.err (!%p5343_p0)
}
  0x68   :  { %s5347_s25 = scalar_lea.vmem %s5641_s27, 1024  ;;  %p5352_p2 = scmp.lt.s32.totalorder %s5641_s27, %s5641_s27 }
  0x69   :  { %p5348_p1 = scmp.ne.s32.totalorder %s5641_s27, %s5347_s25  ;;  %p5353_p3 = scmp.lt.s32.totalorder %s5347_s25, %s5347_s25 }
  0x6b   :  { %p5354_p4 = por %p5353_p3, %p5352_p2 }
  0x6d   :  { %p5355_p5 = pnand %p5354_p4, %p5348_p1 }
  0x6f   :  { %5358 = shalt.err (!%p5355_p5)
}
  0x70   :  { %s5491_s15 = smov 64   ;;  %s5492_s0 = smov 4  }
  0x71   :  { %41 = dma.hbm_to_vmem [thread:$0]  %s5974_s20, 1024, %s5641_s27, [#allocation3], %s5491_s15, %s5491_s15, %s5492_s0  }
  0x72   :  { %s5493_s22 = smov [#allocation6]   ;;  %s5494_s24 = smov [#allocation9]  }
  0x73   :  { %s57_s10 = sshll.u32 %s5493_s22, 4  ;;  %s82_s26 = sshll.u32 %s5494_s24, 4  ;;  %s58_s10 = int_to_ptr.vmem [resolvable:$true] %s57_s10  ;;  %s83_s26 = int_to_ptr.vmem [resolvable:$true] %s82_s26 }
  0x74   :  { %s5359_s29 = scalar_lea.hbm %s5956_s3, 2048 }
  0x75   :  { %p5360_p6 = scmp.ne.s32.totalorder %s5956_s3, %s5359_s29  ;;  %p5363_p7 = scmp.lt.u32.totalorder %s5359_s29, %s5956_s3 }
  0x77   :  { %p5365_p8 = pnand %p5363_p7, %p5360_p6 }
  0x79   :  { %5368 = shalt.err (!%p5365_p8)
}
  0x7a   :  { %s5369_s27 = scalar_lea.vmem %s58_s10, 2048  ;;  %p5374_p10 = scmp.lt.s32.totalorder %s58_s10, %s58_s10 }
  0x7b   :  { %p5370_p9 = scmp.ne.s32.totalorder %s58_s10, %s5369_s27  ;;  %p5375_p11 = scmp.lt.s32.totalorder %s5369_s27, %s5369_s27 }
  0x7d   :  { %p5376_p12 = por %p5375_p11, %p5374_p10 }
  0x7f   :  { %p5377_p13 = pnand %p5376_p12, %p5370_p9 }
  0x81   :  { %5380 = shalt.err (!%p5377_p13)
}
  0x82   :  { %63 = dma.hbm_to_vmem [thread:$0]  %s5956_s3, 2048, %s58_s10, [#allocation5], %s5489_s2, %s5489_s2, %s5490_s23  }
  0x83   :  { %s5381_s1 = scalar_lea.hbm %s5959_s6, 32 }
  0x84   :  { %p5382_p0 = scmp.ne.s32.totalorder %s5959_s6, %s5381_s1  ;;  %p5385_p1 = scmp.lt.u32.totalorder %s5381_s1, %s5959_s6 }
  0x86   :  { %p5387_p2 = pnand %p5385_p1, %p5382_p0 }
  0x88   :  { %5390 = shalt.err (!%p5387_p2)
}
  0x89   :  { %s5391_s7 = scalar_lea.vmem %s83_s26, 32  ;;  %p5396_p4 = scmp.lt.s32.totalorder %s83_s26, %s83_s26 }
  0x8a   :  { %p5392_p3 = scmp.ne.s32.totalorder %s83_s26, %s5391_s7  ;;  %p5397_p5 = scmp.lt.s32.totalorder %s5391_s7, %s5391_s7 }
  0x8c   :  { %p5398_p6 = por %p5397_p5, %p5396_p4 }
  0x8e   :  { %p5399_p7 = pnand %p5398_p6, %p5392_p3 }
  0x90   :  { %5402 = shalt.err (!%p5399_p7)
}
  0x91   :  { %85 = dma.hbm_to_vmem [thread:$0]  %s5959_s6, 32, %s83_s26, [#allocation8]  }
  0x92   :  { %s5495_s23 = smov [#allocation12]   ;;  %s5496_s29 = smov [#allocation15]  }
  0x93   :  { %s104_s10 = sshll.u32 %s5495_s23, 4  ;;  %s125_s4 = sshll.u32 %s5496_s29, 4  ;;  %s105_s10 = int_to_ptr.vmem [resolvable:$true] %s104_s10  ;;  %s5702_s4 = int_to_ptr.vmem [resolvable:$true] %s125_s4 }
  0x94   :  { %s5403_s19 = scalar_lea.hbm %s5961_s8, 64 }
  0x95   :  { %p5404_p8 = scmp.ne.s32.totalorder %s5961_s8, %s5403_s19  ;;  %p5407_p9 = scmp.lt.u32.totalorder %s5403_s19, %s5961_s8 }
  0x97   :  { %p5409_p10 = pnand %p5407_p9, %p5404_p8 }
  0x99   :  { %5412 = shalt.err (!%p5409_p10)
}
  0x9a   :  { %s5413_s6 = scalar_lea.vmem %s105_s10, 64  ;;  %p5418_p12 = scmp.lt.s32.totalorder %s105_s10, %s105_s10 }
  0x9b   :  { %p5414_p11 = scmp.ne.s32.totalorder %s105_s10, %s5413_s6  ;;  %p5419_p13 = scmp.lt.s32.totalorder %s5413_s6, %s5413_s6 }
  0x9d   :  { %p5420_p0 = por %p5419_p13, %p5418_p12 }
  0x9f   :  { %p5421_p1 = pnand %p5420_p0, %p5414_p11 }
  0xa1   :  { %5424 = shalt.err (!%p5421_p1)
}
  0xa2   :  { %107 = dma.hbm_to_vmem [thread:$0]  %s5961_s8, 64, %s105_s10, [#allocation11]  }
  0xa3   :  { %s5425_s22 = scalar_lea.hbm %s5964_s11, 32768 }
  0xa4   :  { %p5426_p2 = scmp.ne.s32.totalorder %s5964_s11, %s5425_s22  ;;  %p5429_p3 = scmp.lt.u32.totalorder %s5425_s22, %s5964_s11 }
  0xa6   :  { %p5431_p4 = pnand %p5429_p3, %p5426_p2 }
  0xa8   :  { %5434 = shalt.err (!%p5431_p4)
}
  0xa9   :  { %s5435_s2 = scalar_lea.vmem %s5702_s4, 32768  ;;  %p5440_p6 = scmp.lt.s32.totalorder %s5702_s4, %s5702_s4 }
  0xaa   :  { %p5436_p5 = scmp.ne.s32.totalorder %s5702_s4, %s5435_s2  ;;  %p5441_p7 = scmp.lt.s32.totalorder %s5435_s2, %s5435_s2 }
  0xac   :  { %p5442_p8 = por %p5441_p7, %p5440_p6 }
  0xae   :  { %p5443_p9 = pnand %p5442_p8, %p5436_p5 }
  0xb0   :  { %5446 = shalt.err (!%p5443_p9)
}
  0xb1   :  { %s5497_s8 = smov 512   ;;  %s5498_s23 = smov 32  }
  0xb2   :  { %131 = dma.hbm_to_vmem [thread:$0]  %s5964_s11, 32768, %s5702_s4, [#allocation14], %s5497_s8, %s5497_s8, %s5498_s23  }
  0xb3   :  { %s5499_s30 = smov [#allocation18]   ;;  %s5447_s20 = scalar_lea.hbm %s5969_s16, 32 }
  0xb4   :  { %s156_s18 = sshll.u32 %s5499_s30, 4  ;;  %p5448_p10 = scmp.ne.s32.totalorder %s5969_s16, %s5447_s20  ;;  %s157_s18 = int_to_ptr.vmem [resolvable:$true] %s156_s18 }
  0xb5   :  { %p5451_p11 = scmp.lt.u32.totalorder %s5447_s20, %s5969_s16 }
  0xb7   :  { %p5453_p12 = pnand %p5451_p11, %p5448_p10 }
  0xb9   :  { %5456 = shalt.err (!%p5453_p12)
}
  0xba   :  { %s5457_s0 = scalar_lea.vmem %s157_s18, 32  ;;  %p5462_p0 = scmp.lt.s32.totalorder %s157_s18, %s157_s18 }
  0xbb   :  { %p5458_p13 = scmp.ne.s32.totalorder %s157_s18, %s5457_s0  ;;  %p5463_p1 = scmp.lt.s32.totalorder %s5457_s0, %s5457_s0 }
  0xbd   :  { %p5464_p2 = por %p5463_p1, %p5462_p0 }
  0xbf   :  { %p5465_p3 = pnand %p5464_p2, %p5458_p13 }
  0xc1   :  { %5468 = shalt.err (!%p5465_p3)
}
  0xc2   :  { %159 = dma.hbm_to_vmem [thread:$0]  %s5969_s16, 32, %s157_s18, [#allocation17]  }
  0xc3   :  { %5469 = dma.done.wait [#allocation3], 1024  }
  0xc4   :  { %5470 = vsyncadd [#allocation3], 4294966272 }
  0xc5   :  { %5471 = dma.done.wait [#allocation5], 2064  }
  0xc6   :  { %5472 = vsyncadd [#allocation5], 4294965232 }
  0xc7   :  { %5473 = dma.done.wait [#allocation8], 64  }
  0xc8   :  { %5474 = vsyncadd [#allocation8], 4294967232 }
  0xc9   :  { %5475 = dma.done.wait [#allocation11], 8256  }
  0xca   :  { %5476 = vsyncadd [#allocation11], 4294959040 }
  0xcb   :  { %5477 = dma.done.wait [#allocation14], 32832  }
  0xcc   :  { %5478 = vsyncadd [#allocation14], 4294934464 }
  0xcd   :  { %5479 = dma.done.wait [#allocation17], 16416  }
  0xce   :  { %5480 = vsyncadd [#allocation17], 4294950880  ;;  %v5500_v0 = vmov 0.0   ;;  %vm5501_vm0 = vmmov 0   ;;  %v4875_v1 = vld [vmem:[#allocation2] sm:$0xff]   ;;  %v4876_v2 = vld [vmem:[#allocation2 + $0x8] sm:$0xff]  }
  0xcf   :  { %4797 = vmatprep.subr.bf16.mxu0 %v5500_v0  ;;  %4813 = vmatprep.mubr.msk.bf16.mxu0 %vm5501_vm0, %v5500_v0  ;;  %v4877_v3 = vld [vmem:[#allocation2 + $0x10] sm:$0xff]   ;;  %v4885_v5 = vld [vmem:[#allocation6] ss:$8 sps:$4 sm:$0xff]   ;;  %v4878_v6 = vld [vmem:[#allocation2 + $0x18] sm:$0xff]   ;;  %s5975_s21 = sld [smem:[#allocation25_spill]]  ;;  %v5502_v27 = vmov 0  }
  0xd0   :  { %4798 = vmatpush3.bf16.msra.mxu0 %v4875_v1  ;;  %v4883_v4 = vld [vmem:[#allocation6 + $0x4] ss:$8 sps:$4 sm:$0xff]   ;;  %v4886_v7 = vld [vmem:[#allocation6 + $0x14] ss:$8 sps:$4 sm:$0xff]   ;;  %v4888_v8 = vld [vmem:[#allocation6 + $0x10] ss:$8 sps:$4 sm:$0xff]   ;;  %451 = vmatprep.mubr.bf16.mxu1 %v5502_v27 }
  0xd1   :  { %4799 = vmatprep.subr.bf16.mxu0 %v5500_v0  ;;  %419 = vmatprep.subr.bf16.mxu1 %v4883_v4  ;;  %v4889_v9 = vld [vmem:[#allocation6 + $0x24] ss:$8 sps:$4 sm:$0xff]   ;;  %v4891_v12 = vld [vmem:[#allocation6 + $0x20] ss:$8 sps:$4 sm:$0xff]   ;;  %v4892_v13 = vld [vmem:[#allocation6 + $0x34] ss:$8 sps:$4 sm:$0xff]  }
  0xd2   :  { %420 = vmatpush1.bf16.msra.mxu1 %v4885_v5  ;;  %v4879_v10 = vld [vmem:[#allocation2 + $0x20] sm:$0xff]   ;;  %v4880_v11 = vld [vmem:[#allocation2 + $0x28] sm:$0xff]   ;;  %v4894_v14 = vld [vmem:[#allocation6 + $0x30] ss:$8 sps:$4 sm:$0xff]  }
  0xd3   :  { %421 = vmatprep.subr.bf16.mxu1 %v4886_v7  ;;  %v4895_v15 = vld [vmem:[#allocation6 + $0x44] ss:$8 sps:$4 sm:$0xff]   ;;  %v4897_v17 = vld [vmem:[#allocation6 + $0x40] ss:$8 sps:$4 sm:$0xff]   ;;  %v4898_v18 = vld [vmem:[#allocation6 + $0x54] ss:$8 sps:$4 sm:$0xff]  }
  0xd4   :  { %4800 = vmatpush3.bf16.msra.mxu0 %v4876_v2  ;;  %v4881_v16 = vld [vmem:[#allocation2 + $0x30] sm:$0xff]   ;;  %v4882_v19 = vld [vmem:[#allocation2 + $0x38] sm:$0xff]   ;;  %v4903_v24 = vld [vmem:[#allocation6 + $0x60] ss:$8 sps:$4 sm:$0xff]  }
  0xd5   :  { %4801 = vmatprep.subr.bf16.mxu0 %v5500_v0  ;;  %v194_v20 = vld [vmem:[%s5975_s21] sm:$0xff]  ;;  %v4900_v21 = vld [vmem:[#allocation6 + $0x50] ss:$8 sps:$4 sm:$0xff]  }
  0xd6   :  { %422 = vmatpush1.bf16.msra.mxu1 %v4888_v8  ;;  %v195_v22 = vpack.c.bf16 %v194_v20, %v194_v20  ;;  %v4901_v23 = vld [vmem:[#allocation6 + $0x64] ss:$8 sps:$4 sm:$0xff]   ;;  %v4904_v25 = vld [vmem:[#allocation6 + $0x74] ss:$8 sps:$4 sm:$0xff]   ;;  %v4906_v26 = vld [vmem:[#allocation6 + $0x70] ss:$8 sps:$4 sm:$0xff]  }
  0xd7   :  { %423 = vmatprep.subr.bf16.mxu1 %v4889_v9  ;;  %v4909_v28 = vld [vmem:[#allocation10 + $0x4] ss:$16 sps:$4 sm:$0xff]   ;;  %v4315_v29 = vld [vmem:[#allocation4] ss:$0 sm:$0xff]  ;;  %v4907_v37 = vld [vmem:[#allocation10] ss:$16 sps:$4 sm:$0xff]  }
  0xd8   :  { %4802 = vmatpush3.bf16.msra.mxu0 %v4877_v3  ;;  %v4912_v39 = vld [vmem:[#allocation10 + $0x24] ss:$16 sps:$4 sm:$0xff]   ;;  %v4910_v40 = vld [vmem:[#allocation10 + $0x20] ss:$16 sps:$4 sm:$0xff]   ;;  %v4957_v5 = vld [vmem:[#allocation10 + $0xc] ss:$16 sps:$4 sm:$0xff]  }
  0xd9   :  { %4803 = vmatprep.subr.bf16.mxu0 %v5500_v0  ;;  %v4915_v41 = vld [vmem:[#allocation10 + $0x44] ss:$16 sps:$4 sm:$0xff]   ;;  %v4913_v42 = vld [vmem:[#allocation10 + $0x40] ss:$16 sps:$4 sm:$0xff]   ;;  %v327_v9 = vld [vmem:[#allocation7] sm:$0x3] }
  0xda   :  { %424 = vmatpush1.bf16.msra.mxu1 %v4891_v12  ;;  %v4918_v43 = vld [vmem:[#allocation10 + $0x64] ss:$16 sps:$4 sm:$0xff]   ;;  %v4916_v44 = vld [vmem:[#allocation10 + $0x60] ss:$16 sps:$4 sm:$0xff]  }
  0xdb   :  { %425 = vmatprep.subr.bf16.mxu1 %v4892_v13  ;;  %v4921_v45 = vld [vmem:[#allocation10 + $0x84] ss:$16 sps:$4 sm:$0xff]   ;;  %v4919_v46 = vld [vmem:[#allocation10 + $0x80] ss:$16 sps:$4 sm:$0xff]  }
  0xdc   :  { %4804 = vmatpush3.bf16.msra.mxu0 %v4878_v6  ;;  %v4924_v47 = vld [vmem:[#allocation10 + $0xa4] ss:$16 sps:$4 sm:$0xff]   ;;  %v4922_v48 = vld [vmem:[#allocation10 + $0xa0] ss:$16 sps:$4 sm:$0xff]   ;;  %v329_v6 = vlaneseq }
  0xdd   :  { %4805 = vmatprep.subr.bf16.mxu0 %v5500_v0  ;;  %v4927_v49 = vld [vmem:[#allocation10 + $0xc4] ss:$16 sps:$4 sm:$0xff]   ;;  %v4925_v50 = vld [vmem:[#allocation10 + $0xc0] ss:$16 sps:$4 sm:$0xff]  }
  0xde   :  { %426 = vmatpush1.bf16.msra.mxu1 %v4894_v14  ;;  %v4930_v51 = vld [vmem:[#allocation10 + $0xe4] ss:$16 sps:$4 sm:$0xff]   ;;  %v4928_v52 = vld [vmem:[#allocation10 + $0xe0] ss:$16 sps:$4 sm:$0xff]   ;;  %v5748_v7 = vshrl.u32 %v329_v6, 7 }
  0xdf   :  { %427 = vmatprep.subr.bf16.mxu1 %v4895_v15  ;;  %v4933_v53 = vld [vmem:[#allocation10 + $0x104] ss:$16 sps:$4 sm:$0xff]   ;;  %v4931_v54 = vld [vmem:[#allocation10 + $0x100] ss:$16 sps:$4 sm:$0xff]  }
  0xe0   :  { %4806 = vmatpush3.bf16.msra.mxu0 %v4879_v10  ;;  %v4936_v55 = vld [vmem:[#allocation10 + $0x124] ss:$16 sps:$4 sm:$0xff]   ;;  %v4934_v56 = vld [vmem:[#allocation10 + $0x120] ss:$16 sps:$4 sm:$0xff]   ;;  %v5751_v8 = vsub.s32 0, %v5748_v7  ;;  %v5754_v10 = vsub.s32 1, %v5748_v7 }
  0xe1   :  { %4807 = vmatprep.subr.bf16.mxu0 %v5500_v0  ;;  %v4939_v57 = vld [vmem:[#allocation10 + $0x144] ss:$16 sps:$4 sm:$0xff]   ;;  %v4937_v58 = vld [vmem:[#allocation10 + $0x140] ss:$16 sps:$4 sm:$0xff]  }
  0xe2   :  { %428 = vmatpush1.bf16.msra.mxu1 %v4897_v17  ;;  %v4942_v59 = vld [vmem:[#allocation10 + $0x164] ss:$16 sps:$4 sm:$0xff]   ;;  %v4940_v60 = vld [vmem:[#allocation10 + $0x160] ss:$16 sps:$4 sm:$0xff]   ;;  %v336_v12 = vrot.slane %v327_v9, %v5754_v10 }
  0xe3   :  { %429 = vmatprep.subr.bf16.mxu1 %v4898_v18  ;;  %v4945_v61 = vld [vmem:[#allocation10 + $0x184] ss:$16 sps:$4 sm:$0xff]   ;;  %v4943_v62 = vld [vmem:[#allocation10 + $0x180] ss:$16 sps:$4 sm:$0xff]  }
  0xe4   :  { %4808 = vmatpush3.bf16.msra.mxu0 %v4880_v11  ;;  %v4948_v63 = vld [vmem:[#allocation10 + $0x1a4] ss:$16 sps:$4 sm:$0xff]   ;;  %v4949_v2 = vld [vmem:[#allocation10 + $0x1c0] ss:$16 sps:$4 sm:$0xff]   ;;  %v332_v11 = vrot.slane %v327_v9, %v5751_v8 }
  0xe5   :  { %4809 = vmatprep.subr.bf16.mxu0 %v5500_v0  ;;  %v4951_v1 = vld [vmem:[#allocation10 + $0x1c4] ss:$16 sps:$4 sm:$0xff]   ;;  %v4952_v4 = vld [vmem:[#allocation10 + $0x1e0] ss:$16 sps:$4 sm:$0xff]  }
  0xe6   :  { %430 = vmatpush1.bf16.msra.mxu1 %v4900_v21  ;;  %v4954_v3 = vld [vmem:[#allocation10 + $0x1e4] ss:$16 sps:$4 sm:$0xff]  }
  0xe7   :  { %431 = vmatprep.subr.bf16.mxu1 %v4901_v23 }
  0xe8   :  { %4810 = vmatpush3.bf16.msra.mxu0 %v4881_v16 }
  0xe9   :  { %4811 = vmatprep.subr.bf16.mxu0 %v5500_v0  ;;  %v4946_v0 = vld [vmem:[#allocation10 + $0x1a0] ss:$16 sps:$4 sm:$0xff]  }
  0xea   :  { %432 = vmatpush1.bf16.msra.mxu1 %v4903_v24 }
  0xeb   :  { %433 = vmatprep.subr.bf16.mxu1 %v4904_v25 }
  0xec   :  { %4812 = vmatpush3.bf16.msra.mxu0 %v4882_v19 }
  0xee   :  { %434 = vmatpush1.bf16.msra.mxu1 %v4906_v26 }
  0xef   :  { %4814 = vmatmul.mubr.bf16.vlgmr.msra.gmra.mrb[0].mxu0 %v195_v22  ;;  %941 = vmatprep.subr.bf16.mxu1 %v4909_v28 }
 0x1c2   :  { %v301_v30 = vpop.f32.mrb[0].mxu0 }
 0x1c3   :  { %v302_v31 = vadd.f32 %v4315_v29, %v301_v30  ;;  %v4815_v32 = vpop.f32.mrb[1].mxu0 }
 0x1c4   :  { %v304_v33 = vpop.f32.mrb[2].mxu0 }
 0x1c5   :  { %vm307_vm1 = vcmp.gt.f32.partialorder %v302_v31, 0.0  ;;  %v308_v34 = vmul.f32 0.2, %v302_v31  ;;  %v4816_v35 = vpop.f32.mrb[3].mxu0 }
 0x1c7   :  { %v309_v36 = vsel %vm307_vm1, %v302_v31, %v308_v34 }
 0x1c8   :  { %v310_v38 = vpack.c.bf16 %v309_v36, %v309_v36 }
 0x1ca   :  { %452 = vmatmul.mubr.bf16.vlgmr.msra.gmra.mrb[0].mxu1 %v310_v38 }
 0x1cb   :  { %942 = vmatpush1.bf16.msra.mxu1 %v4907_v37 }
 0x1cc   :  { %943 = vmatprep.subr.bf16.mxu1 %v4912_v39 }
 0x1cf   :  { %944 = vmatpush1.bf16.msra.mxu1 %v4910_v40 }
 0x1d0   :  { %945 = vmatprep.subr.bf16.mxu1 %v4915_v41 }
 0x1d3   :  { %946 = vmatpush1.bf16.msra.mxu1 %v4913_v42 }
 0x1d4   :  { %947 = vmatprep.subr.bf16.mxu1 %v4918_v43 }
 0x1d7   :  { %948 = vmatpush1.bf16.msra.mxu1 %v4916_v44 }
 0x1d8   :  { %949 = vmatprep.subr.bf16.mxu1 %v4921_v45 }
 0x1db   :  { %950 = vmatpush1.bf16.msra.mxu1 %v4919_v46 }
 0x1dc   :  { %951 = vmatprep.subr.bf16.mxu1 %v4924_v47 }
 0x1df   :  { %952 = vmatpush1.bf16.msra.mxu1 %v4922_v48 }
 0x1e0   :  { %953 = vmatprep.subr.bf16.mxu1 %v4927_v49 }
 0x1e3   :  { %954 = vmatpush1.bf16.msra.mxu1 %v4925_v50 }
 0x1e4   :  { %955 = vmatprep.subr.bf16.mxu1 %v4930_v51 }
 0x1e7   :  { %956 = vmatpush1.bf16.msra.mxu1 %v4928_v52 }
 0x1e8   :  { %957 = vmatprep.subr.bf16.mxu1 %v4933_v53  ;;  %v499_v53 = vld [vmem:[%s5958_s5] sm:$0x3] }
 0x1eb   :  { %958 = vmatpush1.bf16.msra.mxu1 %v4931_v54  ;;  %v513_v54 = vld [vmem:[#allocation9] sm:$0x3] }
 0x1ec   :  { %959 = vmatprep.subr.bf16.mxu1 %v4936_v55  ;;  %v504_v55 = vrot.slane %v499_v53, %v5751_v8 }
 0x1ef   :  { %960 = vmatpush1.bf16.msra.mxu1 %v4934_v56 }
 0x1f0   :  { %961 = vmatprep.subr.bf16.mxu1 %v4939_v57  ;;  %v508_v57 = vrot.slane %v499_v53, %v5754_v10 }
 0x1f3   :  { %962 = vmatpush1.bf16.msra.mxu1 %v4937_v58 }
 0x1f4   :  { %963 = vmatprep.subr.bf16.mxu1 %v4942_v59 }
 0x1f7   :  { %964 = vmatpush1.bf16.msra.mxu1 %v4940_v60  ;;  %v518_v60 = vrot.slane %v513_v54, %v5751_v8 }
 0x1f8   :  { %965 = vmatprep.subr.bf16.mxu1 %v4945_v61 }
 0x1fb   :  { %966 = vmatpush1.bf16.msra.mxu1 %v4943_v62  ;;  %v522_v62 = vrot.slane %v513_v54, %v5754_v10 }
 0x1fc   :  { %967 = vmatprep.subr.bf16.mxu1 %v4948_v63 }
 0x1ff   :  { %968 = vmatpush1.bf16.msra.mxu1 %v4946_v0 }
 0x200   :  { %969 = vmatprep.subr.bf16.mxu1 %v4951_v1 }
 0x203   :  { %970 = vmatpush1.bf16.msra.mxu1 %v4949_v2 }
 0x204   :  { %971 = vmatprep.subr.bf16.mxu1 %v4954_v3 }
 0x207   :  { %972 = vmatpush1.bf16.msra.mxu1 %v4952_v4 }
 0x208   :  { %982 = vmatprep.subr.bf16.mxu1 %v4957_v5 }
 0x29d   :  { %v453_v13 = vpop.f32.mrb[0].mxu1 }
 0x29e   :  { %v454_v14 = vadd.f32 %v453_v13, %v332_v11  ;;  %v455_v15 = vpop.f32.mrb[1].mxu1  ;;  %v4955_v11 = vld [vmem:[#allocation10 + $0x8] ss:$16 sps:$4 sm:$0xff]   ;;  %v4960_v13 = vld [vmem:[#allocation10 + $0x2c] ss:$16 sps:$4 sm:$0xff]  }
 0x29f   :  { %v456_v16 = vadd.f32 %v455_v15, %v336_v12  ;;  %v457_v17 = vpop.f32.mrb[2].mxu1  ;;  %v4963_v15 = vld [vmem:[#allocation10 + $0x4c] ss:$16 sps:$4 sm:$0xff]  }
 0x2a0   :  { %v460_v18 = vrot.slane %v454_v14, 4  ;;  %v458_v19 = vpop.f32.mrb[3].mxu1  ;;  %v4966_v17 = vld [vmem:[#allocation10 + $0x6c] ss:$16 sps:$4 sm:$0xff]  }
 0x2a1   :  { %v466_v20 = vrot.slane %v456_v16, 4  ;;  %v4969_v19 = vld [vmem:[#allocation10 + $0x8c] ss:$16 sps:$4 sm:$0xff]  }
 0x2a2   :  { %v461_v21 = vadd.f32 %v460_v18, %v454_v14  ;;  %v4964_v18 = vld [vmem:[#allocation10 + $0x68] ss:$16 sps:$4 sm:$0xff]  }
 0x2a3   :  { %v467_v22 = vadd.f32 %v466_v20, %v456_v16  ;;  %v4967_v20 = vld [vmem:[#allocation10 + $0x88] ss:$16 sps:$4 sm:$0xff]  }
 0x2a4   :  { %v462_v23 = vrot.slane %v461_v21, 2 }
 0x2a5   :  { %v468_v24 = vrot.slane %v467_v22, 2 }
 0x2a6   :  { %v463_v25 = vadd.f32 %v462_v23, %v461_v21  ;;  %v4972_v21 = vld [vmem:[#allocation10 + $0xac] ss:$16 sps:$4 sm:$0xff]  }
 0x2a7   :  { %v469_v26 = vadd.f32 %v468_v24, %v467_v22  ;;  %v4970_v22 = vld [vmem:[#allocation10 + $0xa8] ss:$16 sps:$4 sm:$0xff]   ;;  %v4975_v23 = vld [vmem:[#allocation10 + $0xcc] ss:$16 sps:$4 sm:$0xff]  }
 0x2a8   :  { %v464_v27 = vrot.slane %v463_v25, 1  ;;  %v4973_v24 = vld [vmem:[#allocation10 + $0xc8] ss:$16 sps:$4 sm:$0xff]  }
 0x2a9   :  { %v470_v28 = vrot.slane %v469_v26, 1 }
 0x2aa   :  { %v465_v29 = vadd.f32 %v464_v27, %v463_v25  ;;  %v4978_v25 = vld [vmem:[#allocation10 + $0xec] ss:$16 sps:$4 sm:$0xff]  }
 0x2ab   :  { %v471_v30 = vadd.f32 %v470_v28, %v469_v26  ;;  %v4976_v26 = vld [vmem:[#allocation10 + $0xe8] ss:$16 sps:$4 sm:$0xff]   ;;  %v4981_v27 = vld [vmem:[#allocation10 + $0x10c] ss:$16 sps:$4 sm:$0xff]  }
 0x2ac   :  { %v473_v31 = vmul.f32 0.125, %v465_v29  ;;  %v4979_v28 = vld [vmem:[#allocation10 + $0x108] ss:$16 sps:$4 sm:$0xff]   ;;  %v4984_v29 = vld [vmem:[#allocation10 + $0x12c] ss:$16 sps:$4 sm:$0xff]  }
 0x2ad   :  { %v474_v32 = vmul.f32 0.125, %v471_v30  ;;  %v4982_v30 = vld [vmem:[#allocation10 + $0x128] ss:$16 sps:$4 sm:$0xff]  }
 0x2ae   :  { %v475_v33 = vsub.f32 %v454_v14, %v473_v31  ;;  %v4958_v14 = vld [vmem:[#allocation10 + $0x28] ss:$16 sps:$4 sm:$0xff]   ;;  %v4987_v31 = vld [vmem:[#allocation10 + $0x14c] ss:$16 sps:$4 sm:$0xff]  }
 0x2af   :  { %v476_v34 = vsub.f32 %v456_v16, %v474_v32  ;;  %v4961_v16 = vld [vmem:[#allocation10 + $0x48] ss:$16 sps:$4 sm:$0xff]  }
 0x2b0   :  { %v477_v35 = vmul.f32 %v475_v33, %v475_v33  ;;  %v4985_v32 = vld [vmem:[#allocation10 + $0x148] ss:$16 sps:$4 sm:$0xff]  }
 0x2b1   :  { %v478_v36 = vmul.f32 %v476_v34, %v476_v34 }
 0x2b2   :  { %v479_v37 = vrot.slane %v477_v35, 4 }
 0x2b3   :  { %v485_v38 = vrot.slane %v478_v36, 4 }
 0x2b4   :  { %v480_v39 = vadd.f32 %v479_v37, %v477_v35  ;;  %v4993_v35 = vld [vmem:[#allocation10 + $0x18c] ss:$16 sps:$4 sm:$0xff]  }
 0x2b5   :  { %v486_v40 = vadd.f32 %v485_v38, %v478_v36  ;;  %v4991_v36 = vld [vmem:[#allocation10 + $0x188] ss:$16 sps:$4 sm:$0xff]   ;;  %v4996_v37 = vld [vmem:[#allocation10 + $0x1ac] ss:$16 sps:$4 sm:$0xff]  }
 0x2b6   :  { %v481_v41 = vrot.slane %v480_v39, 2  ;;  %v4994_v38 = vld [vmem:[#allocation10 + $0x1a8] ss:$16 sps:$4 sm:$0xff]  }
 0x2b7   :  { %v487_v42 = vrot.slane %v486_v40, 2 }
 0x2b8   :  { %v482_v43 = vadd.f32 %v481_v41, %v480_v39  ;;  %v4999_v39 = vld [vmem:[#allocation10 + $0x1cc] ss:$16 sps:$4 sm:$0xff]  }
 0x2b9   :  { %v488_v44 = vadd.f32 %v487_v42, %v486_v40  ;;  %v4997_v40 = vld [vmem:[#allocation10 + $0x1c8] ss:$16 sps:$4 sm:$0xff]   ;;  %v5002_v41 = vld [vmem:[#allocation10 + $0x1ec] ss:$16 sps:$4 sm:$0xff]  }
 0x2ba   :  { %v483_v45 = vrot.slane %v482_v43, 1  ;;  %v1167_v42 = vld [vmem:[#allocation15] sm:$0xff] }
 0x2bb   :  { %v489_v46 = vrot.slane %v488_v44, 1 }
 0x2bc   :  { %v484_v47 = vadd.f32 %v483_v45, %v482_v43  ;;  %v1171_v43 = vld [vmem:[#allocation15 + $0x20] sm:$0xff] }
 0x2bd   :  { %v490_v48 = vadd.f32 %v489_v46, %v488_v44  ;;  %v5000_v44 = vld [vmem:[#allocation10 + $0x1e8] ss:$16 sps:$4 sm:$0xff]   ;;  %v4405_v45 = vcombine.high %v1167_v42, %v1171_v43  ;;  %v4404_v46 = vcombine.low %v1167_v42, %v1171_v43 }
 0x2be   :  { %v491_v49 = vmul.f32 0.125, %v484_v47  ;;  %v1175_v47 = vld [vmem:[#allocation15 + $0x40] sm:$0xff] }
 0x2bf   :  { %v492_v50 = vmul.f32 0.125, %v490_v48  ;;  %v1179_v48 = vld [vmem:[#allocation15 + $0x60] sm:$0xff] }
 0x2c0   :  { %v493_v51 = vadd.f32 0.8, %v491_v49  ;;  %v4413_v49 = vcombine.high %v1175_v47, %v1179_v48  ;;  %v1287_v42 = vld [vmem:[#allocation15 + $0x3c0] sm:$0xff] }
 0x2c1   :  { %v494_v52 = vadd.f32 0.8, %v492_v50  ;;  %v4412_v50 = vcombine.low %v1175_v47, %v1179_v48  ;;  %v1291_v43 = vld [vmem:[#allocation15 + $0x3e0] sm:$0xff] }
 0x2c2   :  { %5195 = vrsqrt.f32 %v493_v51  ;;  %v1183_v51 = vld [vmem:[#allocation15 + $0x80] sm:$0xff] }
 0x2c3   :  { %5197 = vrsqrt.f32 %v494_v52  ;;  %v1187_v52 = vld [vmem:[#allocation15 + $0xa0] sm:$0xff] }
 0x2c4   :  { %v4421_v53 = vcombine.high %v1183_v51, %v1187_v52  ;;  %v4420_v54 = vcombine.low %v1183_v51, %v1187_v52  ;;  %v1299_v47 = vld [vmem:[#allocation15 + $0x420] sm:$0xff]  ;;  %v5771_v51 = vld [vmem:[#allocation15 + $0x28] sm:$0xff] }
 0x2cc   :  { %v5196_v56 = vpop.eup %5195 }
 0x2cd   :  { %v5198_v58 = vpop.eup %5197  ;;  %v497_v59 = vmul.f32 %v5196_v56, %v475_v33  ;;  %v4990_v33 = vld [vmem:[#allocation10 + $0x16c] ss:$16 sps:$4 sm:$0xff]  }
 0x2ce   :  { %v498_v61 = vmul.f32 %v5198_v58, %v476_v34  ;;  %v4988_v34 = vld [vmem:[#allocation10 + $0x168] ss:$16 sps:$4 sm:$0xff]  }
 0x2cf   :  { %v511_v63 = vmul.f32 %v504_v55, %v497_v59  ;;  %v1191_v55 = vld [vmem:[#allocation15 + $0xc0] sm:$0xff] }
 0x2d0   :  { %v512_v0 = vmul.f32 %v508_v57, %v498_v61  ;;  %v1195_v56 = vld [vmem:[#allocation15 + $0xe0] sm:$0xff] }
 0x2d1   :  { %v525_v1 = vadd.f32 %v518_v60, %v511_v63  ;;  %v4429_v57 = vcombine.high %v1191_v55, %v1195_v56  ;;  %v4428_v58 = vcombine.low %v1191_v55, %v1195_v56  ;;  %v1199_v59 = vld [vmem:[#allocation15 + $0x100] sm:$0xff] }
 0x2d2   :  { %v526_v2 = vadd.f32 %v522_v62, %v512_v0  ;;  %v1203_v60 = vld [vmem:[#allocation15 + $0x120] sm:$0xff] }
 0x2d3   :  { %vm527_vm2 = vcmp.gt.f32.partialorder %v525_v1, 0.0  ;;  %v529_v3 = vmul.f32 0.2, %v525_v1  ;;  %v4437_v61 = vcombine.high %v1199_v59, %v1203_v60  ;;  %v4436_v62 = vcombine.low %v1199_v59, %v1203_v60  ;;  %v1207_v63 = vld [vmem:[#allocation15 + $0x140] sm:$0xff] }
 0x2d4   :  { %vm528_vm3 = vcmp.gt.f32.partialorder %v526_v2, 0.0  ;;  %v530_v4 = vmul.f32 0.2, %v526_v2  ;;  %v1211_v0 = vld [vmem:[#allocation15 + $0x160] sm:$0xff] }
 0x2d5   :  { %v531_v5 = vsel %vm527_vm2, %v525_v1, %v529_v3  ;;  %v4445_v1 = vcombine.high %v1207_v63, %v1211_v0  ;;  %v1215_v3 = vld [vmem:[#allocation15 + $0x180] sm:$0xff] }
 0x2d6   :  { %v532_v6 = vsel %vm528_vm3, %v526_v2, %v530_v4  ;;  %v5765_v12 = vpack.c.bf16 %v531_v5, %v531_v5  ;;  %v4444_v2 = vcombine.low %v1207_v63, %v1211_v0  ;;  %v1219_v4 = vld [vmem:[#allocation15 + $0x1a0] sm:$0xff] }
 0x2d7   :  { %v534_v9 = vpack.c.bf16 %v532_v6, %v532_v6  ;;  %v4453_v5 = vcombine.high %v1215_v3, %v1219_v4  ;;  %v4452_v6 = vcombine.low %v1215_v3, %v1219_v4  ;;  %v1307_v55 = vld [vmem:[#allocation15 + $0x460] sm:$0xff] }
 0x2d8   :  { %v1315_v59 = vld [vmem:[#allocation15 + $0x4a0] sm:$0xff] }
 0x2d9   :  { %973 = vmatprep.mubr.bf16.mxu1 %v534_v9  ;;  %v1323_v63 = vld [vmem:[#allocation15 + $0x4e0] sm:$0xff] }
 0x2da   :  { %974 = vmatmul.mubr.bf16.vlgmr.msra.gmra.mrb[4].mxu1 %v5765_v12  ;;  %v1331_v3 = vld [vmem:[#allocation15 + $0x520] sm:$0xff] }
 0x2db   :  { %983 = vmatpush1.bf16.msra.mxu1 %v4955_v11  ;;  %1014 = vmatprep.mubr.bf16.mxu1 %v534_v9  ;;  %v1223_v9 = vld [vmem:[#allocation15 + $0x1c0] sm:$0xff] }
 0x2dc   :  { %984 = vmatprep.subr.bf16.mxu1 %v4960_v13  ;;  %v1227_v11 = vld [vmem:[#allocation15 + $0x1e0] sm:$0xff] }
 0x2dd   :  { %v4460_v13 = vcombine.low %v1223_v9, %v1227_v11 }
 0x2df   :  { %985 = vmatpush1.bf16.msra.mxu1 %v4958_v14  ;;  %v1231_v14 = vld [vmem:[#allocation15 + $0x200] sm:$0xff] }
 0x2e0   :  { %986 = vmatprep.subr.bf16.mxu1 %v4963_v15  ;;  %v1235_v15 = vld [vmem:[#allocation15 + $0x220] sm:$0xff] }
 0x2e3   :  { %987 = vmatpush1.bf16.msra.mxu1 %v4961_v16  ;;  %v4469_v16 = vcombine.high %v1231_v14, %v1235_v15 }
 0x2e4   :  { %988 = vmatprep.subr.bf16.mxu1 %v4966_v17  ;;  %v4468_v17 = vcombine.low %v1231_v14, %v1235_v15  ;;  %v1347_v14 = vld [vmem:[#allocation15 + $0x5a0] sm:$0xff] }
 0x2e7   :  { %989 = vmatpush1.bf16.msra.mxu1 %v4964_v18  ;;  %v1239_v18 = vld [vmem:[#allocation15 + $0x240] sm:$0xff] }
 0x2e8   :  { %990 = vmatprep.subr.bf16.mxu1 %v4969_v19  ;;  %v1243_v19 = vld [vmem:[#allocation15 + $0x260] sm:$0xff] }
 0x2eb   :  { %991 = vmatpush1.bf16.msra.mxu1 %v4967_v20  ;;  %v4477_v20 = vcombine.high %v1239_v18, %v1243_v19 }
 0x2ec   :  { %992 = vmatprep.subr.bf16.mxu1 %v4972_v21  ;;  %v4476_v21 = vcombine.low %v1239_v18, %v1243_v19  ;;  %v1355_v18 = vld [vmem:[#allocation15 + $0x5e0] sm:$0xff] }
 0x2ef   :  { %993 = vmatpush1.bf16.msra.mxu1 %v4970_v22  ;;  %v1247_v22 = vld [vmem:[#allocation15 + $0x280] sm:$0xff] }
 0x2f0   :  { %994 = vmatprep.subr.bf16.mxu1 %v4975_v23  ;;  %v1251_v23 = vld [vmem:[#allocation15 + $0x2a0] sm:$0xff] }
 0x2f3   :  { %995 = vmatpush1.bf16.msra.mxu1 %v4973_v24  ;;  %v4485_v24 = vcombine.high %v1247_v22, %v1251_v23 }
 0x2f4   :  { %996 = vmatprep.subr.bf16.mxu1 %v4978_v25  ;;  %v4484_v25 = vcombine.low %v1247_v22, %v1251_v23  ;;  %v1363_v22 = vld [vmem:[#allocation15 + $0x620] sm:$0xff] }
 0x2f7   :  { %997 = vmatpush1.bf16.msra.mxu1 %v4976_v26  ;;  %v1255_v26 = vld [vmem:[#allocation15 + $0x2c0] sm:$0xff] }
 0x2f8   :  { %998 = vmatprep.subr.bf16.mxu1 %v4981_v27  ;;  %v1259_v27 = vld [vmem:[#allocation15 + $0x2e0] sm:$0xff] }
 0x2fb   :  { %999 = vmatpush1.bf16.msra.mxu1 %v4979_v28  ;;  %v4493_v28 = vcombine.high %v1255_v26, %v1259_v27 }
 0x2fc   :  { %1000 = vmatprep.subr.bf16.mxu1 %v4984_v29  ;;  %v4492_v29 = vcombine.low %v1255_v26, %v1259_v27  ;;  %v1371_v26 = vld [vmem:[#allocation15 + $0x660] sm:$0xff] }
 0x2ff   :  { %1001 = vmatpush1.bf16.msra.mxu1 %v4982_v30  ;;  %v1263_v30 = vld [vmem:[#allocation15 + $0x300] sm:$0xff] }
 0x300   :  { %1002 = vmatprep.subr.bf16.mxu1 %v4987_v31  ;;  %v1267_v31 = vld [vmem:[#allocation15 + $0x320] sm:$0xff] }
 0x303   :  { %1003 = vmatpush1.bf16.msra.mxu1 %v4985_v32  ;;  %v4501_v32 = vcombine.high %v1263_v30, %v1267_v31 }
 0x304   :  { %1004 = vmatprep.subr.bf16.mxu1 %v4990_v33  ;;  %v4500_v33 = vcombine.low %v1263_v30, %v1267_v31  ;;  %v1379_v30 = vld [vmem:[#allocation15 + $0x6a0] sm:$0xff] }
 0x307   :  { %1005 = vmatpush1.bf16.msra.mxu1 %v4988_v34  ;;  %v1271_v34 = vld [vmem:[#allocation15 + $0x340] sm:$0xff] }
 0x308   :  { %1006 = vmatprep.subr.bf16.mxu1 %v4993_v35  ;;  %v1275_v35 = vld [vmem:[#allocation15 + $0x360] sm:$0xff] }
 0x30b   :  { %1007 = vmatpush1.bf16.msra.mxu1 %v4991_v36  ;;  %v4509_v36 = vcombine.high %v1271_v34, %v1275_v35 }
 0x30c   :  { %1008 = vmatprep.subr.bf16.mxu1 %v4996_v37  ;;  %v4508_v37 = vcombine.low %v1271_v34, %v1275_v35  ;;  %v1387_v34 = vld [vmem:[#allocation15 + $0x6e0] sm:$0xff] }
 0x30f   :  { %1009 = vmatpush1.bf16.msra.mxu1 %v4994_v38  ;;  %v1279_v38 = vld [vmem:[#allocation15 + $0x380] sm:$0xff] }
 0x310   :  { %1010 = vmatprep.subr.bf16.mxu1 %v4999_v39  ;;  %v1283_v39 = vld [vmem:[#allocation15 + $0x3a0] sm:$0xff] }
 0x313   :  { %1011 = vmatpush1.bf16.msra.mxu1 %v4997_v40  ;;  %v4517_v40 = vcombine.high %v1279_v38, %v1283_v39 }
 0x314   :  { %1012 = vmatprep.subr.bf16.mxu1 %v5002_v41  ;;  %v4516_v41 = vcombine.low %v1279_v38, %v1283_v39  ;;  %v1395_v38 = vld [vmem:[#allocation15 + $0x720] sm:$0xff] }
 0x317   :  { %1013 = vmatpush1.bf16.msra.mxu1 %v5000_v44  ;;  %v1295_v44 = vld [vmem:[#allocation15 + $0x400] sm:$0xff] }
 0x318   :  { %2745 = vmatprep.subr.bf16.mxu1 %v4405_v45  ;;  %v4524_v45 = vcombine.low %v1287_v42, %v1291_v43  ;;  %v4532_v48 = vcombine.low %v1295_v44, %v1299_v47 }
 0x31a   :  { %1015 = vmatmul.mubr.bf16.vlgmr.msra.gmra.mrb[8].mxu1 %v5765_v12  ;;  %v4461_v12 = vcombine.high %v1223_v9, %v1227_v11  ;;  %v1339_v9 = vld [vmem:[#allocation15 + $0x560] sm:$0xff] }
 0x31b   :  { %2746 = vmatpush1.bf16.msra.mxu1 %v4404_v46  ;;  %v4525_v46 = vcombine.high %v1287_v42, %v1291_v43  ;;  %v1403_v42 = vld [vmem:[#allocation15 + $0x760] sm:$0xff] }
 0x31c   :  { %2747 = vmatprep.subr.bf16.mxu1 %v4413_v49  ;;  %v4533_v49 = vcombine.high %v1295_v44, %v1299_v47 }
 0x31e   :  { %2786 = vmatprep.subr.bf16.mxu0 %v4533_v49  ;;  %v1415_v49 = vld [vmem:[#allocation15 + $0x7c0] sm:$0xff] }
 0x31f   :  { %2748 = vmatpush1.bf16.msra.mxu1 %v4412_v50  ;;  %2787 = vmatpush1.bf16.msra.mxu0 %v4532_v48  ;;  %v5769_v50 = vld [vmem:[#allocation15 + $0x8] sm:$0xff] }
 0x320   :  { %2749 = vmatprep.subr.bf16.mxu1 %v4421_v53  ;;  %v4407_v52 = vcombine.high %v5769_v50, %v5771_v51  ;;  %v4406_v53 = vcombine.low %v5769_v50, %v5771_v51 }
 0x323   :  { %2750 = vmatpush1.bf16.msra.mxu1 %v4420_v54  ;;  %v1303_v54 = vld [vmem:[#allocation15 + $0x440] sm:$0xff] }
 0x324   :  { %2751 = vmatprep.subr.bf16.mxu1 %v4429_v57  ;;  %v4541_v56 = vcombine.high %v1303_v54, %v1307_v55  ;;  %v4540_v57 = vcombine.low %v1303_v54, %v1307_v55 }
 0x326   :  { %2788 = vmatprep.subr.bf16.mxu0 %v4541_v56  ;;  %v5777_v56 = vld [vmem:[#allocation15 + $0x10] sm:$0xff] }
 0x327   :  { %2752 = vmatpush1.bf16.msra.mxu1 %v4428_v58  ;;  %2789 = vmatpush1.bf16.msra.mxu0 %v4540_v57  ;;  %v1311_v58 = vld [vmem:[#allocation15 + $0x480] sm:$0xff]  ;;  %v5779_v57 = vld [vmem:[#allocation15 + $0x30] sm:$0xff] }
 0x328   :  { %2753 = vmatprep.subr.bf16.mxu1 %v4437_v61  ;;  %v4549_v60 = vcombine.high %v1311_v58, %v1315_v59  ;;  %v4548_v61 = vcombine.low %v1311_v58, %v1315_v59  ;;  %v5781_v58 = vld [vmem:[#allocation12] sm:$0xf]  ;;  %v4409_v59 = vcombine.high %v5777_v56, %v5779_v57 }
 0x32a   :  { %2790 = vmatprep.subr.bf16.mxu0 %v4549_v60  ;;  %v4408_v60 = vcombine.low %v5777_v56, %v5779_v57 }
 0x32b   :  { %2754 = vmatpush1.bf16.msra.mxu1 %v4436_v62  ;;  %2791 = vmatpush1.bf16.msra.mxu0 %v4548_v61  ;;  %v1319_v62 = vld [vmem:[#allocation15 + $0x4c0] sm:$0xff]  ;;  %v604_v61 = vrot.slane %v5781_v58, %v5751_v8 }
 0x32c   :  { %2755 = vmatprep.subr.bf16.mxu1 %v4445_v1  ;;  %v4557_v0 = vcombine.high %v1319_v62, %v1323_v63  ;;  %v4556_v1 = vcombine.low %v1319_v62, %v1323_v63  ;;  %v608_v62 = vrot.slane %v5781_v58, %v5754_v10 }
 0x32e   :  { %2792 = vmatprep.subr.bf16.mxu0 %v4557_v0 }
 0x32f   :  { %2756 = vmatpush1.bf16.msra.mxu1 %v4444_v2  ;;  %2793 = vmatpush1.bf16.msra.mxu0 %v4556_v1  ;;  %v1327_v2 = vld [vmem:[#allocation15 + $0x500] sm:$0xff] }
 0x330   :  { %2757 = vmatprep.subr.bf16.mxu1 %v4453_v5  ;;  %v4565_v4 = vcombine.high %v1327_v2, %v1331_v3  ;;  %v4564_v5 = vcombine.low %v1327_v2, %v1331_v3 }
 0x332   :  { %2794 = vmatprep.subr.bf16.mxu0 %v4565_v4 }
 0x333   :  { %2758 = vmatpush1.bf16.msra.mxu1 %v4452_v6  ;;  %2795 = vmatpush1.bf16.msra.mxu0 %v4564_v5  ;;  %v1335_v6 = vld [vmem:[#allocation15 + $0x540] sm:$0xff] }
 0x334   :  { %2759 = vmatprep.subr.bf16.mxu1 %v4461_v12  ;;  %v4573_v11 = vcombine.high %v1335_v6, %v1339_v9  ;;  %v4572_v12 = vcombine.low %v1335_v6, %v1339_v9 }
 0x336   :  { %2796 = vmatprep.subr.bf16.mxu0 %v4573_v11 }
 0x337   :  { %2760 = vmatpush1.bf16.msra.mxu1 %v4460_v13  ;;  %2797 = vmatpush1.bf16.msra.mxu0 %v4572_v12  ;;  %v1343_v13 = vld [vmem:[#allocation15 + $0x580] sm:$0xff] }
 0x338   :  { %2761 = vmatprep.subr.bf16.mxu1 %v4469_v16  ;;  %v4581_v15 = vcombine.high %v1343_v13, %v1347_v14  ;;  %v4580_v16 = vcombine.low %v1343_v13, %v1347_v14 }
 0x33a   :  { %2798 = vmatprep.subr.bf16.mxu0 %v4581_v15 }
 0x33b   :  { %2762 = vmatpush1.bf16.msra.mxu1 %v4468_v17  ;;  %2799 = vmatpush1.bf16.msra.mxu0 %v4580_v16  ;;  %v1351_v17 = vld [vmem:[#allocation15 + $0x5c0] sm:$0xff] }
 0x33c   :  { %2763 = vmatprep.subr.bf16.mxu1 %v4477_v20  ;;  %v4589_v19 = vcombine.high %v1351_v17, %v1355_v18  ;;  %v4588_v20 = vcombine.low %v1351_v17, %v1355_v18 }
 0x33e   :  { %2800 = vmatprep.subr.bf16.mxu0 %v4589_v19 }
 0x33f   :  { %2764 = vmatpush1.bf16.msra.mxu1 %v4476_v21  ;;  %2801 = vmatpush1.bf16.msra.mxu0 %v4588_v20  ;;  %v1359_v21 = vld [vmem:[#allocation15 + $0x600] sm:$0xff] }
 0x340   :  { %2765 = vmatprep.subr.bf16.mxu1 %v4485_v24  ;;  %v4597_v23 = vcombine.high %v1359_v21, %v1363_v22  ;;  %v4596_v24 = vcombine.low %v1359_v21, %v1363_v22 }
 0x342   :  { %2802 = vmatprep.subr.bf16.mxu0 %v4597_v23 }
 0x343   :  { %2766 = vmatpush1.bf16.msra.mxu1 %v4484_v25  ;;  %2803 = vmatpush1.bf16.msra.mxu0 %v4596_v24  ;;  %v1367_v25 = vld [vmem:[#allocation15 + $0x640] sm:$0xff] }
 0x344   :  { %2767 = vmatprep.subr.bf16.mxu1 %v4493_v28  ;;  %v4605_v27 = vcombine.high %v1367_v25, %v1371_v26  ;;  %v4604_v28 = vcombine.low %v1367_v25, %v1371_v26 }
 0x346   :  { %2804 = vmatprep.subr.bf16.mxu0 %v4605_v27 }
 0x347   :  { %2768 = vmatpush1.bf16.msra.mxu1 %v4492_v29  ;;  %2805 = vmatpush1.bf16.msra.mxu0 %v4604_v28  ;;  %v1375_v29 = vld [vmem:[#allocation15 + $0x680] sm:$0xff] }
 0x348   :  { %2769 = vmatprep.subr.bf16.mxu1 %v4501_v32  ;;  %v4613_v31 = vcombine.high %v1375_v29, %v1379_v30  ;;  %v4612_v32 = vcombine.low %v1375_v29, %v1379_v30 }
 0x34a   :  { %2806 = vmatprep.subr.bf16.mxu0 %v4613_v31 }
 0x34b   :  { %2770 = vmatpush1.bf16.msra.mxu1 %v4500_v33  ;;  %2807 = vmatpush1.bf16.msra.mxu0 %v4612_v32  ;;  %v1383_v33 = vld [vmem:[#allocation15 + $0x6c0] sm:$0xff] }
 0x34c   :  { %2771 = vmatprep.subr.bf16.mxu1 %v4509_v36  ;;  %v4621_v35 = vcombine.high %v1383_v33, %v1387_v34  ;;  %v4620_v36 = vcombine.low %v1383_v33, %v1387_v34 }
 0x34e   :  { %2808 = vmatprep.subr.bf16.mxu0 %v4621_v35 }
 0x34f   :  { %2772 = vmatpush1.bf16.msra.mxu1 %v4508_v37  ;;  %2809 = vmatpush1.bf16.msra.mxu0 %v4620_v36  ;;  %v1391_v37 = vld [vmem:[#allocation15 + $0x700] sm:$0xff] }
 0x350   :  { %2773 = vmatprep.subr.bf16.mxu1 %v4517_v40  ;;  %v4629_v39 = vcombine.high %v1391_v37, %v1395_v38  ;;  %v4628_v40 = vcombine.low %v1391_v37, %v1395_v38 }
 0x352   :  { %2810 = vmatprep.subr.bf16.mxu0 %v4629_v39 }
 0x353   :  { %2774 = vmatpush1.bf16.msra.mxu1 %v4516_v41  ;;  %2811 = vmatpush1.bf16.msra.mxu0 %v4628_v40  ;;  %v1399_v41 = vld [vmem:[#allocation15 + $0x740] sm:$0xff] }
 0x354   :  { %2775 = vmatprep.subr.bf16.mxu1 %v4525_v46  ;;  %v4637_v43 = vcombine.high %v1399_v41, %v1403_v42  ;;  %v4636_v44 = vcombine.low %v1399_v41, %v1403_v42  ;;  %v1411_v46 = vld [vmem:[#allocation15 + $0x7a0] sm:$0xff]  ;;  %v5794_v42 = vld [vmem:[%s5962_s9] sm:$0xf] }
 0x356   :  { %2812 = vmatprep.subr.bf16.mxu0 %v4637_v43  ;;  %v5796_v43 = vld [vmem:[#allocation13] sm:$0xf] }
 0x357   :  { %2776 = vmatpush1.bf16.msra.mxu1 %v4524_v45  ;;  %2813 = vmatpush1.bf16.msra.mxu0 %v4636_v44  ;;  %v1407_v45 = vld [vmem:[#allocation15 + $0x780] sm:$0xff]  ;;  %v1104_v44 = vrot.slane %v5794_v42, %v5751_v8 }
 0x358   :  { %2827 = vmatprep.subr.bf16.mxu1 %v4407_v52  ;;  %v4645_v47 = vcombine.high %v1407_v45, %v1411_v46  ;;  %v4644_v48 = vcombine.low %v1407_v45, %v1411_v46  ;;  %v1419_v52 = vld [vmem:[#allocation15 + $0x7e0] sm:$0xff]  ;;  %v1108_v46 = vrot.slane %v5794_v42, %v5754_v10 }
 0x359   :  { %v4652_v54 = vcombine.low %v1415_v49, %v1419_v52  ;;  %v4653_v55 = vcombine.high %v1415_v49, %v1419_v52  ;;  %v1130_v49 = vrot.slane %v5796_v43, %v5751_v8 }
 0x35a   :  { %2814 = vmatprep.subr.bf16.mxu0 %v4645_v47 }
 0x35b   :  { %2815 = vmatpush1.bf16.msra.mxu0 %v4644_v48 }
 0x35c   :  { %2816 = vmatprep.subr.bf16.mxu0 %v4653_v55 }
 0x35f   :  { %2817 = vmatpush1.bf16.msra.mxu0 %v4652_v54  ;;  %v1134_v54 = vrot.slane %v5796_v43, %v5754_v10 }
 0x360   :  { %2909 = vmatprep.subr.bf16.mxu0 %v4409_v59 }
 0x3ad   :  { %v975_v63 = vpop.f32.mrb[4].mxu1 }
 0x3ae   :  { %v976_v0 = vadd.f32 %v975_v63, %v604_v61  ;;  %v977_v1 = vpop.f32.mrb[5].mxu1 }
 0x3af   :  { %v978_v2 = vadd.f32 %v977_v1, %v608_v62  ;;  %v979_v3 = vpop.f32.mrb[6].mxu1 }
 0x3b0   :  { %v1023_v4 = vrot.slane %v976_v0, 4  ;;  %v980_v5 = vpop.f32.mrb[7].mxu1  ;;  %v1180_v3 = vld [vmem:[#allocation15 + $0x68] sm:$0xff] }
 0x3b1   :  { %v1029_v6 = vrot.slane %v978_v2, 4  ;;  %v5807_v5 = vsub.s32 2, %v5748_v7 }
 0x3b2   :  { %v1024_v9 = vadd.f32 %v1023_v4, %v976_v0 }
 0x3b3   :  { %v1030_v11 = vadd.f32 %v1029_v6, %v978_v2 }
 0x3b4   :  { %v1025_v12 = vrot.slane %v1024_v9, 2 }
 0x3b5   :  { %v1031_v13 = vrot.slane %v1030_v11, 2 }
 0x3b6   :  { %v1026_v14 = vadd.f32 %v1025_v12, %v1024_v9  ;;  %v5812_v9 = vsub.s32 3, %v5748_v7 }
 0x3b7   :  { %v1032_v15 = vadd.f32 %v1031_v13, %v1030_v11  ;;  %v1184_v13 = vld [vmem:[#allocation15 + $0x88] sm:$0xff] }
 0x3b8   :  { %v1027_v16 = vrot.slane %v1026_v14, 1 }
 0x3b9   :  { %v1033_v17 = vrot.slane %v1032_v15, 1 }
 0x3ba   :  { %v1028_v18 = vadd.f32 %v1027_v16, %v1026_v14  ;;  %v1188_v14 = vld [vmem:[#allocation15 + $0xa8] sm:$0xff]  ;;  %v616_v16 = vrot.slane %v5781_v58, %v5812_v9 }
 0x3bb   :  { %v1034_v19 = vadd.f32 %v1033_v17, %v1032_v15  ;;  %v612_v15 = vrot.slane %v5781_v58, %v5807_v5 }
 0x3bc   :  { %v1047_v20 = vmul.f32 0.125, %v1028_v18  ;;  %v4423_v18 = vcombine.high %v1184_v13, %v1188_v14 }
 0x3bd   :  { %v1048_v21 = vmul.f32 0.125, %v1034_v19 }
 0x3be   :  { %v1051_v22 = vsub.f32 %v976_v0, %v1047_v20  ;;  %v1192_v20 = vld [vmem:[#allocation15 + $0xc8] sm:$0xff] }
 0x3bf   :  { %v1052_v23 = vsub.f32 %v978_v2, %v1048_v21  ;;  %v1176_v2 = vld [vmem:[#allocation15 + $0x48] sm:$0xff] }
 0x3c0   :  { %v1055_v24 = vmul.f32 %v1051_v22, %v1051_v22  ;;  %v4415_v12 = vcombine.high %v1176_v2, %v1180_v3  ;;  %v4414_v17 = vcombine.low %v1176_v2, %v1180_v3  ;;  %v1196_v21 = vld [vmem:[#allocation15 + $0xe8] sm:$0xff] }
 0x3c1   :  { %v1056_v25 = vmul.f32 %v1052_v23, %v1052_v23  ;;  %v4431_v51 = vcombine.high %v1192_v20, %v1196_v21 }
 0x3c2   :  { %v1059_v26 = vrot.slane %v1055_v24, 4 }
 0x3c3   :  { %v1065_v27 = vrot.slane %v1056_v25, 4 }
 0x3c4   :  { %v1060_v28 = vadd.f32 %v1059_v26, %v1055_v24  ;;  %v4422_v26 = vcombine.low %v1184_v13, %v1188_v14 }
 0x3c5   :  { %v1066_v29 = vadd.f32 %v1065_v27, %v1056_v25 }
 0x3c6   :  { %v1061_v30 = vrot.slane %v1060_v28, 2 }
 0x3c7   :  { %v1067_v31 = vrot.slane %v1066_v29, 2 }
 0x3c8   :  { %v1062_v32 = vadd.f32 %v1061_v30, %v1060_v28  ;;  %v1200_v28 = vld [vmem:[#allocation15 + $0x108] sm:$0xff] }
 0x3c9   :  { %v1068_v33 = vadd.f32 %v1067_v31, %v1066_v29  ;;  %v1204_v29 = vld [vmem:[#allocation15 + $0x128] sm:$0xff]  ;;  %v4430_v31 = vcombine.low %v1192_v20, %v1196_v21 }
 0x3ca   :  { %v1063_v34 = vrot.slane %v1062_v32, 1  ;;  %v1244_v20 = vld [vmem:[#allocation15 + $0x268] sm:$0xff] }
 0x3cb   :  { %v1069_v35 = vrot.slane %v1068_v33, 1 }
 0x3cc   :  { %v1064_v36 = vadd.f32 %v1063_v34, %v1062_v32 }
 0x3cd   :  { %v1070_v37 = vadd.f32 %v1069_v35, %v1068_v33  ;;  %v4439_v33 = vcombine.high %v1200_v28, %v1204_v29  ;;  %v1208_v35 = vld [vmem:[#allocation15 + $0x148] sm:$0xff] }
 0x3ce   :  { %v1083_v38 = vmul.f32 0.125, %v1064_v36  ;;  %v1212_v36 = vld [vmem:[#allocation15 + $0x168] sm:$0xff] }
 0x3cf   :  { %v1084_v39 = vmul.f32 0.125, %v1070_v37 }
 0x3d0   :  { %v1087_v40 = vadd.f32 0.8, %v1083_v38 }
 0x3d1   :  { %v1088_v41 = vadd.f32 0.8, %v1084_v39  ;;  %v4438_v39 = vcombine.low %v1200_v28, %v1204_v29 }
 0x3d2   :  { %5199 = vrsqrt.f32 %v1087_v40 }
 0x3d3   :  { %5201 = vrsqrt.f32 %v1088_v41  ;;  %v4447_v41 = vcombine.high %v1208_v35, %v1212_v36 }
 0x3dc   :  { %v5200_v45 = vpop.eup %5199 }
 0x3dd   :  { %v5202_v47 = vpop.eup %5201  ;;  %v1095_v48 = vmul.f32 %v5200_v45, %v1051_v22  ;;  %v1216_v45 = vld [vmem:[#allocation15 + $0x188] sm:$0xff] }
 0x3de   :  { %v1096_v52 = vmul.f32 %v5202_v47, %v1052_v23 }
 0x3df   :  { %v1121_v55 = vmul.f32 %v1104_v44, %v1095_v48 }
 0x3e0   :  { %v1122_v59 = vmul.f32 %v1108_v46, %v1096_v52  ;;  %v1220_v46 = vld [vmem:[#allocation15 + $0x1a8] sm:$0xff] }
 0x3e1   :  { %v1147_v61 = vadd.f32 %v1130_v49, %v1121_v55  ;;  %v4446_v49 = vcombine.low %v1208_v35, %v1212_v36 }
 0x3e2   :  { %v1148_v62 = vadd.f32 %v1134_v54, %v1122_v59  ;;  %v4455_v54 = vcombine.high %v1216_v45, %v1220_v46  ;;  %v1224_v59 = vld [vmem:[#allocation15 + $0x1c8] sm:$0xff] }
 0x3e3   :  { %vm1151_vm4 = vcmp.gt.f32.partialorder %v1147_v61, 0.0  ;;  %v1155_v63 = vmul.f32 0.2, %v1147_v61 }
 0x3e4   :  { %vm1152_vm5 = vcmp.gt.f32.partialorder %v1148_v62, 0.0  ;;  %v1156_v0 = vmul.f32 0.2, %v1148_v62 }
 0x3e5   :  { %v1159_v1 = vsel %vm1151_vm4, %v1147_v61, %v1155_v63  ;;  %v1228_v61 = vld [vmem:[#allocation15 + $0x1e8] sm:$0xff] }
 0x3e6   :  { %v1160_v4 = vsel %vm1152_vm5, %v1148_v62, %v1156_v0  ;;  %v5814_v11 = vpack.c.bf16 %v1159_v1, %v1159_v1  ;;  %v4454_v0 = vcombine.low %v1216_v45, %v1220_v46  ;;  %v4463_v2 = vcombine.high %v1224_v59, %v1228_v61  ;;  %v1272_v45 = vld [vmem:[#allocation15 + $0x348] sm:$0xff] }
 0x3e7   :  { %v5809_v6 = vpack.c.bf16 %v1160_v4, %v1160_v4  ;;  %v1232_v4 = vld [vmem:[#allocation15 + $0x208] sm:$0xff] }
 0x3e8   :  { %v1276_v46 = vld [vmem:[#allocation15 + $0x368] sm:$0xff] }
 0x3e9   :  { %2777 = vmatprep.mubr.bf16.mxu1 %v5809_v6 }
 0x3ea   :  { %2778 = vmatmul.mubr.bf16.vlgmr.msra.gmra.mrb[12].mxu1 %v5814_v11 }
 0x3eb   :  { %2828 = vmatpush1.bf16.msra.mxu1 %v4406_v53  ;;  %2859 = vmatprep.mubr.bf16.mxu1 %v5809_v6 }
 0x3ec   :  { %2829 = vmatprep.subr.bf16.mxu1 %v4415_v12  ;;  %v1236_v12 = vld [vmem:[#allocation15 + $0x228] sm:$0xff] }
 0x3ed   :  { %v1016_v19 = vpop.f32.mrb[8].mxu1 }
 0x3ee   :  { %v1017_v22 = vadd.f32 %v1016_v19, %v612_v15  ;;  %v1018_v23 = vpop.f32.mrb[9].mxu1  ;;  %v4462_v15 = vcombine.low %v1224_v59, %v1228_v61  ;;  %v1240_v19 = vld [vmem:[#allocation15 + $0x248] sm:$0xff]  ;;  %v1116_v61 = vrot.slane %v5794_v42, %v5812_v9 }
 0x3ef   :  { %v1019_v24 = vadd.f32 %v1018_v23, %v616_v16  ;;  %v1020_v25 = vpop.f32.mrb[10].mxu1  ;;  %2830 = vmatpush1.bf16.msra.mxu1 %v4414_v17  ;;  %v4471_v17 = vcombine.high %v1232_v4, %v1236_v12  ;;  %v4470_v23 = vcombine.low %v1232_v4, %v1236_v12  ;;  %v4478_v28 = vcombine.low %v1240_v19, %v1244_v20  ;;  %v1288_v4 = vld [vmem:[#allocation15 + $0x3c8] sm:$0xff] }
 0x3f0   :  { %v1035_v27 = vrot.slane %v1017_v22, 4  ;;  %v1021_v50 = vpop.f32.mrb[11].mxu1  ;;  %2831 = vmatprep.subr.bf16.mxu1 %v4423_v18  ;;  %v4479_v25 = vcombine.high %v1240_v19, %v1244_v20  ;;  %v1292_v12 = vld [vmem:[#allocation15 + $0x3e8] sm:$0xff] }
 0x3f1   :  { %v1041_v53 = vrot.slane %v1019_v24, 4  ;;  %v1252_v50 = vld [vmem:[#allocation15 + $0x2a8] sm:$0xff] }
 0x3f2   :  { %v1036_v58 = vadd.f32 %v1035_v27, %v1017_v22  ;;  %v1248_v27 = vld [vmem:[#allocation15 + $0x288] sm:$0xff] }
 0x3f3   :  { %v1042_v30 = vadd.f32 %v1041_v53, %v1019_v24  ;;  %2832 = vmatpush1.bf16.msra.mxu1 %v4422_v26  ;;  %v4486_v35 = vcombine.low %v1248_v27, %v1252_v50  ;;  %v1296_v19 = vld [vmem:[#allocation15 + $0x408] sm:$0xff] }
 0x3f4   :  { %v1037_v32 = vrot.slane %v1036_v58, 2  ;;  %2833 = vmatprep.subr.bf16.mxu1 %v4431_v51  ;;  %v1300_v20 = vld [vmem:[#allocation15 + $0x428] sm:$0xff] }
 0x3f5   :  { %v1043_v34 = vrot.slane %v1042_v30, 2 }
 0x3f6   :  { %v1038_v37 = vadd.f32 %v1037_v32, %v1036_v58  ;;  %v4487_v58 = vcombine.high %v1248_v27, %v1252_v50  ;;  %v1260_v32 = vld [vmem:[#allocation15 + $0x2e8] sm:$0xff] }
 0x3f7   :  { %v1044_v38 = vadd.f32 %v1043_v34, %v1042_v30  ;;  %2834 = vmatpush1.bf16.msra.mxu1 %v4430_v31  ;;  %v1256_v31 = vld [vmem:[#allocation15 + $0x2c8] sm:$0xff] }
 0x3f8   :  { %v1039_v40 = vrot.slane %v1038_v37, 1  ;;  %2835 = vmatprep.subr.bf16.mxu1 %v4439_v33  ;;  %v1304_v27 = vld [vmem:[#allocation15 + $0x448] sm:$0xff] }
 0x3f9   :  { %v1045_v44 = vrot.slane %v1044_v38, 1  ;;  %v1308_v50 = vld [vmem:[#allocation15 + $0x468] sm:$0xff] }
 0x3fa   :  { %v1040_v47 = vadd.f32 %v1039_v40, %v1038_v37  ;;  %v4495_v37 = vcombine.high %v1256_v31, %v1260_v32  ;;  %v1268_v40 = vld [vmem:[#allocation15 + $0x328] sm:$0xff] }
 0x3fb   :  { %v1046_v48 = vadd.f32 %v1045_v44, %v1044_v38  ;;  %2836 = vmatpush1.bf16.msra.mxu1 %v4438_v39  ;;  %v1264_v39 = vld [vmem:[#allocation15 + $0x308] sm:$0xff] }
 0x3fc   :  { %v1049_v52 = vmul.f32 0.125, %v1040_v47  ;;  %2837 = vmatprep.subr.bf16.mxu1 %v4447_v41  ;;  %v4494_v41 = vcombine.low %v1256_v31, %v1260_v32  ;;  %v4503_v44 = vcombine.high %v1264_v39, %v1268_v40  ;;  %v4502_v47 = vcombine.low %v1264_v39, %v1268_v40  ;;  %v1189_v31 = vld [vmem:[#allocation15 + $0xb0] sm:$0xff]  ;;  %v1312_v32 = vld [vmem:[#allocation15 + $0x488] sm:$0xff] }
 0x3fd   :  { %v1050_v55 = vmul.f32 0.125, %v1046_v48  ;;  %v4511_v48 = vcombine.high %v1272_v45, %v1276_v46  ;;  %v1197_v39 = vld [vmem:[#allocation15 + $0xf0] sm:$0xff]  ;;  %v1320_v40 = vld [vmem:[#allocation15 + $0x4c8] sm:$0xff] }
 0x3fe   :  { %v5826_v62 = vsub.f32 %v1017_v22, %v1049_v52  ;;  %v1284_v52 = vld [vmem:[#allocation15 + $0x3a8] sm:$0xff] }
 0x3ff   :  { %v5828_v63 = vsub.f32 %v1019_v24, %v1050_v55  ;;  %2838 = vmatpush1.bf16.msra.mxu1 %v4446_v49  ;;  %v1280_v49 = vld [vmem:[#allocation15 + $0x388] sm:$0xff]  ;;  %v4510_v55 = vcombine.low %v1272_v45, %v1276_v46  ;;  %v1201_v45 = vld [vmem:[#allocation15 + $0x110] sm:$0xff] }
 0x400   :  { %v1057_v1 = vmul.f32 %v5826_v62, %v5826_v62  ;;  %2839 = vmatprep.subr.bf16.mxu1 %v4455_v54  ;;  %v1112_v54 = vrot.slane %v5794_v42, %v5807_v5  ;;  %v4527_v42 = vcombine.high %v1288_v4, %v1292_v12  ;;  %v1205_v46 = vld [vmem:[#allocation15 + $0x130] sm:$0xff] }
 0x401   :  { %v1058_v3 = vmul.f32 %v5828_v63, %v5828_v63 }
 0x402   :  { %v1071_v13 = vrot.slane %v1057_v1, 4 }
 0x403   :  { %v1077_v14 = vrot.slane %v1058_v3, 4  ;;  %2840 = vmatpush1.bf16.msra.mxu1 %v4454_v0  ;;  %v4519_v0 = vcombine.high %v1280_v49, %v1284_v52 }
 0x404   :  { %v1072_v16 = vadd.f32 %v1071_v13, %v1057_v1  ;;  %2841 = vmatprep.subr.bf16.mxu1 %v4463_v2 }
 0x405   :  { %v1078_v18 = vadd.f32 %v1077_v14, %v1058_v3  ;;  %v1138_v3 = vrot.slane %v5796_v43, %v5807_v5  ;;  %v1142_v14 = vrot.slane %v5796_v43, %v5812_v9  ;;  %v1177_v43 = vld [vmem:[#allocation15 + $0x50] sm:$0xff] }
 0x406   :  { %v1073_v21 = vrot.slane %v1072_v16, 2 }
 0x407   :  { %v1079_v22 = vrot.slane %v1078_v18, 2  ;;  %2842 = vmatpush1.bf16.msra.mxu1 %v4462_v15 }
 0x408   :  { %v1074_v24 = vadd.f32 %v1073_v21, %v1072_v16  ;;  %2843 = vmatprep.subr.bf16.mxu1 %v4471_v17  ;;  %v4518_v16 = vcombine.low %v1280_v49, %v1284_v52  ;;  %v4526_v21 = vcombine.low %v1288_v4, %v1292_v12 }
 0x409   :  { %v1080_v26 = vadd.f32 %v1079_v22, %v1078_v18 }
 0x40a   :  { %v1075_v51 = vrot.slane %v1074_v24, 1 }
 0x40b   :  { %v1081_v53 = vrot.slane %v1080_v26, 1  ;;  %2844 = vmatpush1.bf16.msra.mxu1 %v4470_v23  ;;  %v4535_v23 = vcombine.high %v1296_v19, %v1300_v20 }
 0x40c   :  { %v1076_v29 = vadd.f32 %v1075_v51, %v1074_v24  ;;  %2845 = vmatprep.subr.bf16.mxu1 %v4479_v25 }
 0x40d   :  { %v1082_v30 = vadd.f32 %v1081_v53, %v1080_v26  ;;  %v1181_v26 = vld [vmem:[#allocation15 + $0x70] sm:$0xff]  ;;  %v4534_v53 = vcombine.low %v1296_v19, %v1300_v20 }
 0x40e   :  { %v1085_v33 = vmul.f32 0.125, %v1076_v29  ;;  %v1185_v29 = vld [vmem:[#allocation15 + $0x90] sm:$0xff] }
 0x40f   :  { %v1086_v34 = vmul.f32 0.125, %v1082_v30  ;;  %2846 = vmatpush1.bf16.msra.mxu1 %v4478_v28  ;;  %v4543_v30 = vcombine.high %v1304_v27, %v1308_v50  ;;  %v1225_v20 = vld [vmem:[#allocation15 + $0x1d0] sm:$0xff] }
 0x410   :  { %v1089_v36 = vadd.f32 0.8, %v1085_v33  ;;  %2847 = vmatprep.subr.bf16.mxu1 %v4487_v58  ;;  %v4417_v58 = vcombine.high %v1177_v43, %v1181_v26  ;;  %v1316_v33 = vld [vmem:[#allocation15 + $0x4a8] sm:$0xff] }
 0x411   :  { %v1090_v38 = vadd.f32 0.8, %v1086_v34  ;;  %v4416_v34 = vcombine.low %v1177_v43, %v1181_v26  ;;  %v4550_v56 = vcombine.low %v1312_v32, %v1316_v33  ;;  %v1237_v26 = vld [vmem:[#allocation15 + $0x230] sm:$0xff] }
 0x412   :  { %5203 = vrsqrt.f32 %v1089_v36  ;;  %v4425_v36 = vcombine.high %v1185_v29, %v1189_v31 }
 0x413   :  { %5205 = vrsqrt.f32 %v1090_v38  ;;  %2848 = vmatpush1.bf16.msra.mxu1 %v4486_v35  ;;  %v4542_v35 = vcombine.low %v1304_v27, %v1308_v50  ;;  %v1193_v38 = vld [vmem:[#allocation15 + $0xd0] sm:$0xff]  ;;  %v1360_v27 = vld [vmem:[#allocation15 + $0x608] sm:$0xff] }
 0x414   :  { %2849 = vmatprep.subr.bf16.mxu1 %v4495_v37  ;;  %v4551_v37 = vcombine.high %v1312_v32, %v1316_v33  ;;  %v4433_v57 = vcombine.high %v1193_v38, %v1197_v39  ;;  %v4432_v49 = vcombine.low %v1193_v38, %v1197_v39  ;;  %v1364_v50 = vld [vmem:[#allocation15 + $0x628] sm:$0xff]  ;;  %v1245_v32 = vld [vmem:[#allocation15 + $0x270] sm:$0xff] }
 0x415   :  { %v1368_v33 = vld [vmem:[#allocation15 + $0x648] sm:$0xff]  ;;  %v1249_v39 = vld [vmem:[#allocation15 + $0x290] sm:$0xff] }
 0x417   :  { %2850 = vmatpush1.bf16.msra.mxu1 %v4494_v41  ;;  %v1324_v41 = vld [vmem:[#allocation15 + $0x4e8] sm:$0xff] }
 0x418   :  { %2851 = vmatprep.subr.bf16.mxu1 %v4503_v44  ;;  %v4424_v44 = vcombine.low %v1185_v29, %v1189_v31  ;;  %v4558_v52 = vcombine.low %v1320_v40, %v1324_v41  ;;  %v1241_v31 = vld [vmem:[#allocation15 + $0x250] sm:$0xff] }
 0x41b   :  { %2852 = vmatpush1.bf16.msra.mxu1 %v4502_v47  ;;  %v1328_v47 = vld [vmem:[#allocation15 + $0x508] sm:$0xff] }
 0x41c   :  { %v5204_v59 = vpop.eup %5203  ;;  %2853 = vmatprep.subr.bf16.mxu1 %v4511_v48  ;;  %v1332_v48 = vld [vmem:[#allocation15 + $0x528] sm:$0xff] }
 0x41d   :  { %v5206_v1 = vpop.eup %5205  ;;  %v1097_v2 = vmul.f32 %v5204_v59, %v5826_v62  ;;  %v1209_v59 = vld [vmem:[#allocation15 + $0x150] sm:$0xff] }
 0x41e   :  { %v1098_v13 = vmul.f32 %v5206_v1, %v5828_v63  ;;  %v1340_v1 = vld [vmem:[#allocation15 + $0x568] sm:$0xff] }
 0x41f   :  { %v1123_v15 = vmul.f32 %v1112_v54, %v1097_v2  ;;  %2854 = vmatpush1.bf16.msra.mxu1 %v4510_v55  ;;  %v4441_v54 = vcombine.high %v1201_v45, %v1205_v46  ;;  %v4567_v55 = vcombine.high %v1328_v47, %v1332_v48  ;;  %v4440_v2 = vcombine.low %v1201_v45, %v1205_v46  ;;  %v1257_v46 = vld [vmem:[#allocation15 + $0x2d0] sm:$0xff] }
 0x420   :  { %v1124_v17 = vmul.f32 %v1116_v61, %v1098_v13  ;;  %2855 = vmatprep.subr.bf16.mxu1 %v4519_v0  ;;  %v1213_v61 = vld [vmem:[#allocation15 + $0x170] sm:$0xff]  ;;  %v1336_v0 = vld [vmem:[#allocation15 + $0x548] sm:$0xff] }
 0x421   :  { %v1149_v18 = vadd.f32 %v1138_v3, %v1123_v15  ;;  %v4566_v3 = vcombine.low %v1328_v47, %v1332_v48  ;;  %v4449_v4 = vcombine.high %v1209_v59, %v1213_v61  ;;  %v4575_v12 = vcombine.high %v1336_v0, %v1340_v1  ;;  %v1217_v13 = vld [vmem:[#allocation15 + $0x190] sm:$0xff]  ;;  %v1344_v15 = vld [vmem:[#allocation15 + $0x588] sm:$0xff] }
 0x422   :  { %v1150_v62 = vadd.f32 %v1142_v14, %v1124_v17  ;;  %v1221_v14 = vld [vmem:[#allocation15 + $0x1b0] sm:$0xff]  ;;  %v4448_v17 = vcombine.low %v1209_v59, %v1213_v61  ;;  %v1384_v48 = vld [vmem:[#allocation15 + $0x6c8] sm:$0xff] }
 0x423   :  { %2856 = vmatpush1.bf16.msra.mxu1 %v4518_v16  ;;  %vm1153_vm6 = vcmp.gt.f32.partialorder %v1149_v18, 0.0  ;;  %v1157_v22 = vmul.f32 0.2, %v1149_v18  ;;  %v1348_v16 = vld [vmem:[#allocation15 + $0x5a8] sm:$0xff]  ;;  %v1261_v47 = vld [vmem:[#allocation15 + $0x2f0] sm:$0xff] }
 0x424   :  { %2857 = vmatprep.subr.bf16.mxu1 %v4527_v42  ;;  %vm1154_vm7 = vcmp.gt.f32.partialorder %v1150_v62, 0.0  ;;  %v1158_v63 = vmul.f32 0.2, %v1150_v62  ;;  %v4574_v42 = vcombine.low %v1336_v0, %v1340_v1  ;;  %v4583_v19 = vcombine.high %v1344_v15, %v1348_v16  ;;  %v1265_v61 = vld [vmem:[#allocation15 + $0x310] sm:$0xff]  ;;  %v1392_v1 = vld [vmem:[#allocation15 + $0x708] sm:$0xff] }
 0x425   :  { %v1161_v24 = vsel %vm1153_vm6, %v1149_v18, %v1157_v22  ;;  %v4457_v18 = vcombine.high %v1217_v13, %v1221_v14  ;;  %v1356_v22 = vld [vmem:[#allocation15 + $0x5e8] sm:$0xff]  ;;  %v1269_v0 = vld [vmem:[#allocation15 + $0x330] sm:$0xff] }
 0x426   :  { %v1162_v25 = vsel %vm1154_vm7, %v1150_v62, %v1158_v63  ;;  %v5846_v28 = vpack.c.bf16 %v1161_v24, %v1161_v24  ;;  %v1229_v62 = vld [vmem:[#allocation15 + $0x1f0] sm:$0xff]  ;;  %v4456_v63 = vcombine.low %v1217_v13, %v1221_v14 }
 0x427   :  { %2858 = vmatpush1.bf16.msra.mxu1 %v4526_v21  ;;  %v5844_v51 = vpack.c.bf16 %v1162_v25, %v1162_v25  ;;  %v1352_v21 = vld [vmem:[#allocation15 + $0x5c8] sm:$0xff]  ;;  %v4465_v24 = vcombine.high %v1225_v20, %v1229_v62  ;;  %v1233_v25 = vld [vmem:[#allocation15 + $0x210] sm:$0xff] }
 0x428   :  { %2868 = vmatprep.subr.bf16.mxu1 %v4535_v23  ;;  %v4582_v23 = vcombine.low %v1344_v15, %v1348_v16  ;;  %v4591_v43 = vcombine.high %v1352_v21, %v1356_v22  ;;  %v4590_v29 = vcombine.low %v1352_v21, %v1356_v22  ;;  %v1273_v14 = vld [vmem:[#allocation15 + $0x350] sm:$0xff]  ;;  %v1400_v16 = vld [vmem:[#allocation15 + $0x748] sm:$0xff] }
 0x429   :  { %2818 = vmatprep.mubr.bf16.mxu0 %v5844_v51  ;;  %v1277_v15 = vld [vmem:[#allocation15 + $0x370] sm:$0xff]  ;;  %v1408_v22 = vld [vmem:[#allocation15 + $0x788] sm:$0xff] }
 0x42a   :  { %2819 = vmatmul.mubr.bf16.vlgmr.msra.gmra.mrb[4].mxu0 %v5846_v28  ;;  %2860 = vmatmul.mubr.bf16.vlgmr.msra.gmra.mrb[16].mxu1 %v5814_v11  ;;  %v1285_v21 = vld [vmem:[#allocation15 + $0x3b0] sm:$0xff] }
 0x42b   :  { %2910 = vmatpush1.bf16.msra.mxu0 %v4408_v60  ;;  %2869 = vmatpush1.bf16.msra.mxu1 %v4534_v53  ;;  %v4559_v60 = vcombine.high %v1320_v40, %v1324_v41  ;;  %v4464_v53 = vcombine.low %v1225_v20, %v1229_v62  ;;  %v1253_v40 = vld [vmem:[#allocation15 + $0x2b0] sm:$0xff]  ;;  %v1376_v41 = vld [vmem:[#allocation15 + $0x688] sm:$0xff] }
 0x42c   :  { %2900 = vmatprep.mubr.bf16.mxu1 %v5844_v51  ;;  %2941 = vmatprep.mubr.bf16.mxu0 %v5809_v6  ;;  %v1281_v62 = vld [vmem:[#allocation15 + $0x390] sm:$0xff] }
 0x42d   :  { %2911 = vmatprep.subr.bf16.mxu0 %v4417_v58  ;;  %2870 = vmatprep.subr.bf16.mxu1 %v4543_v30  ;;  %v4473_v58 = vcombine.high %v1233_v25, %v1237_v26  ;;  %v4599_v30 = vcombine.high %v1360_v27, %v1364_v50 }
 0x42f   :  { %2912 = vmatpush1.bf16.msra.mxu0 %v4416_v34  ;;  %2871 = vmatpush1.bf16.msra.mxu1 %v4542_v35  ;;  %v1372_v34 = vld [vmem:[#allocation15 + $0x668] sm:$0xff]  ;;  %v4472_v35 = vcombine.low %v1233_v25, %v1237_v26  ;;  %v1289_v26 = vld [vmem:[#allocation15 + $0x3d0] sm:$0xff] }
 0x430   :  { %2913 = vmatprep.subr.bf16.mxu0 %v4425_v36  ;;  %2872 = vmatprep.subr.bf16.mxu1 %v4551_v37  ;;  %v4598_v36 = vcombine.low %v1360_v27, %v1364_v50  ;;  %v4481_v37 = vcombine.high %v1241_v31, %v1245_v32  ;;  %v4607_v38 = vcombine.high %v1368_v33, %v1372_v34  ;;  %v1293_v27 = vld [vmem:[#allocation15 + $0x3f0] sm:$0xff]  ;;  %v1416_v50 = vld [vmem:[#allocation15 + $0x7c8] sm:$0xff] }
 0x433   :  { %2914 = vmatpush1.bf16.msra.mxu0 %v4424_v44  ;;  %2873 = vmatpush1.bf16.msra.mxu1 %v4550_v56  ;;  %v1380_v44 = vld [vmem:[#allocation15 + $0x6a8] sm:$0xff]  ;;  %v4480_v56 = vcombine.low %v1241_v31, %v1245_v32  ;;  %v1297_v32 = vld [vmem:[#allocation15 + $0x410] sm:$0xff] }
 0x434   :  { %2915 = vmatprep.subr.bf16.mxu0 %v4433_v57  ;;  %2874 = vmatprep.subr.bf16.mxu1 %v4559_v60  ;;  %v4606_v57 = vcombine.low %v1368_v33, %v1372_v34  ;;  %v4489_v60 = vcombine.high %v1249_v39, %v1253_v40  ;;  %v4615_v45 = vcombine.high %v1376_v41, %v1380_v44  ;;  %v1301_v33 = vld [vmem:[#allocation15 + $0x430] sm:$0xff]  ;;  %v1170_v34 = vld [vmem:[#allocation15 + $0x18] sm:$0xff] }
 0x437   :  { %2916 = vmatpush1.bf16.msra.mxu0 %v4432_v49  ;;  %2875 = vmatpush1.bf16.msra.mxu1 %v4558_v52  ;;  %v1388_v49 = vld [vmem:[#allocation15 + $0x6e8] sm:$0xff]  ;;  %v4488_v52 = vcombine.low %v1249_v39, %v1253_v40  ;;  %v1305_v40 = vld [vmem:[#allocation15 + $0x450] sm:$0xff] }
 0x438   :  { %2917 = vmatprep.subr.bf16.mxu0 %v4441_v54  ;;  %2876 = vmatprep.subr.bf16.mxu1 %v4567_v55  ;;  %v4614_v54 = vcombine.low %v1376_v41, %v1380_v44  ;;  %v4497_v55 = vcombine.high %v1257_v46, %v1261_v47  ;;  %v4623_v59 = vcombine.high %v1384_v48, %v1388_v49  ;;  %v1309_v41 = vld [vmem:[#allocation15 + $0x470] sm:$0xff]  ;;  %v1178_v44 = vld [vmem:[#allocation15 + $0x58] sm:$0xff] }
 0x43b   :  { %2918 = vmatpush1.bf16.msra.mxu0 %v4440_v2  ;;  %2877 = vmatpush1.bf16.msra.mxu1 %v4566_v3  ;;  %v1396_v2 = vld [vmem:[#allocation15 + $0x728] sm:$0xff]  ;;  %v4496_v3 = vcombine.low %v1257_v46, %v1261_v47  ;;  %v1313_v47 = vld [vmem:[#allocation15 + $0x490] sm:$0xff] }
 0x43c   :  { %2919 = vmatprep.subr.bf16.mxu0 %v4449_v4  ;;  %2878 = vmatprep.subr.bf16.mxu1 %v4575_v12  ;;  %v4622_v4 = vcombine.low %v1384_v48, %v1388_v49  ;;  %v4505_v12 = vcombine.high %v1265_v61, %v1269_v0  ;;  %v4631_v13 = vcombine.high %v1392_v1, %v1396_v2  ;;  %v1317_v48 = vld [vmem:[#allocation15 + $0x4b0] sm:$0xff]  ;;  %v1186_v49 = vld [vmem:[#allocation15 + $0x98] sm:$0xff] }
 0x43f   :  { %2920 = vmatpush1.bf16.msra.mxu0 %v4448_v17  ;;  %2879 = vmatpush1.bf16.msra.mxu1 %v4574_v42  ;;  %v1404_v17 = vld [vmem:[#allocation15 + $0x768] sm:$0xff]  ;;  %v4504_v42 = vcombine.low %v1265_v61, %v1269_v0  ;;  %v1321_v0 = vld [vmem:[#allocation15 + $0x4d0] sm:$0xff] }
 0x440   :  { %2921 = vmatprep.subr.bf16.mxu0 %v4457_v18  ;;  %2880 = vmatprep.subr.bf16.mxu1 %v4583_v19  ;;  %v4630_v18 = vcombine.low %v1392_v1, %v1396_v2  ;;  %v4513_v19 = vcombine.high %v1273_v14, %v1277_v15  ;;  %v4639_v20 = vcombine.high %v1400_v16, %v1404_v17  ;;  %v1325_v1 = vld [vmem:[#allocation15 + $0x4f0] sm:$0xff]  ;;  %v1194_v2 = vld [vmem:[#allocation15 + $0xd8] sm:$0xff] }
 0x443   :  { %2922 = vmatpush1.bf16.msra.mxu0 %v4456_v63  ;;  %2881 = vmatpush1.bf16.msra.mxu1 %v4582_v23  ;;  %v1412_v63 = vld [vmem:[#allocation15 + $0x7a8] sm:$0xff]  ;;  %v4512_v23 = vcombine.low %v1273_v14, %v1277_v15  ;;  %v1329_v15 = vld [vmem:[#allocation15 + $0x510] sm:$0xff] }
 0x444   :  { %2923 = vmatprep.subr.bf16.mxu0 %v4465_v24  ;;  %2882 = vmatprep.subr.bf16.mxu1 %v4591_v43  ;;  %v4638_v24 = vcombine.low %v1400_v16, %v1404_v17  ;;  %v4521_v43 = vcombine.high %v1281_v62, %v1285_v21  ;;  %v4647_v25 = vcombine.high %v1408_v22, %v1412_v63  ;;  %v1333_v16 = vld [vmem:[#allocation15 + $0x530] sm:$0xff]  ;;  %v1206_v17 = vld [vmem:[#allocation15 + $0x138] sm:$0xff] }
 0x447   :  { %2924 = vmatpush1.bf16.msra.mxu0 %v4464_v53  ;;  %2883 = vmatpush1.bf16.msra.mxu1 %v4590_v29  ;;  %v1420_v53 = vld [vmem:[#allocation15 + $0x7e8] sm:$0xff]  ;;  %v4520_v29 = vcombine.low %v1281_v62, %v1285_v21  ;;  %v1337_v62 = vld [vmem:[#allocation15 + $0x550] sm:$0xff] }
 0x448   :  { %2925 = vmatprep.subr.bf16.mxu0 %v4473_v58  ;;  %2884 = vmatprep.subr.bf16.mxu1 %v4599_v30  ;;  %v4646_v58 = vcombine.low %v1408_v22, %v1412_v63  ;;  %v4529_v30 = vcombine.high %v1289_v26, %v1293_v27  ;;  %v4655_v31 = vcombine.high %v1416_v50, %v1420_v53  ;;  %v1341_v21 = vld [vmem:[#allocation15 + $0x570] sm:$0xff]  ;;  %v1210_v22 = vld [vmem:[#allocation15 + $0x158] sm:$0xff] }
 0x449   :  { %v1214_v63 = vld [vmem:[#allocation15 + $0x178] sm:$0xff] }
 0x44b   :  { %2926 = vmatpush1.bf16.msra.mxu0 %v4472_v35  ;;  %2885 = vmatpush1.bf16.msra.mxu1 %v4598_v36  ;;  %v1174_v35 = vld [vmem:[#allocation15 + $0x38] sm:$0xff]  ;;  %v4528_v36 = vcombine.low %v1289_v26, %v1293_v27  ;;  %v1345_v26 = vld [vmem:[#allocation15 + $0x590] sm:$0xff] }
 0x44c   :  { %2927 = vmatprep.subr.bf16.mxu0 %v4481_v37  ;;  %2886 = vmatprep.subr.bf16.mxu1 %v4607_v38  ;;  %v4654_v37 = vcombine.low %v1416_v50, %v1420_v53  ;;  %v4537_v38 = vcombine.high %v1297_v32, %v1301_v33  ;;  %v4411_v39 = vcombine.high %v1170_v34, %v1174_v35  ;;  %v1349_v27 = vld [vmem:[#allocation15 + $0x5b0] sm:$0xff]  ;;  %v1218_v50 = vld [vmem:[#allocation15 + $0x198] sm:$0xff] }
 0x44d   :  { %v1222_v53 = vld [vmem:[#allocation15 + $0x1b8] sm:$0xff] }
 0x44f   :  { %2928 = vmatpush1.bf16.msra.mxu0 %v4480_v56  ;;  %2887 = vmatpush1.bf16.msra.mxu1 %v4606_v57  ;;  %v1182_v56 = vld [vmem:[#allocation15 + $0x78] sm:$0xff]  ;;  %v4536_v57 = vcombine.low %v1297_v32, %v1301_v33  ;;  %v1353_v32 = vld [vmem:[#allocation15 + $0x5d0] sm:$0xff] }
 0x450   :  { %2929 = vmatprep.subr.bf16.mxu0 %v4489_v60  ;;  %2888 = vmatprep.subr.bf16.mxu1 %v4615_v45  ;;  %v4410_v60 = vcombine.low %v1170_v34, %v1174_v35  ;;  %v4545_v45 = vcombine.high %v1305_v40, %v1309_v41  ;;  %v4419_v46 = vcombine.high %v1178_v44, %v1182_v56  ;;  %v1357_v33 = vld [vmem:[#allocation15 + $0x5f0] sm:$0xff]  ;;  %v1226_v34 = vld [vmem:[#allocation15 + $0x1d8] sm:$0xff] }
 0x451   :  { %v1230_v35 = vld [vmem:[#allocation15 + $0x1f8] sm:$0xff] }
 0x453   :  { %2930 = vmatpush1.bf16.msra.mxu0 %v4488_v52  ;;  %2889 = vmatpush1.bf16.msra.mxu1 %v4614_v54  ;;  %v1190_v52 = vld [vmem:[#allocation15 + $0xb8] sm:$0xff]  ;;  %v4544_v54 = vcombine.low %v1305_v40, %v1309_v41  ;;  %v1361_v40 = vld [vmem:[#allocation15 + $0x610] sm:$0xff] }
 0x454   :  { %2931 = vmatprep.subr.bf16.mxu0 %v4497_v55  ;;  %2890 = vmatprep.subr.bf16.mxu1 %v4623_v59  ;;  %v4418_v55 = vcombine.low %v1178_v44, %v1182_v56  ;;  %v4553_v59 = vcombine.high %v1313_v47, %v1317_v48  ;;  %v4427_v61 = vcombine.high %v1186_v49, %v1190_v52  ;;  %v1365_v41 = vld [vmem:[#allocation15 + $0x630] sm:$0xff]  ;;  %v1234_v44 = vld [vmem:[#allocation15 + $0x218] sm:$0xff] }
 0x455   :  { %v1238_v56 = vld [vmem:[#allocation15 + $0x238] sm:$0xff] }
 0x457   :  { %2932 = vmatpush1.bf16.msra.mxu0 %v4496_v3  ;;  %2891 = vmatpush1.bf16.msra.mxu1 %v4622_v4  ;;  %v1198_v3 = vld [vmem:[#allocation15 + $0xf8] sm:$0xff]  ;;  %v4552_v4 = vcombine.low %v1313_v47, %v1317_v48  ;;  %v1369_v47 = vld [vmem:[#allocation15 + $0x650] sm:$0xff] }
 0x458   :  { %2933 = vmatprep.subr.bf16.mxu0 %v4505_v12  ;;  %2892 = vmatprep.subr.bf16.mxu1 %v4631_v13  ;;  %v4426_v12 = vcombine.low %v1186_v49, %v1190_v52  ;;  %v4561_v13 = vcombine.high %v1321_v0, %v1325_v1  ;;  %v4435_v14 = vcombine.high %v1194_v2, %v1198_v3  ;;  %v1373_v48 = vld [vmem:[#allocation15 + $0x670] sm:$0xff]  ;;  %v1242_v49 = vld [vmem:[#allocation15 + $0x258] sm:$0xff] }
 0x459   :  { %v1246_v52 = vld [vmem:[#allocation15 + $0x278] sm:$0xff] }
 0x45b   :  { %2934 = vmatpush1.bf16.msra.mxu0 %v4504_v42  ;;  %2893 = vmatpush1.bf16.msra.mxu1 %v4630_v18  ;;  %v4560_v42 = vcombine.low %v1321_v0, %v1325_v1  ;;  %v4434_v18 = vcombine.low %v1194_v2, %v1198_v3  ;;  %v1377_v0 = vld [vmem:[#allocation15 + $0x690] sm:$0xff]  ;;  %v1250_v2 = vld [vmem:[#allocation15 + $0x298] sm:$0xff] }
 0x45c   :  { %2935 = vmatprep.subr.bf16.mxu0 %v4513_v19  ;;  %2894 = vmatprep.subr.bf16.mxu1 %v4639_v20  ;;  %v4569_v19 = vcombine.high %v1329_v15, %v1333_v16  ;;  %v1381_v1 = vld [vmem:[#allocation15 + $0x6b0] sm:$0xff]  ;;  %v1254_v3 = vld [vmem:[#allocation15 + $0x2b8] sm:$0xff] }
 0x45f   :  { %2936 = vmatpush1.bf16.msra.mxu0 %v4512_v23  ;;  %2895 = vmatpush1.bf16.msra.mxu1 %v4638_v24  ;;  %v4568_v23 = vcombine.low %v1329_v15, %v1333_v16  ;;  %v1385_v15 = vld [vmem:[#allocation15 + $0x6d0] sm:$0xff] }
 0x460   :  { %2937 = vmatprep.subr.bf16.mxu0 %v4521_v43  ;;  %2896 = vmatprep.subr.bf16.mxu1 %v4647_v25  ;;  %v4577_v43 = vcombine.high %v1337_v62, %v1341_v21  ;;  %v4451_v25 = vcombine.high %v1210_v22, %v1214_v63  ;;  %v1389_v16 = vld [vmem:[#allocation15 + $0x6f0] sm:$0xff] }
 0x463   :  { %2938 = vmatpush1.bf16.msra.mxu0 %v4520_v29  ;;  %2897 = vmatpush1.bf16.msra.mxu1 %v4646_v58  ;;  %v4576_v29 = vcombine.low %v1337_v62, %v1341_v21  ;;  %v4450_v58 = vcombine.low %v1210_v22, %v1214_v63  ;;  %v1393_v62 = vld [vmem:[#allocation15 + $0x710] sm:$0xff]  ;;  %v1266_v22 = vld [vmem:[#allocation15 + $0x318] sm:$0xff] }
 0x464   :  { %2939 = vmatprep.subr.bf16.mxu0 %v4529_v30  ;;  %2898 = vmatprep.subr.bf16.mxu1 %v4655_v31  ;;  %v4585_v30 = vcombine.high %v1345_v26, %v1349_v27  ;;  %v4459_v31 = vcombine.high %v1218_v50, %v1222_v53  ;;  %v1397_v21 = vld [vmem:[#allocation15 + $0x730] sm:$0xff]  ;;  %v1270_v63 = vld [vmem:[#allocation15 + $0x338] sm:$0xff] }
 0x467   :  { %2940 = vmatpush1.bf16.msra.mxu0 %v4528_v36  ;;  %2899 = vmatpush1.bf16.msra.mxu1 %v4654_v37  ;;  %v4584_v36 = vcombine.low %v1345_v26, %v1349_v27  ;;  %v4458_v37 = vcombine.low %v1218_v50, %v1222_v53  ;;  %v1401_v26 = vld [vmem:[#allocation15 + $0x750] sm:$0xff]  ;;  %v1274_v50 = vld [vmem:[#allocation15 + $0x358] sm:$0xff] }
 0x468   :  { %2950 = vmatprep.subr.bf16.mxu0 %v4537_v38  ;;  %2991 = vmatprep.subr.bf16.mxu1 %v4411_v39  ;;  %v4593_v38 = vcombine.high %v1353_v32, %v1357_v33  ;;  %v4467_v39 = vcombine.high %v1226_v34, %v1230_v35  ;;  %v1405_v27 = vld [vmem:[#allocation15 + $0x770] sm:$0xff]  ;;  %v1278_v53 = vld [vmem:[#allocation15 + $0x378] sm:$0xff] }
 0x46a   :  { %2942 = vmatmul.mubr.bf16.vlgmr.msra.gmra.mrb[8].mxu0 %v5814_v11  ;;  %2901 = vmatmul.mubr.bf16.vlgmr.msra.gmra.mrb[16].mxu1 %v5846_v28 }
 0x46b   :  { %2951 = vmatpush1.bf16.msra.mxu0 %v4536_v57  ;;  %2982 = vmatprep.mubr.bf16.mxu0 %v5844_v51  ;;  %v4592_v57 = vcombine.low %v1353_v32, %v1357_v33  ;;  %v1409_v32 = vld [vmem:[#allocation15 + $0x790] sm:$0xff] }
 0x46c   :  { %2992 = vmatpush1.bf16.msra.mxu1 %v4410_v60  ;;  %3023 = vmatprep.mubr.bf16.mxu1 %v5809_v6  ;;  %v1202_v6 = vld [vmem:[#allocation15 + $0x118] sm:$0xff]  ;;  %v4466_v60 = vcombine.low %v1226_v34, %v1230_v35  ;;  %v1413_v33 = vld [vmem:[#allocation15 + $0x7b0] sm:$0xff] }
 0x46d   :  { %2952 = vmatprep.subr.bf16.mxu0 %v4545_v45  ;;  %2993 = vmatprep.subr.bf16.mxu1 %v4419_v46  ;;  %v4443_v20 = vcombine.high %v1202_v6, %v1206_v17  ;;  %v4442_v24 = vcombine.low %v1202_v6, %v1206_v17  ;;  %v4601_v45 = vcombine.high %v1361_v40, %v1365_v41  ;;  %v1258_v6 = vld [vmem:[#allocation15 + $0x2d8] sm:$0xff] }
 0x46e   :  { %v4475_v46 = vcombine.high %v1234_v44, %v1238_v56  ;;  %v1262_v17 = vld [vmem:[#allocation15 + $0x2f8] sm:$0xff] }
 0x46f   :  { %2953 = vmatpush1.bf16.msra.mxu0 %v4544_v54  ;;  %v4600_v54 = vcombine.low %v1361_v40, %v1365_v41  ;;  %v1282_v34 = vld [vmem:[#allocation15 + $0x398] sm:$0xff]  ;;  %v1417_v40 = vld [vmem:[#allocation15 + $0x7d0] sm:$0xff] }
 0x470   :  { %2994 = vmatpush1.bf16.msra.mxu1 %v4418_v55  ;;  %2954 = vmatprep.subr.bf16.mxu0 %v4553_v59  ;;  %v4474_v55 = vcombine.low %v1234_v44, %v1238_v56  ;;  %v4609_v59 = vcombine.high %v1369_v47, %v1373_v48  ;;  %v1286_v35 = vld [vmem:[#allocation15 + $0x3b8] sm:$0xff]  ;;  %v1421_v41 = vld [vmem:[#allocation15 + $0x7f0] sm:$0xff] }
 0x471   :  { %2995 = vmatprep.subr.bf16.mxu1 %v4427_v61  ;;  %v4483_v61 = vcombine.high %v1242_v49, %v1246_v52  ;;  %v1290_v44 = vld [vmem:[#allocation15 + $0x3d8] sm:$0xff] }
 0x472   :  { %v1294_v56 = vld [vmem:[#allocation15 + $0x3f8] sm:$0xff] }
 0x473   :  { %2955 = vmatpush1.bf16.msra.mxu0 %v4552_v4  ;;  %v4608_v4 = vcombine.low %v1369_v47, %v1373_v48  ;;  %v1298_v47 = vld [vmem:[#allocation15 + $0x418] sm:$0xff] }
 0x474   :  { %2996 = vmatpush1.bf16.msra.mxu1 %v4426_v12  ;;  %2956 = vmatprep.subr.bf16.mxu0 %v4561_v13  ;;  %v4482_v12 = vcombine.low %v1242_v49, %v1246_v52  ;;  %v4617_v13 = vcombine.high %v1377_v0, %v1381_v1  ;;  %v1302_v48 = vld [vmem:[#allocation15 + $0x438] sm:$0xff]  ;;  %v4656_v49 = vcombine.low %v1417_v40, %v1421_v41 }
 0x475   :  { %2997 = vmatprep.subr.bf16.mxu1 %v4435_v14  ;;  %v4491_v14 = vcombine.high %v1250_v2, %v1254_v3  ;;  %v4530_v52 = vcombine.low %v1290_v44, %v1294_v56 }
 0x477   :  { %2957 = vmatpush1.bf16.msra.mxu0 %v4560_v42  ;;  %v4616_v42 = vcombine.low %v1377_v0, %v1381_v1  ;;  %v5003_v0 = vld [vmem:[#allocation16] ss:$8 sps:$4 sm:$0xff]   ;;  %v4538_v1 = vcombine.low %v1298_v47, %v1302_v48 }
 0x478   :  { %2998 = vmatpush1.bf16.msra.mxu1 %v4434_v18  ;;  %2958 = vmatprep.subr.bf16.mxu0 %v4569_v19  ;;  %v4490_v18 = vcombine.low %v1250_v2, %v1254_v3  ;;  %v4625_v19 = vcombine.high %v1385_v15, %v1389_v16  ;;  %v5008_v3 = vld [vmem:[#allocation16 + $0x14] ss:$8 sps:$4 sm:$0xff]  }
 0x479   :  { %2999 = vmatprep.subr.bf16.mxu1 %v4443_v20  ;;  %v4499_v20 = vcombine.high %v1258_v6, %v1262_v17 }
 0x47b   :  { %2959 = vmatpush1.bf16.msra.mxu0 %v4568_v23  ;;  %v4624_v23 = vcombine.low %v1385_v15, %v1389_v16  ;;  %v5011_v15 = vld [vmem:[#allocation16 + $0x24] ss:$8 sps:$4 sm:$0xff]  }
 0x47c   :  { %3000 = vmatpush1.bf16.msra.mxu1 %v4442_v24  ;;  %2960 = vmatprep.subr.bf16.mxu0 %v4577_v43  ;;  %v4498_v24 = vcombine.low %v1258_v6, %v1262_v17  ;;  %v4633_v43 = vcombine.high %v1393_v62, %v1397_v21  ;;  %v1322_v6 = vld [vmem:[#allocation15 + $0x4d8] sm:$0xff] }
 0x47d   :  { %3001 = vmatprep.subr.bf16.mxu1 %v4451_v25  ;;  %v4507_v25 = vcombine.high %v1266_v22, %v1270_v63  ;;  %v1326_v17 = vld [vmem:[#allocation15 + $0x4f8] sm:$0xff] }
 0x47f   :  { %2961 = vmatpush1.bf16.msra.mxu0 %v4576_v29  ;;  %v4632_v29 = vcombine.low %v1393_v62, %v1397_v21  ;;  %v1334_v62 = vld [vmem:[#allocation15 + $0x538] sm:$0xff] }
 0x480   :  { %3002 = vmatpush1.bf16.msra.mxu1 %v4450_v58  ;;  %2962 = vmatprep.subr.bf16.mxu0 %v4585_v30  ;;  %v4506_v58 = vcombine.low %v1266_v22, %v1270_v63  ;;  %v4641_v30 = vcombine.high %v1401_v26, %v1405_v27  ;;  %v5012_v21 = vld [vmem:[#allocation16 + $0x30] ss:$8 sps:$4 sm:$0xff]   ;;  %v5017_v22 = vld [vmem:[#allocation16 + $0x44] ss:$8 sps:$4 sm:$0xff]  }
 0x481   :  { %3003 = vmatprep.subr.bf16.mxu1 %v4459_v31  ;;  %v4515_v31 = vcombine.high %v1274_v50, %v1278_v53 }
 0x483   :  { %2963 = vmatpush1.bf16.msra.mxu0 %v4584_v36  ;;  %v4640_v36 = vcombine.low %v1401_v26, %v1405_v27  ;;  %v5020_v26 = vld [vmem:[#allocation16 + $0x54] ss:$8 sps:$4 sm:$0xff]  }
 0x484   :  { %3004 = vmatpush1.bf16.msra.mxu1 %v4458_v37  ;;  %2964 = vmatprep.subr.bf16.mxu0 %v4593_v38  ;;  %v4514_v37 = vcombine.low %v1274_v50, %v1278_v53  ;;  %v4649_v38 = vcombine.high %v1409_v32, %v1413_v33  ;;  %v1346_v50 = vld [vmem:[#allocation15 + $0x598] sm:$0xff] }
 0x485   :  { %3005 = vmatprep.subr.bf16.mxu1 %v4467_v39  ;;  %v4523_v39 = vcombine.high %v1282_v34, %v1286_v35  ;;  %v1350_v53 = vld [vmem:[#allocation15 + $0x5b8] sm:$0xff] }
 0x487   :  { %2965 = vmatpush1.bf16.msra.mxu0 %v4592_v57  ;;  %v4648_v57 = vcombine.low %v1409_v32, %v1413_v33  ;;  %v4587_v32 = vcombine.high %v1346_v50, %v1350_v53 }
 0x488   :  { %3006 = vmatpush1.bf16.msra.mxu1 %v4466_v60  ;;  %2966 = vmatprep.subr.bf16.mxu0 %v4601_v45  ;;  %v4522_v60 = vcombine.low %v1282_v34, %v1286_v35  ;;  %v4657_v45 = vcombine.high %v1417_v40, %v1421_v41  ;;  %v1354_v34 = vld [vmem:[#allocation15 + $0x5d8] sm:$0xff] }
 0x489   :  { %3007 = vmatprep.subr.bf16.mxu1 %v4475_v46  ;;  %v4531_v46 = vcombine.high %v1290_v44, %v1294_v56  ;;  %v1358_v35 = vld [vmem:[#allocation15 + $0x5f8] sm:$0xff] }
 0x48a   :  { %v5026_v40 = vld [vmem:[#allocation16 + $0x74] ss:$8 sps:$4 sm:$0xff]   ;;  %v4595_v41 = vcombine.high %v1354_v34, %v1358_v35 }
 0x48b   :  { %2967 = vmatpush1.bf16.msra.mxu0 %v4600_v54  ;;  %v5005_v54 = vld [vmem:[#allocation16 + $0x4] ss:$8 sps:$4 sm:$0xff]   ;;  %v1362_v44 = vld [vmem:[#allocation15 + $0x618] sm:$0xff] }
 0x48c   :  { %3008 = vmatpush1.bf16.msra.mxu1 %v4474_v55  ;;  %2968 = vmatprep.subr.bf16.mxu0 %v4609_v59  ;;  %v4539_v55 = vcombine.high %v1298_v47, %v1302_v48  ;;  %v1306_v59 = vld [vmem:[#allocation15 + $0x458] sm:$0xff] }
 0x48d   :  { %3009 = vmatprep.subr.bf16.mxu1 %v4483_v61  ;;  %v1310_v61 = vld [vmem:[#allocation15 + $0x478] sm:$0xff] }
 0x48e   :  { %v4547_v2 = vcombine.high %v1306_v59, %v1310_v61  ;;  %v1366_v56 = vld [vmem:[#allocation15 + $0x638] sm:$0xff] }
 0x48f   :  { %2969 = vmatpush1.bf16.msra.mxu0 %v4608_v4  ;;  %v1314_v4 = vld [vmem:[#allocation15 + $0x498] sm:$0xff] }
 0x490   :  { %3010 = vmatpush1.bf16.msra.mxu1 %v4482_v12  ;;  %2970 = vmatprep.subr.bf16.mxu0 %v4617_v13  ;;  %v1318_v12 = vld [vmem:[#allocation15 + $0x4b8] sm:$0xff] }
 0x491   :  { %3011 = vmatprep.subr.bf16.mxu1 %v4491_v14  ;;  %v5006_v13 = vld [vmem:[#allocation16 + $0x10] ss:$8 sps:$4 sm:$0xff]   ;;  %v4546_v14 = vcombine.low %v1306_v59, %v1310_v61  ;;  %v4555_v16 = vcombine.high %v1314_v4, %v1318_v12 }
 0x492   :  { %v1370_v47 = vld [vmem:[#allocation15 + $0x658] sm:$0xff] }
 0x493   :  { %2971 = vmatpush1.bf16.msra.mxu0 %v4616_v42  ;;  %v5009_v42 = vld [vmem:[#allocation16 + $0x20] ss:$8 sps:$4 sm:$0xff]   ;;  %v1374_v48 = vld [vmem:[#allocation15 + $0x678] sm:$0xff] }
 0x494   :  { %3012 = vmatpush1.bf16.msra.mxu1 %v4490_v18  ;;  %2972 = vmatprep.subr.bf16.mxu0 %v4625_v19  ;;  %v4554_v18 = vcombine.low %v1314_v4, %v1318_v12  ;;  %v5014_v19 = vld [vmem:[#allocation16 + $0x34] ss:$8 sps:$4 sm:$0xff]  }
 0x495   :  { %3013 = vmatprep.subr.bf16.mxu1 %v4499_v20  ;;  %v1330_v20 = vld [vmem:[#allocation15 + $0x518] sm:$0xff] }
 0x496   :  { %v4571_v63 = vcombine.high %v1330_v20, %v1334_v62  ;;  %v1378_v59 = vld [vmem:[#allocation15 + $0x698] sm:$0xff] }
 0x497   :  { %2973 = vmatpush1.bf16.msra.mxu0 %v4624_v23  ;;  %v1338_v23 = vld [vmem:[#allocation15 + $0x558] sm:$0xff] }
 0x498   :  { %3014 = vmatpush1.bf16.msra.mxu1 %v4498_v24  ;;  %2974 = vmatprep.subr.bf16.mxu0 %v4633_v43  ;;  %v1342_v24 = vld [vmem:[#allocation15 + $0x578] sm:$0xff]  ;;  %v5015_v43 = vld [vmem:[#allocation16 + $0x40] ss:$8 sps:$4 sm:$0xff]  }
 0x499   :  { %3015 = vmatprep.subr.bf16.mxu1 %v4507_v25  ;;  %v4570_v25 = vcombine.low %v1330_v20, %v1334_v62  ;;  %v4579_v27 = vcombine.high %v1338_v23, %v1342_v24  ;;  %v1382_v61 = vld [vmem:[#allocation15 + $0x6b8] sm:$0xff] }
 0x49a   :  { %v1386_v4 = vld [vmem:[#allocation15 + $0x6d8] sm:$0xff] }
 0x49b   :  { %2975 = vmatpush1.bf16.msra.mxu0 %v4632_v29  ;;  %v5018_v29 = vld [vmem:[#allocation16 + $0x50] ss:$8 sps:$4 sm:$0xff]  }
 0x49c   :  { %3016 = vmatpush1.bf16.msra.mxu1 %v4506_v58  ;;  %2976 = vmatprep.subr.bf16.mxu0 %v4641_v30  ;;  %v4578_v58 = vcombine.low %v1338_v23, %v1342_v24  ;;  %v5023_v30 = vld [vmem:[#allocation16 + $0x64] ss:$8 sps:$4 sm:$0xff]   ;;  %v1390_v12 = vld [vmem:[#allocation15 + $0x6f8] sm:$0xff] }
 0x49d   :  { %3017 = vmatprep.subr.bf16.mxu1 %v4515_v31  ;;  %v1402_v20 = vld [vmem:[#allocation15 + $0x758] sm:$0xff] }
 0x49e   :  { %v1406_v62 = vld [vmem:[#allocation15 + $0x778] sm:$0xff] }
 0x49f   :  { %2977 = vmatpush1.bf16.msra.mxu0 %v4640_v36  ;;  %v1410_v23 = vld [vmem:[#allocation15 + $0x798] sm:$0xff] }
 0x4a0   :  { %3018 = vmatpush1.bf16.msra.mxu1 %v4514_v37  ;;  %2978 = vmatprep.subr.bf16.mxu0 %v4649_v38  ;;  %v5021_v37 = vld [vmem:[#allocation16 + $0x60] ss:$8 sps:$4 sm:$0xff]   ;;  %v1414_v24 = vld [vmem:[#allocation15 + $0x7b8] sm:$0xff] }
 0x4a1   :  { %3019 = vmatprep.subr.bf16.mxu1 %v4523_v39  ;;  %v4586_v39 = vcombine.low %v1346_v50, %v1350_v53  ;;  %v1418_v50 = vld [vmem:[#allocation15 + $0x7d8] sm:$0xff] }
 0x4a2   :  { %v1422_v53 = vld [vmem:[#allocation15 + $0x7f8] sm:$0xff] }
 0x4a3   :  { %2979 = vmatpush1.bf16.msra.mxu0 %v4648_v57  ;;  %v5024_v57 = vld [vmem:[#allocation16 + $0x70] ss:$8 sps:$4 sm:$0xff]  }
 0x4a4   :  { %3020 = vmatpush1.bf16.msra.mxu1 %v4522_v60  ;;  %2980 = vmatprep.subr.bf16.mxu0 %v4657_v45  ;;  %v4594_v60 = vcombine.low %v1354_v34, %v1358_v35  ;;  %v5029_v45 = vld [vmem:[#allocation16 + $0x84] ss:$8 sps:$4 sm:$0xff]   ;;  %v5048_v34 = vld [vmem:[#allocation16 + $0xf0] ss:$8 sps:$4 sm:$0xff]   ;;  %v4658_v35 = vcombine.low %v1418_v50, %v1422_v53 }
 0x4a5   :  { %3021 = vmatprep.subr.bf16.mxu1 %v4531_v46  ;;  %v4603_v46 = vcombine.high %v1362_v44, %v1366_v56 }
 0x4a7   :  { %2981 = vmatpush1.bf16.msra.mxu0 %v4656_v49  ;;  %v5027_v49 = vld [vmem:[#allocation16 + $0x80] ss:$8 sps:$4 sm:$0xff]  }
 0x4a8   :  { %3022 = vmatpush1.bf16.msra.mxu1 %v4530_v52  ;;  %4137 = vmatprep.subr.bf16.mxu0 %v5005_v54  ;;  %v4602_v52 = vcombine.low %v1362_v44, %v1366_v56  ;;  %v5032_v54 = vld [vmem:[#allocation16 + $0x94] ss:$8 sps:$4 sm:$0xff]  }
 0x4a9   :  { %3032 = vmatprep.subr.bf16.mxu1 %v4539_v55  ;;  %v4611_v55 = vcombine.high %v1370_v47, %v1374_v48 }
 0x4aa   :  { %2983 = vmatmul.mubr.bf16.vlgmr.msra.gmra.mrb[8].mxu0 %v5846_v28 }
 0x4ab   :  { %3024 = vmatmul.mubr.bf16.vlgmr.msra.gmra.mrb[20].mxu1 %v5814_v11  ;;  %4138 = vmatpush1.bf16.msra.mxu0 %v5003_v0  ;;  %v4563_v11 = vcombine.high %v1322_v6, %v1326_v17  ;;  %v5030_v0 = vld [vmem:[#allocation16 + $0x90] ss:$8 sps:$4 sm:$0xff]  }
 0x4ac   :  { %3033 = vmatpush1.bf16.msra.mxu1 %v4538_v1  ;;  %3064 = vmatprep.mubr.bf16.mxu1 %v5844_v51  ;;  %v4562_v51 = vcombine.low %v1322_v6, %v1326_v17  ;;  %v4610_v1 = vcombine.low %v1370_v47, %v1374_v48  ;;  %v1394_v6 = vld [vmem:[#allocation15 + $0x718] sm:$0xff] }
 0x4ad   :  { %3034 = vmatprep.subr.bf16.mxu1 %v4547_v2  ;;  %4139 = vmatprep.subr.bf16.mxu0 %v5008_v3  ;;  %v5035_v2 = vld [vmem:[#allocation16 + $0xa4] ss:$8 sps:$4 sm:$0xff]   ;;  %v4619_v3 = vcombine.high %v1378_v59, %v1382_v61  ;;  %v1398_v17 = vld [vmem:[#allocation15 + $0x738] sm:$0xff] }
 0x4af   :  { %4140 = vmatpush1.bf16.msra.mxu0 %v5006_v13  ;;  %v5033_v13 = vld [vmem:[#allocation16 + $0xa0] ss:$8 sps:$4 sm:$0xff]  }
 0x4b0   :  { %3035 = vmatpush1.bf16.msra.mxu1 %v4546_v14  ;;  %4141 = vmatprep.subr.bf16.mxu0 %v5011_v15  ;;  %v4618_v14 = vcombine.low %v1378_v59, %v1382_v61  ;;  %v5038_v15 = vld [vmem:[#allocation16 + $0xb4] ss:$8 sps:$4 sm:$0xff]  }
 0x4b1   :  { %3036 = vmatprep.subr.bf16.mxu1 %v4555_v16  ;;  %v4627_v16 = vcombine.high %v1386_v4, %v1390_v12 }
 0x4b3   :  { %4142 = vmatpush1.bf16.msra.mxu0 %v5009_v42  ;;  %v5036_v42 = vld [vmem:[#allocation16 + $0xb0] ss:$8 sps:$4 sm:$0xff]  }
 0x4b4   :  { %3037 = vmatpush1.bf16.msra.mxu1 %v4554_v18  ;;  %4143 = vmatprep.subr.bf16.mxu0 %v5014_v19  ;;  %v4626_v18 = vcombine.low %v1386_v4, %v1390_v12  ;;  %v5041_v19 = vld [vmem:[#allocation16 + $0xc4] ss:$8 sps:$4 sm:$0xff]  }
 0x4b5   :  { %3038 = vmatprep.subr.bf16.mxu1 %v4563_v11  ;;  %v4635_v11 = vcombine.high %v1394_v6, %v1398_v17 }
 0x4b7   :  { %4144 = vmatpush1.bf16.msra.mxu0 %v5012_v21  ;;  %v5039_v21 = vld [vmem:[#allocation16 + $0xc0] ss:$8 sps:$4 sm:$0xff]  }
 0x4b8   :  { %3039 = vmatpush1.bf16.msra.mxu1 %v4562_v51  ;;  %4145 = vmatprep.subr.bf16.mxu0 %v5017_v22  ;;  %v4634_v51 = vcombine.low %v1394_v6, %v1398_v17  ;;  %v5044_v22 = vld [vmem:[#allocation16 + $0xd4] ss:$8 sps:$4 sm:$0xff]  }
 0x4b9   :  { %3040 = vmatprep.subr.bf16.mxu1 %v4571_v63  ;;  %v4643_v63 = vcombine.high %v1402_v20, %v1406_v62 }
 0x4bb   :  { %4146 = vmatpush1.bf16.msra.mxu0 %v5015_v43  ;;  %v5042_v43 = vld [vmem:[#allocation16 + $0xd0] ss:$8 sps:$4 sm:$0xff]  }
 0x4bc   :  { %3041 = vmatpush1.bf16.msra.mxu1 %v4570_v25  ;;  %4147 = vmatprep.subr.bf16.mxu0 %v5020_v26  ;;  %v4642_v25 = vcombine.low %v1402_v20, %v1406_v62  ;;  %v5047_v26 = vld [vmem:[#allocation16 + $0xe4] ss:$8 sps:$4 sm:$0xff]  }
 0x4bd   :  { %v5863_v31 = vpop.f32.mrb[12].mxu1  ;;  %3042 = vmatprep.subr.bf16.mxu1 %v4579_v27  ;;  %v4651_v27 = vcombine.high %v1410_v23, %v1414_v24 }
 0x4be   :  { %v5865_v33 = vpop.f32.mrb[13].mxu1 }
 0x4bf   :  { %v2783_v36 = vpop.f32.mrb[14].mxu1  ;;  %4148 = vmatpush1.bf16.msra.mxu0 %v5018_v29  ;;  %v5045_v29 = vld [vmem:[#allocation16 + $0xe0] ss:$8 sps:$4 sm:$0xff]  }
 0x4c0   :  { %3043 = vmatpush1.bf16.msra.mxu1 %v4578_v58  ;;  %v2784_v38 = vpop.f32.mrb[15].mxu1  ;;  %4149 = vmatprep.subr.bf16.mxu0 %v5023_v30  ;;  %v4650_v58 = vcombine.low %v1410_v23, %v1414_v24  ;;  %v5050_v30 = vld [vmem:[#allocation16 + $0xf4] ss:$8 sps:$4 sm:$0xff]   ;;  %v5053_v36 = vld [vmem:[#allocation16 + $0x104] ss:$8 sps:$4 sm:$0xff]  }
 0x4c1   :  { %3044 = vmatprep.subr.bf16.mxu1 %v4587_v32  ;;  %v4659_v32 = vcombine.high %v1418_v50, %v1422_v53  ;;  %v5882_v24 = vld [vmem:[%s5966_s13] sm:$0xff] }
 0x4c3   :  { %4150 = vmatpush1.bf16.msra.mxu0 %v5021_v37  ;;  %v5871_v37 = vld [vmem:[%s5965_s12] sm:$0xff] }
 0x4c4   :  { %3045 = vmatpush1.bf16.msra.mxu1 %v4586_v39  ;;  %4151 = vmatprep.subr.bf16.mxu0 %v5026_v40  ;;  %v1428_v38 = vrot.slane %v5871_v37, %v5751_v8  ;;  %v1432_v39 = vrot.slane %v5871_v37, %v5754_v10 }
 0x4c5   :  { %3046 = vmatprep.subr.bf16.mxu1 %v4595_v41 }
 0x4c6   :  { %v2780_v40 = vadd.f32 %v5863_v31, %v1428_v38  ;;  %v2782_v41 = vadd.f32 %v5865_v33, %v1432_v39 }
 0x4c7   :  { %4152 = vmatpush1.bf16.msra.mxu0 %v5024_v57 }
 0x4c8   :  { %3047 = vmatpush1.bf16.msra.mxu1 %v4594_v60  ;;  %4153 = vmatprep.subr.bf16.mxu0 %v5029_v45 }
 0x4c9   :  { %3048 = vmatprep.subr.bf16.mxu1 %v4603_v46 }
 0x4cb   :  { %4154 = vmatpush1.bf16.msra.mxu0 %v5027_v49 }
 0x4cc   :  { %3049 = vmatpush1.bf16.msra.mxu1 %v4602_v52  ;;  %4155 = vmatprep.subr.bf16.mxu0 %v5032_v54 }
 0x4cd   :  { %3050 = vmatprep.subr.bf16.mxu1 %v4611_v55 }
 0x4cf   :  { %4156 = vmatpush1.bf16.msra.mxu0 %v5030_v0 }
 0x4d0   :  { %3051 = vmatpush1.bf16.msra.mxu1 %v4610_v1  ;;  %4157 = vmatprep.subr.bf16.mxu0 %v5035_v2 }
 0x4d1   :  { %3052 = vmatprep.subr.bf16.mxu1 %v4619_v3 }
 0x4d3   :  { %4158 = vmatpush1.bf16.msra.mxu0 %v5033_v13 }
 0x4d4   :  { %3053 = vmatpush1.bf16.msra.mxu1 %v4618_v14  ;;  %4159 = vmatprep.subr.bf16.mxu0 %v5038_v15 }
 0x4d5   :  { %3054 = vmatprep.subr.bf16.mxu1 %v4627_v16 }
 0x4d7   :  { %4160 = vmatpush1.bf16.msra.mxu0 %v5036_v42 }
 0x4d8   :  { %3055 = vmatpush1.bf16.msra.mxu1 %v4626_v18  ;;  %4161 = vmatprep.subr.bf16.mxu0 %v5041_v19 }
 0x4d9   :  { %3056 = vmatprep.subr.bf16.mxu1 %v4635_v11 }
 0x4db   :  { %4162 = vmatpush1.bf16.msra.mxu0 %v5039_v21 }
 0x4dc   :  { %3057 = vmatpush1.bf16.msra.mxu1 %v4634_v51  ;;  %4163 = vmatprep.subr.bf16.mxu0 %v5044_v22 }
 0x4dd   :  { %3058 = vmatprep.subr.bf16.mxu1 %v4643_v63 }
 0x4df   :  { %4164 = vmatpush1.bf16.msra.mxu0 %v5042_v43  ;;  %v5887_v43 = vld [vmem:[%s5967_s14] sm:$0xff] }
 0x4e0   :  { %3059 = vmatpush1.bf16.msra.mxu1 %v4642_v25  ;;  %4165 = vmatprep.subr.bf16.mxu0 %v5047_v26  ;;  %v3230_v25 = vrot.slane %v5882_v24, %v5751_v8 }
 0x4e1   :  { %3060 = vmatprep.subr.bf16.mxu1 %v4651_v27  ;;  %v3234_v27 = vrot.slane %v5882_v24, %v5754_v10 }
 0x4e3   :  { %4166 = vmatpush1.bf16.msra.mxu0 %v5045_v29  ;;  %v3280_v29 = vrot.slane %v5887_v43, %v5751_v8 }
 0x4e4   :  { %3061 = vmatpush1.bf16.msra.mxu1 %v4650_v58  ;;  %4167 = vmatprep.subr.bf16.mxu0 %v5050_v30  ;;  %v3284_v30 = vrot.slane %v5887_v43, %v5754_v10 }
 0x4e5   :  { %3062 = vmatprep.subr.bf16.mxu1 %v4659_v32 }
 0x4e7   :  { %4168 = vmatpush1.bf16.msra.mxu0 %v5048_v34 }
 0x4e8   :  { %3063 = vmatpush1.bf16.msra.mxu1 %v4658_v35  ;;  %4178 = vmatprep.subr.bf16.mxu0 %v5053_v36 }
 0x4eb   :  { %3065 = vmatmul.mubr.bf16.vlgmr.msra.gmra.mrb[20].mxu1 %v5846_v28 }
 0x4fd   :  { %v2820_v44 = vpop.f32.mrb[4].mxu0 }
 0x4fe   :  { %v2821_v56 = vadd.f32 %v2820_v44, %v2780_v40  ;;  %v2822_v57 = vpop.f32.mrb[5].mxu0 }
 0x4ff   :  { %v2823_v60 = vadd.f32 %v2822_v57, %v2782_v41  ;;  %v2824_v28 = vpop.f32.mrb[6].mxu0 }
 0x500   :  { %v3073_v45 = vrot.slane %v2821_v56, 4  ;;  %v2825_v46 = vpop.f32.mrb[7].mxu0  ;;  %v1436_v28 = vrot.slane %v5871_v37, %v5807_v5 }
 0x501   :  { %v3079_v47 = vrot.slane %v2823_v60, 4  ;;  %v1440_v46 = vrot.slane %v5871_v37, %v5812_v9 }
 0x502   :  { %v3074_v48 = vadd.f32 %v3073_v45, %v2821_v56  ;;  %v5054_v45 = vld [vmem:[#allocation16 + $0x110] ss:$8 sps:$4 sm:$0xff]  }
 0x503   :  { %v3080_v49 = vadd.f32 %v3079_v47, %v2823_v60  ;;  %v5059_v47 = vld [vmem:[#allocation16 + $0x124] ss:$8 sps:$4 sm:$0xff]  }
 0x504   :  { %v3075_v52 = vrot.slane %v3074_v48, 2 }
 0x505   :  { %v3081_v54 = vrot.slane %v3080_v49, 2 }
 0x506   :  { %v3076_v55 = vadd.f32 %v3075_v52, %v3074_v48 }
 0x507   :  { %v3082_v59 = vadd.f32 %v3081_v54, %v3080_v49 }
 0x508   :  { %v3077_v61 = vrot.slane %v3076_v55, 1 }
 0x509   :  { %v3083_v0 = vrot.slane %v3082_v59, 1 }
 0x50a   :  { %v3078_v1 = vadd.f32 %v3077_v61, %v3076_v55 }
 0x50b   :  { %v3084_v31 = vadd.f32 %v3083_v0, %v3082_v59  ;;  %v5057_v59 = vld [vmem:[#allocation16 + $0x120] ss:$8 sps:$4 sm:$0xff]  }
 0x50c   :  { %v3121_v2 = vmul.f32 0.125, %v3078_v1  ;;  %v5062_v1 = vld [vmem:[#allocation16 + $0x134] ss:$8 sps:$4 sm:$0xff]  }
 0x50d   :  { %v3122_v33 = vmul.f32 0.125, %v3084_v31 }
 0x50e   :  { %v3129_v3 = vsub.f32 %v2821_v56, %v3121_v2  ;;  %v5051_v56 = vld [vmem:[#allocation16 + $0x100] ss:$8 sps:$4 sm:$0xff]  }
 0x50f   :  { %v3130_v4 = vsub.f32 %v2823_v60, %v3122_v33  ;;  %v5056_v60 = vld [vmem:[#allocation16 + $0x114] ss:$8 sps:$4 sm:$0xff]  }
 0x510   :  { %v3137_v12 = vmul.f32 %v3129_v3, %v3129_v3 }
 0x511   :  { %v3138_v13 = vmul.f32 %v3130_v4, %v3130_v4 }
 0x512   :  { %v3145_v14 = vrot.slane %v3137_v12, 4 }
 0x513   :  { %v3151_v15 = vrot.slane %v3138_v13, 4 }
 0x514   :  { %v3146_v16 = vadd.f32 %v3145_v14, %v3137_v12  ;;  %v5065_v12 = vld [vmem:[#allocation16 + $0x144] ss:$8 sps:$4 sm:$0xff]  }
 0x515   :  { %v3152_v6 = vadd.f32 %v3151_v15, %v3138_v13 }
 0x516   :  { %v3147_v17 = vrot.slane %v3146_v16, 2 }
 0x517   :  { %v3153_v42 = vrot.slane %v3152_v6, 2 }
 0x518   :  { %v3148_v18 = vadd.f32 %v3147_v17, %v3146_v16  ;;  %v5063_v16 = vld [vmem:[#allocation16 + $0x140] ss:$8 sps:$4 sm:$0xff]   ;;  %v5068_v17 = vld [vmem:[#allocation16 + $0x154] ss:$8 sps:$4 sm:$0xff]  }
 0x519   :  { %v3154_v19 = vadd.f32 %v3153_v42, %v3152_v6 }
 0x51a   :  { %v3149_v11 = vrot.slane %v3148_v18, 1 }
 0x51b   :  { %v3155_v20 = vrot.slane %v3154_v19, 1 }
 0x51c   :  { %v3150_v62 = vadd.f32 %v3149_v11, %v3148_v18  ;;  %v5066_v11 = vld [vmem:[#allocation16 + $0x150] ss:$8 sps:$4 sm:$0xff]  }
 0x51d   :  { %v3156_v21 = vadd.f32 %v3155_v20, %v3154_v19 }
 0x51e   :  { %v3193_v51 = vmul.f32 0.125, %v3150_v62  ;;  %v5071_v62 = vld [vmem:[#allocation16 + $0x164] ss:$8 sps:$4 sm:$0xff]  }
 0x51f   :  { %v3194_v22 = vmul.f32 0.125, %v3156_v21 }
 0x520   :  { %v3201_v63 = vadd.f32 0.8, %v3193_v51 }
 0x521   :  { %v3202_v23 = vadd.f32 0.8, %v3194_v22 }
 0x522   :  { %5207 = vrsqrt.f32 %v3201_v63  ;;  %v5069_v63 = vld [vmem:[#allocation16 + $0x160] ss:$8 sps:$4 sm:$0xff]  }
 0x523   :  { %5209 = vrsqrt.f32 %v3202_v23 }
 0x52c   :  { %v5208_v26 = vpop.eup %5207 }
 0x52d   :  { %v5210_v50 = vpop.eup %5209  ;;  %v3217_v53 = vmul.f32 %v5208_v26, %v3129_v3  ;;  %v5060_v3 = vld [vmem:[#allocation16 + $0x130] ss:$8 sps:$4 sm:$0xff]  }
 0x52e   :  { %v3218_v58 = vmul.f32 %v5210_v50, %v3130_v4 }
 0x52f   :  { %v3267_v32 = vmul.f32 %v3230_v25, %v3217_v53  ;;  %v5074_v25 = vld [vmem:[#allocation16 + $0x174] ss:$8 sps:$4 sm:$0xff]   ;;  %v5072_v53 = vld [vmem:[#allocation16 + $0x170] ss:$8 sps:$4 sm:$0xff]  }
 0x530   :  { %v3268_v34 = vmul.f32 %v3234_v27, %v3218_v58  ;;  %v5077_v58 = vld [vmem:[#allocation16 + $0x184] ss:$8 sps:$4 sm:$0xff]  }
 0x531   :  { %v3317_v35 = vadd.f32 %v3280_v29, %v3267_v32 }
 0x532   :  { %v3318_v36 = vadd.f32 %v3284_v30, %v3268_v34 }
 0x533   :  { %vm3325_vm8 = vcmp.gt.f32.partialorder %v3317_v35, 0.0  ;;  %v3333_v38 = vmul.f32 0.2, %v3317_v35 }
 0x534   :  { %vm3326_vm9 = vcmp.gt.f32.partialorder %v3318_v36, 0.0  ;;  %v3334_v39 = vmul.f32 0.2, %v3318_v36 }
 0x535   :  { %v3341_v40 = vsel %vm3325_vm8, %v3317_v35, %v3333_v38  ;;  %v5075_v35 = vld [vmem:[#allocation16 + $0x180] ss:$8 sps:$4 sm:$0xff]   ;;  %v5080_v38 = vld [vmem:[#allocation16 + $0x194] ss:$8 sps:$4 sm:$0xff]  }
 0x536   :  { %v3342_v41 = vsel %vm3326_vm9, %v3318_v36, %v3334_v39  ;;  %v3349_v57 = vpack.c.bf16 %v3341_v40, %v3341_v40 }
 0x537   :  { %v3350_v44 = vpack.c.bf16 %v3342_v41, %v3342_v41 }
 0x539   :  { %4169 = vmatprep.mubr.bf16.mxu0 %v3350_v44  ;;  %v5078_v44 = vld [vmem:[#allocation16 + $0x190] ss:$8 sps:$4 sm:$0xff]  }
 0x53a   :  { %4170 = vmatmul.mubr.bf16.vlgmr.msra.gmra.mrb[12].mxu0 %v3349_v57  ;;  %v5083_v57 = vld [vmem:[#allocation16 + $0x1a4] ss:$8 sps:$4 sm:$0xff]  }
 0x53b   :  { %4179 = vmatpush1.bf16.msra.mxu0 %v5051_v56 }
 0x53c   :  { %4180 = vmatprep.subr.bf16.mxu0 %v5056_v60 }
 0x53d   :  { %v2902_v48 = vpop.f32.mrb[16].mxu1 }
 0x53e   :  { %v4821_v49 = vadd.f32 %v2902_v48, %v1436_v28  ;;  %v2904_v52 = vpop.f32.mrb[17].mxu1  ;;  %v5086_v48 = vld [vmem:[#allocation16 + $0x1b4] ss:$8 sps:$4 sm:$0xff]  }
 0x53f   :  { %v4822_v54 = vadd.f32 %v2904_v52, %v1440_v46  ;;  %4181 = vmatpush1.bf16.msra.mxu0 %v5054_v45  ;;  %v2906_v55 = vpop.f32.mrb[18].mxu1  ;;  %v5081_v46 = vld [vmem:[#allocation16 + $0x1a0] ss:$8 sps:$4 sm:$0xff]   ;;  %v5084_v52 = vld [vmem:[#allocation16 + $0x1b0] ss:$8 sps:$4 sm:$0xff]  }
 0x540   :  { %v3085_v61 = vrot.slane %v4821_v49, 4  ;;  %v2907_v0 = vpop.f32.mrb[19].mxu1  ;;  %4182 = vmatprep.subr.bf16.mxu0 %v5059_v47  ;;  %v5087_v55 = vld [vmem:[#allocation16 + $0x1c0] ss:$8 sps:$4 sm:$0xff]  }
 0x541   :  { %v3091_v31 = vrot.slane %v4822_v54, 4  ;;  %v5090_v0 = vld [vmem:[#allocation16 + $0x1d0] ss:$8 sps:$4 sm:$0xff]  }
 0x542   :  { %v3086_v2 = vadd.f32 %v4821_v49, %v3085_v61  ;;  %v3238_v61 = vrot.slane %v5882_v24, %v5807_v5 }
 0x543   :  { %v3092_v33 = vadd.f32 %v4822_v54, %v3091_v31  ;;  %4183 = vmatpush1.bf16.msra.mxu0 %v5057_v59  ;;  %v5092_v59 = vld [vmem:[#allocation16 + $0x1d4] ss:$8 sps:$4 sm:$0xff]   ;;  %v3242_v31 = vrot.slane %v5882_v24, %v5812_v9 }
 0x544   :  { %v3087_v4 = vrot.slane %v3086_v2, 2  ;;  %4184 = vmatprep.subr.bf16.mxu0 %v5062_v1 }
 0x545   :  { %v3093_v13 = vrot.slane %v3092_v33, 2 }
 0x546   :  { %v3088_v14 = vadd.f32 %v3087_v4, %v3086_v2  ;;  %v5095_v2 = vld [vmem:[#allocation16 + $0x1e4] ss:$8 sps:$4 sm:$0xff]   ;;  %v3288_v4 = vrot.slane %v5887_v43, %v5807_v5 }
 0x547   :  { %v3094_v15 = vadd.f32 %v3093_v13, %v3092_v33  ;;  %4185 = vmatpush1.bf16.msra.mxu0 %v5060_v3  ;;  %v3292_v13 = vrot.slane %v5887_v43, %v5812_v9  ;;  %v5101_v5 = vld [vmem:[#allocation16 + $0x204] ss:$8 sps:$4 sm:$0xff]   ;;  %v5910_v9 = vsub.s32 4, %v5748_v7 }
 0x548   :  { %v3089_v6 = vrot.slane %v3088_v14, 1  ;;  %4186 = vmatprep.subr.bf16.mxu0 %v5065_v12 }
 0x549   :  { %v3095_v42 = vrot.slane %v3094_v15, 1 }
 0x54a   :  { %v3090_v18 = vadd.f32 %v3089_v6, %v3088_v14  ;;  %v5098_v6 = vld [vmem:[#allocation16 + $0x1f4] ss:$8 sps:$4 sm:$0xff]  }
 0x54b   :  { %v3096_v19 = vadd.f32 %v3095_v42, %v3094_v15  ;;  %4187 = vmatpush1.bf16.msra.mxu0 %v5063_v16  ;;  %v5093_v15 = vld [vmem:[#allocation16 + $0x1e0] ss:$8 sps:$4 sm:$0xff]  }
 0x54c   :  { %v3123_v20 = vmul.f32 0.125, %v3090_v18  ;;  %4188 = vmatprep.subr.bf16.mxu0 %v5068_v17  ;;  %v5096_v18 = vld [vmem:[#allocation16 + $0x1f0] ss:$8 sps:$4 sm:$0xff]  }
 0x54d   :  { %v3124_v21 = vmul.f32 0.125, %v3096_v19 }
 0x54e   :  { %v3131_v51 = vsub.f32 %v4821_v49, %v3123_v20 }
 0x54f   :  { %v3132_v22 = vsub.f32 %v4822_v54, %v3124_v21  ;;  %4189 = vmatpush1.bf16.msra.mxu0 %v5066_v11  ;;  %v5089_v54 = vld [vmem:[#allocation16 + $0x1c4] ss:$8 sps:$4 sm:$0xff]  }
 0x550   :  { %v3139_v23 = vmul.f32 %v3131_v51, %v3131_v51  ;;  %4190 = vmatprep.subr.bf16.mxu0 %v5071_v62 }
 0x551   :  { %v3140_v26 = vmul.f32 %v3132_v22, %v3132_v22 }
 0x552   :  { %v3157_v27 = vrot.slane %v3139_v23, 4 }
 0x553   :  { %v3163_v50 = vrot.slane %v3140_v26, 4  ;;  %4191 = vmatpush1.bf16.msra.mxu0 %v5069_v63 }
 0x554   :  { %v3158_v29 = vadd.f32 %v3157_v27, %v3139_v23  ;;  %4192 = vmatprep.subr.bf16.mxu0 %v5074_v25  ;;  %v5104_v23 = vld [vmem:[#allocation16 + $0x214] ss:$8 sps:$4 sm:$0xff]   ;;  %v1444_v25 = vrot.slane %v5871_v37, %v5910_v9  ;;  %v5102_v27 = vld [vmem:[#allocation16 + $0x210] ss:$8 sps:$4 sm:$0xff]  }
 0x555   :  { %v3164_v30 = vadd.f32 %v3163_v50, %v3140_v26  ;;  %v5107_v50 = vld [vmem:[#allocation16 + $0x224] ss:$8 sps:$4 sm:$0xff]  }
 0x556   :  { %v3159_v32 = vrot.slane %v3158_v29, 2 }
 0x557   :  { %v3165_v34 = vrot.slane %v3164_v30, 2  ;;  %4193 = vmatpush1.bf16.msra.mxu0 %v5072_v53 }
 0x558   :  { %v3160_v36 = vadd.f32 %v3159_v32, %v3158_v29  ;;  %4194 = vmatprep.subr.bf16.mxu0 %v5077_v58 }
 0x559   :  { %v3166_v39 = vadd.f32 %v3165_v34, %v3164_v30  ;;  %v5105_v34 = vld [vmem:[#allocation16 + $0x220] ss:$8 sps:$4 sm:$0xff]  }
 0x55a   :  { %v3161_v40 = vrot.slane %v3160_v36, 1 }
 0x55b   :  { %v3167_v41 = vrot.slane %v3166_v39, 1  ;;  %4195 = vmatpush1.bf16.msra.mxu0 %v5075_v35 }
 0x55c   :  { %v3162_v56 = vadd.f32 %v3161_v40, %v3160_v36  ;;  %4196 = vmatprep.subr.bf16.mxu0 %v5080_v38  ;;  %v5110_v38 = vld [vmem:[#allocation16 + $0x234] ss:$8 sps:$4 sm:$0xff]  }
 0x55d   :  { %v3168_v60 = vadd.f32 %v3167_v41, %v3166_v39 }
 0x55e   :  { %v3195_v28 = vmul.f32 0.125, %v3162_v56 }
 0x55f   :  { %v3196_v45 = vmul.f32 0.125, %v3168_v60  ;;  %4197 = vmatpush1.bf16.msra.mxu0 %v5078_v44  ;;  %v5108_v44 = vld [vmem:[#allocation16 + $0x230] ss:$8 sps:$4 sm:$0xff]  }
 0x560   :  { %v3203_v47 = vadd.f32 0.8, %v3195_v28  ;;  %4198 = vmatprep.subr.bf16.mxu0 %v5083_v57  ;;  %v5113_v57 = vld [vmem:[#allocation16 + $0x244] ss:$8 sps:$4 sm:$0xff]  }
 0x561   :  { %v3204_v49 = vadd.f32 0.8, %v3196_v45 }
 0x562   :  { %5211 = vrsqrt.f32 %v3203_v47 }
 0x563   :  { %5213 = vrsqrt.f32 %v3204_v49  ;;  %4199 = vmatpush1.bf16.msra.mxu0 %v5081_v46  ;;  %v5111_v46 = vld [vmem:[#allocation16 + $0x240] ss:$8 sps:$4 sm:$0xff]  }
 0x564   :  { %4200 = vmatprep.subr.bf16.mxu0 %v5086_v48  ;;  %v5116_v48 = vld [vmem:[#allocation16 + $0x254] ss:$8 sps:$4 sm:$0xff]  }
 0x567   :  { %4201 = vmatpush1.bf16.msra.mxu0 %v5084_v52 }
 0x568   :  { %4202 = vmatprep.subr.bf16.mxu0 %v5089_v54 }
 0x56b   :  { %4203 = vmatpush1.bf16.msra.mxu0 %v5087_v55  ;;  %v5114_v55 = vld [vmem:[#allocation16 + $0x250] ss:$8 sps:$4 sm:$0xff]  }
 0x56c   :  { %v5212_v1 = vpop.eup %5211  ;;  %4204 = vmatprep.subr.bf16.mxu0 %v5092_v59 }
 0x56d   :  { %v5214_v33 = vpop.eup %5213  ;;  %v3219_v3 = vmul.f32 %v5212_v1, %v3131_v51  ;;  %v5099_v51 = vld [vmem:[#allocation16 + $0x200] ss:$8 sps:$4 sm:$0xff]  }
 0x56e   :  { %v3220_v12 = vmul.f32 %v5214_v33, %v3132_v22  ;;  %v5913_v22 = vsub.s32 5, %v5748_v7 }
 0x56f   :  { %v3269_v14 = vmul.f32 %v3238_v61, %v3219_v3  ;;  %4205 = vmatpush1.bf16.msra.mxu0 %v5090_v0  ;;  %v5119_v61 = vld [vmem:[#allocation16 + $0x264] ss:$8 sps:$4 sm:$0xff]   ;;  %v5122_v3 = vld [vmem:[#allocation16 + $0x274] ss:$8 sps:$4 sm:$0xff]  }
 0x570   :  { %v3270_v16 = vmul.f32 %v3242_v31, %v3220_v12  ;;  %4206 = vmatprep.subr.bf16.mxu0 %v5095_v2  ;;  %v1448_v26 = vrot.slane %v5871_v37, %v5913_v22  ;;  %v5117_v2 = vld [vmem:[#allocation16 + $0x260] ss:$8 sps:$4 sm:$0xff]  }
 0x571   :  { %v3319_v17 = vadd.f32 %v3288_v4, %v3269_v14  ;;  %v5120_v14 = vld [vmem:[#allocation16 + $0x270] ss:$8 sps:$4 sm:$0xff]  }
 0x572   :  { %v3320_v42 = vadd.f32 %v3292_v13, %v3270_v16  ;;  %v5125_v16 = vld [vmem:[#allocation16 + $0x284] ss:$8 sps:$4 sm:$0xff]  }
 0x573   :  { %4207 = vmatpush1.bf16.msra.mxu0 %v5093_v15  ;;  %vm3327_vm10 = vcmp.gt.f32.partialorder %v3319_v17, 0.0  ;;  %v3335_v19 = vmul.f32 0.2, %v3319_v17 }
 0x574   :  { %4208 = vmatprep.subr.bf16.mxu0 %v5098_v6  ;;  %vm3328_vm11 = vcmp.gt.f32.partialorder %v3320_v42, 0.0  ;;  %v3336_v11 = vmul.f32 0.2, %v3320_v42 }
 0x575   :  { %v3343_v20 = vsel %vm3327_vm10, %v3319_v17, %v3335_v19 }
 0x576   :  { %v3344_v62 = vsel %vm3328_vm11, %v3320_v42, %v3336_v11  ;;  %v3351_v63 = vpack.c.bf16 %v3343_v20, %v3343_v20  ;;  %v5128_v11 = vld [vmem:[#allocation16 + $0x294] ss:$8 sps:$4 sm:$0xff]  }
 0x577   :  { %4209 = vmatpush1.bf16.msra.mxu0 %v5096_v18  ;;  %v3352_v21 = vpack.c.bf16 %v3344_v62, %v3344_v62  ;;  %v5123_v18 = vld [vmem:[#allocation16 + $0x280] ss:$8 sps:$4 sm:$0xff]  }
 0x578   :  { %4219 = vmatprep.subr.bf16.mxu0 %v5101_v5 }
 0x579   :  { %4210 = vmatprep.mubr.bf16.mxu0 %v3352_v21  ;;  %v5126_v21 = vld [vmem:[#allocation16 + $0x290] ss:$8 sps:$4 sm:$0xff]  }
 0x57a   :  { %4211 = vmatmul.mubr.bf16.vlgmr.msra.gmra.mrb[12].mxu0 %v3351_v63  ;;  %v5131_v63 = vld [vmem:[#allocation16 + $0x2a4] ss:$8 sps:$4 sm:$0xff]  }
 0x57b   :  { %4220 = vmatpush1.bf16.msra.mxu0 %v5099_v51 }
 0x57c   :  { %4221 = vmatprep.subr.bf16.mxu0 %v5104_v23 }
 0x57d   :  { %v2984_v53 = vpop.f32.mrb[8].mxu0 }
 0x57e   :  { %v4823_v29 = vadd.f32 %v2984_v53, %v1444_v25  ;;  %v2986_v58 = vpop.f32.mrb[9].mxu0  ;;  %v5134_v53 = vld [vmem:[#allocation16 + $0x2b4] ss:$8 sps:$4 sm:$0xff]  }
 0x57f   :  { %v4824_v30 = vadd.f32 %v2986_v58, %v1448_v26  ;;  %v2988_v32 = vpop.f32.mrb[10].mxu0  ;;  %4222 = vmatpush1.bf16.msra.mxu0 %v5102_v27  ;;  %v5129_v27 = vld [vmem:[#allocation16 + $0x2a0] ss:$8 sps:$4 sm:$0xff]   ;;  %v5132_v58 = vld [vmem:[#allocation16 + $0x2b0] ss:$8 sps:$4 sm:$0xff]  }
 0x580   :  { %v3097_v35 = vrot.slane %v4823_v29, 4  ;;  %v2989_v36 = vpop.f32.mrb[11].mxu0  ;;  %4223 = vmatprep.subr.bf16.mxu0 %v5107_v50  ;;  %v5135_v32 = vld [vmem:[#allocation16 + $0x2c0] ss:$8 sps:$4 sm:$0xff]  }
 0x581   :  { %v3103_v39 = vrot.slane %v4824_v30, 4  ;;  %v5138_v36 = vld [vmem:[#allocation16 + $0x2d0] ss:$8 sps:$4 sm:$0xff]  }
 0x582   :  { %v3098_v40 = vadd.f32 %v4823_v29, %v3097_v35  ;;  %v3246_v35 = vrot.slane %v5882_v24, %v5910_v9 }
 0x583   :  { %v3104_v41 = vadd.f32 %v4824_v30, %v3103_v39  ;;  %4224 = vmatpush1.bf16.msra.mxu0 %v5105_v34  ;;  %v5140_v34 = vld [vmem:[#allocation16 + $0x2d4] ss:$8 sps:$4 sm:$0xff]   ;;  %v3250_v39 = vrot.slane %v5882_v24, %v5913_v22 }
 0x584   :  { %v3099_v56 = vrot.slane %v3098_v40, 2  ;;  %4225 = vmatprep.subr.bf16.mxu0 %v5110_v38 }
 0x585   :  { %v3105_v60 = vrot.slane %v3104_v41, 2 }
 0x586   :  { %v3100_v28 = vadd.f32 %v3099_v56, %v3098_v40  ;;  %v5143_v40 = vld [vmem:[#allocation16 + $0x2e4] ss:$8 sps:$4 sm:$0xff]   ;;  %v3296_v56 = vrot.slane %v5887_v43, %v5910_v9 }
 0x587   :  { %v3106_v45 = vadd.f32 %v3105_v60, %v3104_v41  ;;  %4226 = vmatpush1.bf16.msra.mxu0 %v5108_v44  ;;  %v3300_v60 = vrot.slane %v5887_v43, %v5913_v22  ;;  %v5149_v9 = vld [vmem:[#allocation16 + $0x304] ss:$8 sps:$4 sm:$0xff]  }
 0x588   :  { %v3101_v47 = vrot.slane %v3100_v28, 1  ;;  %4227 = vmatprep.subr.bf16.mxu0 %v5113_v57 }
 0x589   :  { %v3107_v49 = vrot.slane %v3106_v45, 1 }
 0x58a   :  { %v3102_v52 = vadd.f32 %v3101_v47, %v3100_v28  ;;  %v5146_v47 = vld [vmem:[#allocation16 + $0x2f4] ss:$8 sps:$4 sm:$0xff]  }
 0x58b   :  { %v3108_v54 = vadd.f32 %v3107_v49, %v3106_v45  ;;  %4228 = vmatpush1.bf16.msra.mxu0 %v5111_v46  ;;  %v5141_v45 = vld [vmem:[#allocation16 + $0x2e0] ss:$8 sps:$4 sm:$0xff]  }
 0x58c   :  { %v3125_v59 = vmul.f32 0.125, %v3102_v52  ;;  %4229 = vmatprep.subr.bf16.mxu0 %v5116_v48  ;;  %v5144_v52 = vld [vmem:[#allocation16 + $0x2f0] ss:$8 sps:$4 sm:$0xff]  }
 0x58d   :  { %v3126_v0 = vmul.f32 0.125, %v3108_v54 }
 0x58e   :  { %v3133_v1 = vsub.f32 %v4823_v29, %v3125_v59 }
 0x58f   :  { %v3134_v31 = vsub.f32 %v4824_v30, %v3126_v0  ;;  %4230 = vmatpush1.bf16.msra.mxu0 %v5114_v55  ;;  %v5137_v30 = vld [vmem:[#allocation16 + $0x2c4] ss:$8 sps:$4 sm:$0xff]   ;;  %v5147_v0 = vld [vmem:[#allocation16 + $0x300] ss:$8 sps:$4 sm:$0xff]  }
 0x590   :  { %v3141_v33 = vmul.f32 %v3133_v1, %v3133_v1  ;;  %4231 = vmatprep.subr.bf16.mxu0 %v5119_v61 }
 0x591   :  { %v3142_v4 = vmul.f32 %v3134_v31, %v3134_v31 }
 0x592   :  { %v3169_v12 = vrot.slane %v3141_v33, 4 }
 0x593   :  { %v3175_v13 = vrot.slane %v3142_v4, 4  ;;  %4232 = vmatpush1.bf16.msra.mxu0 %v5117_v2  ;;  %v5931_v2 = vsub.s32 7, %v5748_v7 }
 0x594   :  { %v3170_v15 = vadd.f32 %v3169_v12, %v3141_v33  ;;  %4233 = vmatprep.subr.bf16.mxu0 %v5122_v3  ;;  %v5152_v33 = vld [vmem:[#allocation16 + $0x314] ss:$8 sps:$4 sm:$0xff]  }
 0x595   :  { %v3176_v6 = vadd.f32 %v3175_v13, %v3142_v4  ;;  %v5150_v4 = vld [vmem:[#allocation16 + $0x310] ss:$8 sps:$4 sm:$0xff]   ;;  %v1456_v12 = vrot.slane %v5871_v37, %v5931_v2  ;;  %v5155_v13 = vld [vmem:[#allocation16 + $0x324] ss:$8 sps:$4 sm:$0xff]  }
 0x596   :  { %v3171_v17 = vrot.slane %v3170_v15, 2 }
 0x597   :  { %v3177_v42 = vrot.slane %v3176_v6, 2  ;;  %4234 = vmatpush1.bf16.msra.mxu0 %v5120_v14 }
 0x598   :  { %v3172_v19 = vadd.f32 %v3171_v17, %v3170_v15  ;;  %4235 = vmatprep.subr.bf16.mxu0 %v5125_v16 }
 0x599   :  { %v3178_v5 = vadd.f32 %v3177_v42, %v3176_v6  ;;  %v5153_v6 = vld [vmem:[#allocation16 + $0x320] ss:$8 sps:$4 sm:$0xff]   ;;  %v5158_v42 = vld [vmem:[#allocation16 + $0x334] ss:$8 sps:$4 sm:$0xff]  }
 0x59a   :  { %v3173_v20 = vrot.slane %v3172_v19, 1 }
 0x59b   :  { %v3179_v62 = vrot.slane %v3178_v5, 1  ;;  %4236 = vmatpush1.bf16.msra.mxu0 %v5123_v18 }
 0x59c   :  { %v3174_v51 = vadd.f32 %v3173_v20, %v3172_v19  ;;  %4237 = vmatprep.subr.bf16.mxu0 %v5128_v11  ;;  %v5156_v20 = vld [vmem:[#allocation16 + $0x330] ss:$8 sps:$4 sm:$0xff]  }
 0x59d   :  { %v3180_v23 = vadd.f32 %v3179_v62, %v3178_v5 }
 0x59e   :  { %v3197_v25 = vmul.f32 0.125, %v3174_v51 }
 0x59f   :  { %v3198_v26 = vmul.f32 0.125, %v3180_v23  ;;  %4238 = vmatpush1.bf16.msra.mxu0 %v5126_v21  ;;  %v5159_v23 = vld [vmem:[#allocation16 + $0x340] ss:$8 sps:$4 sm:$0xff]  }
 0x5a0   :  { %v3205_v50 = vadd.f32 0.8, %v3197_v25  ;;  %4239 = vmatprep.subr.bf16.mxu0 %v5131_v63 }
 0x5a1   :  { %v3206_v29 = vadd.f32 0.8, %v3198_v26  ;;  %v5164_v26 = vld [vmem:[#allocation16 + $0x354] ss:$8 sps:$4 sm:$0xff]  }
 0x5a2   :  { %5215 = vrsqrt.f32 %v3205_v50 }
 0x5a3   :  { %5217 = vrsqrt.f32 %v3206_v29  ;;  %4240 = vmatpush1.bf16.msra.mxu0 %v5129_v27  ;;  %v5162_v29 = vld [vmem:[#allocation16 + $0x350] ss:$8 sps:$4 sm:$0xff]  }
 0x5a4   :  { %4241 = vmatprep.subr.bf16.mxu0 %v5134_v53 }
 0x5a7   :  { %4242 = vmatpush1.bf16.msra.mxu0 %v5132_v58 }
 0x5a8   :  { %4243 = vmatprep.subr.bf16.mxu0 %v5137_v30  ;;  %v5167_v30 = vld [vmem:[#allocation16 + $0x364] ss:$8 sps:$4 sm:$0xff]  }
 0x5ab   :  { %4244 = vmatpush1.bf16.msra.mxu0 %v5135_v32 }
 0x5ac   :  { %v5216_v38 = vpop.eup %5215  ;;  %4245 = vmatprep.subr.bf16.mxu0 %v5140_v34 }
 0x5ad   :  { %v5218_v41 = vpop.eup %5217  ;;  %v3221_v44 = vmul.f32 %v5216_v38, %v3133_v1  ;;  %v5928_v1 = vsub.s32 6, %v5748_v7 }
 0x5ae   :  { %v3222_v57 = vmul.f32 %v5218_v41, %v3134_v31 }
 0x5af   :  { %v3271_v28 = vmul.f32 %v3246_v35, %v3221_v44  ;;  %4246 = vmatpush1.bf16.msra.mxu0 %v5138_v36  ;;  %v1452_v3 = vrot.slane %v5871_v37, %v5928_v1  ;;  %v5161_v37 = vld [vmem:[#allocation16 + $0x344] ss:$8 sps:$4 sm:$0xff]   ;;  %v5165_v36 = vld [vmem:[#allocation16 + $0x360] ss:$8 sps:$4 sm:$0xff]  }
 0x5b0   :  { %v3272_v46 = vmul.f32 %v3250_v39, %v3222_v57  ;;  %4247 = vmatprep.subr.bf16.mxu0 %v5143_v40  ;;  %v5170_v39 = vld [vmem:[#allocation16 + $0x374] ss:$8 sps:$4 sm:$0xff]  }
 0x5b1   :  { %v3321_v48 = vadd.f32 %v3296_v56, %v3271_v28  ;;  %v5168_v56 = vld [vmem:[#allocation16 + $0x370] ss:$8 sps:$4 sm:$0xff]  }
 0x5b2   :  { %v3322_v49 = vadd.f32 %v3300_v60, %v3272_v46  ;;  %v5173_v60 = vld [vmem:[#allocation16 + $0x384] ss:$8 sps:$4 sm:$0xff]  }
 0x5b3   :  { %4248 = vmatpush1.bf16.msra.mxu0 %v5141_v45  ;;  %vm3329_vm12 = vcmp.gt.f32.partialorder %v3321_v48, 0.0  ;;  %v3337_v54 = vmul.f32 0.2, %v3321_v48 }
 0x5b4   :  { %4249 = vmatprep.subr.bf16.mxu0 %v5146_v47  ;;  %vm3330_vm13 = vcmp.gt.f32.partialorder %v3322_v49, 0.0  ;;  %v3338_v55 = vmul.f32 0.2, %v3322_v49  ;;  %v5171_v47 = vld [vmem:[#allocation16 + $0x380] ss:$8 sps:$4 sm:$0xff]  }
 0x5b5   :  { %v3345_v59 = vsel %vm3329_vm12, %v3321_v48, %v3337_v54 }
 0x5b6   :  { %v3346_v61 = vsel %vm3330_vm13, %v3322_v49, %v3338_v55  ;;  %v3353_v31 = vpack.c.bf16 %v3345_v59, %v3345_v59  ;;  %v5176_v49 = vld [vmem:[#allocation16 + $0x394] ss:$8 sps:$4 sm:$0xff]  }
 0x5b7   :  { %4250 = vmatpush1.bf16.msra.mxu0 %v5144_v52  ;;  %v3354_v22 = vpack.c.bf16 %v3346_v61, %v3346_v61  ;;  %v5179_v61 = vld [vmem:[#allocation16 + $0x3a4] ss:$8 sps:$4 sm:$0xff]  }
 0x5b8   :  { %4260 = vmatprep.subr.bf16.mxu0 %v5149_v9  ;;  %v5174_v9 = vld [vmem:[#allocation16 + $0x390] ss:$8 sps:$4 sm:$0xff]  }
 0x5b9   :  { %4251 = vmatprep.mubr.bf16.mxu0 %v3354_v22 }
 0x5ba   :  { %4252 = vmatmul.mubr.bf16.vlgmr.msra.gmra.mrb[12].mxu0 %v3353_v31 }
 0x5bb   :  { %4261 = vmatpush1.bf16.msra.mxu0 %v5147_v0 }
 0x5bc   :  { %4262 = vmatprep.subr.bf16.mxu0 %v5152_v33  ;;  %v5177_v33 = vld [vmem:[#allocation16 + $0x3a0] ss:$8 sps:$4 sm:$0xff]  }
 0x5be   :  { %v3066_v14 = vpop.f32.mrb[20].mxu1 }
 0x5bf   :  { %v4825_v15 = vadd.f32 %v3066_v14, %v1452_v3  ;;  %v3068_v16 = vpop.f32.mrb[21].mxu1  ;;  %4263 = vmatpush1.bf16.msra.mxu0 %v5150_v4  ;;  %v5182_v4 = vld [vmem:[#allocation16 + $0x3b4] ss:$8 sps:$4 sm:$0xff]   ;;  %v5180_v14 = vld [vmem:[#allocation16 + $0x3b0] ss:$8 sps:$4 sm:$0xff]  }
 0x5c0   :  { %v4826_v7 = vadd.f32 %v3068_v16, %v1456_v12  ;;  %v3070_v17 = vpop.f32.mrb[22].mxu1  ;;  %4264 = vmatprep.subr.bf16.mxu0 %v5155_v13  ;;  %v5183_v16 = vld [vmem:[#allocation16 + $0x3c0] ss:$8 sps:$4 sm:$0xff]  }
 0x5c1   :  { %v3109_v18 = vrot.slane %v4825_v15, 4  ;;  %v3071_v19 = vpop.f32.mrb[23].mxu1  ;;  %v3254_v17 = vrot.slane %v5882_v24, %v5928_v1 }
 0x5c2   :  { %v3115_v11 = vrot.slane %v4826_v7, 4  ;;  %v3258_v19 = vrot.slane %v5882_v24, %v5931_v2 }
 0x5c3   :  { %v3110_v5 = vadd.f32 %v4825_v15, %v3109_v18  ;;  %4265 = vmatpush1.bf16.msra.mxu0 %v5153_v6  ;;  %v5188_v6 = vld [vmem:[#allocation16 + $0x3d4] ss:$8 sps:$4 sm:$0xff]  }
 0x5c4   :  { %v3116_v62 = vadd.f32 %v4826_v7, %v3115_v11  ;;  %4266 = vmatprep.subr.bf16.mxu0 %v5158_v42  ;;  %v5191_v42 = vld [vmem:[#allocation16 + $0x3e4] ss:$8 sps:$4 sm:$0xff]  }
 0x5c5   :  { %v3111_v21 = vrot.slane %v3110_v5, 2 }
 0x5c6   :  { %v3117_v51 = vrot.slane %v3116_v62, 2 }
 0x5c7   :  { %v3112_v63 = vadd.f32 %v3111_v21, %v3110_v5  ;;  %4267 = vmatpush1.bf16.msra.mxu0 %v5156_v20  ;;  %v3304_v20 = vrot.slane %v5887_v43, %v5928_v1  ;;  %v3308_v21 = vrot.slane %v5887_v43, %v5931_v2  ;;  %v3485_v43 = vld [vmem:[#allocation18] sm:$0x3] }
 0x5c8   :  { %v3118_v25 = vadd.f32 %v3117_v51, %v3116_v62  ;;  %4268 = vmatprep.subr.bf16.mxu0 %v5161_v37  ;;  %v5189_v37 = vld [vmem:[#allocation16 + $0x3e0] ss:$8 sps:$4 sm:$0xff]   ;;  %v3490_v2 = vrot.slane %v3485_v43, %v5751_v8 }
 0x5c9   :  { %v3113_v27 = vrot.slane %v3112_v63, 1 }
 0x5ca   :  { %v3119_v50 = vrot.slane %v3118_v25, 1 }
 0x5cb   :  { %v3114_v53 = vadd.f32 %v3113_v27, %v3112_v63  ;;  %4269 = vmatpush1.bf16.msra.mxu0 %v5159_v23  ;;  %v5194_v63 = vld [vmem:[#allocation16 + $0x3f4] ss:$8 sps:$4 sm:$0xff]  }
 0x5cc   :  { %v3120_v58 = vadd.f32 %v3119_v50, %v3118_v25  ;;  %4270 = vmatprep.subr.bf16.mxu0 %v5164_v26  ;;  %v5192_v26 = vld [vmem:[#allocation16 + $0x3f0] ss:$8 sps:$4 sm:$0xff]  }
 0x5cd   :  { %v3127_v32 = vmul.f32 0.125, %v3114_v53 }
 0x5ce   :  { %v3128_v34 = vmul.f32 0.125, %v3120_v58 }
 0x5cf   :  { %v3135_v35 = vsub.f32 %v4825_v15, %v3127_v32  ;;  %4271 = vmatpush1.bf16.msra.mxu0 %v5162_v29  ;;  %v5185_v15 = vld [vmem:[#allocation16 + $0x3c4] ss:$8 sps:$4 sm:$0xff]  }
 0x5d0   :  { %v3136_v38 = vsub.f32 %v4826_v7, %v3128_v34  ;;  %4272 = vmatprep.subr.bf16.mxu0 %v5167_v30  ;;  %v5186_v7 = vld [vmem:[#allocation16 + $0x3d0] ss:$8 sps:$4 sm:$0xff]   ;;  %v3494_v30 = vrot.slane %v3485_v43, %v5754_v10 }
 0x5d1   :  { %v3143_v40 = vmul.f32 %v3135_v35, %v3135_v35 }
 0x5d2   :  { %v3144_v41 = vmul.f32 %v3136_v38, %v3136_v38 }
 0x5d3   :  { %v3181_v44 = vrot.slane %v3143_v40, 4  ;;  %4273 = vmatpush1.bf16.msra.mxu0 %v5165_v36 }
 0x5d4   :  { %v3187_v57 = vrot.slane %v3144_v41, 4  ;;  %4274 = vmatprep.subr.bf16.mxu0 %v5170_v39 }
 0x5d5   :  { %v3182_v28 = vadd.f32 %v3181_v44, %v3143_v40 }
 0x5d6   :  { %v3188_v45 = vadd.f32 %v3187_v57, %v3144_v41 }
 0x5d7   :  { %v3183_v46 = vrot.slane %v3182_v28, 2  ;;  %4275 = vmatpush1.bf16.msra.mxu0 %v5168_v56 }
 0x5d8   :  { %v3189_v48 = vrot.slane %v3188_v45, 2  ;;  %4276 = vmatprep.subr.bf16.mxu0 %v5173_v60 }
 0x5d9   :  { %v3184_v52 = vadd.f32 %v3183_v46, %v3182_v28 }
 0x5da   :  { %v3190_v54 = vadd.f32 %v3189_v48, %v3188_v45 }
 0x5db   :  { %v3185_v55 = vrot.slane %v3184_v52, 1  ;;  %4277 = vmatpush1.bf16.msra.mxu0 %v5171_v47 }
 0x5dc   :  { %v3191_v59 = vrot.slane %v3190_v54, 1  ;;  %4278 = vmatprep.subr.bf16.mxu0 %v5176_v49 }
 0x5dd   :  { %v3186_v22 = vadd.f32 %v3185_v55, %v3184_v52 }
 0x5de   :  { %v3192_v0 = vadd.f32 %v3191_v59, %v3190_v54 }
 0x5df   :  { %v3199_v31 = vmul.f32 0.125, %v3186_v22  ;;  %4279 = vmatpush1.bf16.msra.mxu0 %v5174_v9 }
 0x5e0   :  { %v3200_v3 = vmul.f32 0.125, %v3192_v0  ;;  %4280 = vmatprep.subr.bf16.mxu0 %v5179_v61 }
 0x5e1   :  { %v3207_v12 = vadd.f32 0.8, %v3199_v31 }
 0x5e2   :  { %v3208_v13 = vadd.f32 0.8, %v3200_v3 }
 0x5e3   :  { %5219 = vrsqrt.f32 %v3207_v12  ;;  %4281 = vmatpush1.bf16.msra.mxu0 %v5177_v33 }
 0x5e4   :  { %5221 = vrsqrt.f32 %v3208_v13  ;;  %4282 = vmatprep.subr.bf16.mxu0 %v5182_v4 }
 0x5e7   :  { %4283 = vmatpush1.bf16.msra.mxu0 %v5180_v14 }
 0x5e8   :  { %4284 = vmatprep.subr.bf16.mxu0 %v5185_v15 }
 0x5eb   :  { %4285 = vmatpush1.bf16.msra.mxu0 %v5183_v16 }
 0x5ec   :  { %4286 = vmatprep.subr.bf16.mxu0 %v5188_v6 }
 0x5ed   :  { %v5220_v18 = vpop.eup %5219 }
 0x5ee   :  { %v5222_v11 = vpop.eup %5221  ;;  %v3223_v5 = vmul.f32 %v5220_v18, %v3135_v35 }
 0x5ef   :  { %v3224_v62 = vmul.f32 %v5222_v11, %v3136_v38  ;;  %4287 = vmatpush1.bf16.msra.mxu0 %v5186_v7 }
 0x5f0   :  { %v3273_v51 = vmul.f32 %v3254_v17, %v3223_v5  ;;  %4288 = vmatprep.subr.bf16.mxu0 %v5191_v42 }
 0x5f1   :  { %v3274_v23 = vmul.f32 %v3258_v19, %v3224_v62 }
 0x5f2   :  { %v3323_v25 = vadd.f32 %v3304_v20, %v3273_v51 }
 0x5f3   :  { %4289 = vmatpush1.bf16.msra.mxu0 %v5189_v37  ;;  %v3324_v27 = vadd.f32 %v3308_v21, %v3274_v23 }
 0x5f4   :  { %4290 = vmatprep.subr.bf16.mxu0 %v5194_v63  ;;  %vm3331_vm14 = vcmp.gt.f32.partialorder %v3323_v25, 0.0  ;;  %v3339_v24 = vmul.f32 0.2, %v3323_v25 }
 0x5f5   :  { %vm3332_vm15 = vcmp.gt.f32.partialorder %v3324_v27, 0.0  ;;  %v3340_v50 = vmul.f32 0.2, %v3324_v27 }
 0x5f6   :  { %v3347_v1 = vsel %vm3331_vm14, %v3323_v25, %v3339_v24 }
 0x5f7   :  { %4291 = vmatpush1.bf16.msra.mxu0 %v5192_v26  ;;  %v3348_v53 = vsel %vm3332_vm15, %v3324_v27, %v3340_v50  ;;  %v3355_v58 = vpack.c.bf16 %v3347_v1, %v3347_v1 }
 0x5f8   :  { %v3356_v29 = vpack.c.bf16 %v3348_v53, %v3348_v53 }
 0x5fa   :  { %4292 = vmatprep.mubr.bf16.mxu0 %v3356_v29 }
 0x5fb   :  { %4293 = vmatmul.mubr.bf16.vlgmr.msra.gmra.mrb[12].mxu0 %v3355_v58 }
 0x6ce   :  { %v4294_v32 = vpop.f32.mrb[12].mxu0 }
 0x6cf   :  { %v4827_v34 = vadd.f32 %v4294_v32, %v3490_v2  ;;  %v4296_v35 = vpop.f32.mrb[13].mxu0 }
 0x6d0   :  { %v4828_v36 = vadd.f32 %v4296_v35, %v3494_v30  ;;  %v4298_v38 = vpop.f32.mrb[14].mxu0 }
 0x6d1   :  { %5223 = vtanh.f32 %v4827_v34  ;;  %v4299_v39 = vpop.f32.mrb[15].mxu0 }
 0x6d2   :  { %5225 = vtanh.f32 %v4828_v36 }
 0x6db   :  { %v5224_v40 = vpop.eup %5223 }
 0x6dc   :  { %v5226_v41 = vpop.eup %5225  ;;  %4303 = vst [vmem:[%s5970_s17] sm:$0xff] %v5224_v40 }
 0x6dd   :  { %4304 = vst [vmem:[%s5970_s17 + $0x8] sm:$0xff] %v5226_v41 }
 0x6de   :  { %4309 = vsyncpa [#allocation3], 1 }
 0x6df   :  { %4310 = vsyncpa [#allocation5], 1 }
 0x6e0   :  { %4311 = vsyncpa [#allocation8], 1 }
 0x6e1   :  { %4312 = vsyncpa [#allocation11], 1 }
 0x6e2   :  { %4313 = vsyncpa [#allocation14], 1 }
 0x6e3   :  { %4314 = vsyncpa [#allocation17], 1 }

</bundles_post_ra>
